<compile_context>
chip_gen: v7x
topology: tpu7x:2x2x1
jax: 0.10.0
libtpu: 0.0.40
codegen_flags: <defaults>
</compile_context>

<pallas_src>
import functools

import jax
import jax.numpy as jnp
from jax import lax
from jax.experimental import pallas as pl
from jax.experimental.pallas import tpu as pltpu

LANE = 128


def _round_up(x, m):
    return ((x + m - 1) // m) * m


# ------------------------- per-generation hardware info ------------------------
@functools.lru_cache(maxsize=1)
def _tpu_gen_info():
    kind = ""
    try:
        kind = jax.devices()[0].device_kind.lower()
    except Exception:
        pass
    is_v5e = ("v5 lite" in kind) or ("v5e" in kind) or ("v5litepod" in kind)
    is_v6 = "v6" in kind
    is_v7 = ("v7" in kind) or ("tpu7" in kind)
    if is_v5e or is_v6:
        vmem_phys = 128 * 1024 * 1024
    else:
        vmem_phys = 64 * 1024 * 1024          # conservative (v7x / unknown)
    try:
        info = pltpu.get_tpu_info()
        cap = getattr(info, "vmem_capacity_bytes", None)
        if cap:
            vmem_phys = int(cap)
    except Exception:
        pass
    # Single budget used for BOTH the tile picker and vmem_limit_bytes; ~18%
    # headroom below physical for compiler-internal scratch / semaphores.
    budget = int(vmem_phys * 0.82)
    return {"is_v5e": is_v5e, "is_v7": is_v7, "vmem_budget_bytes": budget}


# ---------------- probe: single-buffered grid-invariant inputs -----------------
_SINGLE_BUFFER_PROBE = None


def _single_buffer_weights_supported():
    """Probe once whether pipeline_mode=pl.Buffered(1) is accepted for
    grid-invariant inputs on this build; otherwise fall back to default
    double buffering (then accounted at 2x in the VMEM budget)."""
    global _SINGLE_BUFFER_PROBE
    if _SINGLE_BUFFER_PROBE is not None:
        return _SINGLE_BUFFER_PROBE
    try:
        def probe_kernel(w_ref, x_ref, o_ref):
            o_ref[...] = x_ref[...] + w_ref[...]

        w = jnp.full((8, 128), 1.0, jnp.float32)
        x = jnp.full((16, 128), 1.0, jnp.float32)
        out = pl.pallas_call(
            probe_kernel,
            grid=(2,),
            in_specs=[pl.BlockSpec((8, 128), lambda i: (0, 0),
                                   pipeline_mode=pl.Buffered(1)),
                      pl.BlockSpec((8, 128), lambda i: (i, 0))],
            out_specs=pl.BlockSpec((8, 128), lambda i: (i, 0)),
            out_shape=jax.ShapeDtypeStruct((16, 128), jnp.float32),
        )(w, x)
        out = jax.block_until_ready(out)
        _SINGLE_BUFFER_PROBE = bool(jnp.allclose(out, 2.0))
    except Exception:
        _SINGLE_BUFFER_PROBE = False
    return _SINGLE_BUFFER_PROBE


# ----------------------------- fused GRU kernel ------------------------------
def _fused_gru_kernel(n_layers, hp, x_ref, *args):
    """All GRU layers for one (TB,) batch tile, VMEM resident.

    x_ref:            (T, TB, E)    bf16  time-major embedded inputs
    per layer (x4):   wih (E_l,3Hp) bf16, whh (Hp,3Hp) bf16,
                      b_gx (1,3Hp) f32 (bih + folded bhh_{r,z}), b_hn (1,Hp) f32
    out_ref:          (T, TB, Hp)   bf16  last layer's hidden states (time-major)
    hn_ref:           (L, TB, Hp)   f32   final hidden state of every layer
    seq_scr:          (T, TB, Hp)   bf16  inter-layer activation scratch
    gx_scr:           (T, TB, 3Hp)  bf16  pre-projected gates scratch
    """
    w_refs = args[: 4 * n_layers]
    out_ref, hn_ref, seq_scr, gx_scr = args[4 * n_layers:]

    t_len, tb, _ = x_ref.shape
    unroll = True if t_len <= 16 else 8       # full unroll only for short T

    for layer in range(n_layers):
        wih_ref, whh_ref, bgx_ref, bhn_ref = w_refs[4 * layer: 4 * layer + 4]
        last = layer == n_layers - 1
        dst = out_ref if last else seq_scr

        # (1) Batched input projection for the whole tile: one big MXU matmul,
        #     bf16 inputs / f32 accumulation.  bih + folded bhh_r, bhh_z added
        #     here (off the serial per-step path).  Stored bf16.
        inp = x_ref[...] if layer == 0 else seq_scr[...]          # bf16
        e_l = inp.shape[-1]
        gx = jnp.dot(inp.reshape(t_len * tb, e_l), wih_ref[...],
                     preferred_element_type=jnp.float32)
        gx_scr[...] = (gx + bgx_ref[...]).reshape(
            t_len, tb, 3 * hp).astype(jnp.bfloat16)

        whh = whh_ref[...]        # (Hp, 3Hp) bf16 — loaded once, reused for all T
        bhn = bhn_ref[...]        # (1, Hp) f32 — only the new-gate hidden bias

        # (2) Serial recurrence over time.  Gate slices are 128-lane aligned
        #     (Hp multiple of 128); dynamic ref indexing only on the leading axis.
        def step(t, h, whh=whh, bhn=bhn, dst=dst):
            gh = jnp.dot(h.astype(jnp.bfloat16), whh,
                         preferred_element_type=jnp.float32)      # (TB, 3Hp) f32
            gxt = gx_scr[t]                                       # (TB, 3Hp) bf16
            r = jax.nn.sigmoid(gxt[:, :hp] + gh[:, :hp])
            z = jax.nn.sigmoid(gxt[:, hp:2 * hp] + gh[:, hp:2 * hp])
            n = jnp.tanh(gxt[:, 2 * hp:] + r * (gh[:, 2 * hp:] + bhn))
            h_new = (1.0 - z) * n + z * h                         # f32 carry
            dst[t] = h_new.astype(jnp.bfloat16)
            return h_new

        h0 = jnp.zeros((tb, hp), jnp.float32)          # PyTorch default h0 = 0
        h_last = lax.fori_loop(0, t_len, step, h0, unroll=unroll)
        hn_ref[layer] = h_last


def _pick_batch_tile(b, t_len, e, hp, n_layers, weight_bytes, budget,
                     is_v5e, is_v7):
    """Largest batch tile fitting the same VMEM budget passed to the compiler,
    with the (buffered) weights accounted as a fixed cost."""
    per_row = 2 * (t_len * e * 2)            # x block (bf16) x 2 pipeline buffers
    per_row += 2 * (t_len * hp * 2)          # out block (bf16) x 2 pipeline buffers
    per_row += 2 * (n_layers * hp * 4)       # hn block (f32) x 2 pipeline buffers
    per_row += t_len * hp * 2                # inter-layer scratch (bf16)
    per_row += t_len * 3 * hp * 2            # pre-projected gates scratch (bf16)
    per_row += 24 * hp * 4                   # per-step temporaries (rough)
    avail = budget - weight_bytes
    tb = max(1, avail // max(per_row, 1))
    tb = min(tb, b, 128 if is_v5e else 256)  # v5e MXU is 128-wide; 256 elsewhere
    if is_v7 and b >= 32:
        # >=2 batch tiles so the "parallel" grid axis spans both v7x TensorCores
        tb = min(tb, _round_up(-(-b // 2), 16))
    if tb >= b:
        tb = b                               # full dim — always a legal block
    else:
        tb = max(16, (tb // 16) * 16)        # bf16 sublane (16) alignment
    return int(tb)


def fused_gru_forward(x_tm, layers, hp, batch_tile=None):
    """x_tm: (T, B, E) bf16 time-major inputs.
    Returns (out (T,B,Hp) bf16, hn (L,B,Hp) f32)."""
    t_len, b, e = x_tm.shape
    n_layers = len(layers)

    gen = _tpu_gen_info()
    budget = gen["vmem_budget_bytes"]

    single_buf = _single_buffer_weights_supported()
    weight_buf_count = 1 if single_buf else 2

    flat_weights, weight_specs = [], []
    weight_bytes = 0
    for layer in layers:
        for name in ("wih_t", "whh_t", "b_gx", "b_hn"):
            w = layer[name]
            flat_weights.append(w)
            weight_bytes += int(w.size) * w.dtype.itemsize * weight_buf_count
            if single_buf:
                weight_specs.append(pl.BlockSpec(w.shape, lambda i: (0, 0),
                                                 pipeline_mode=pl.Buffered(1)))
            else:
                weight_specs.append(pl.BlockSpec(w.shape, lambda i: (0, 0)))

    tb = batch_tile or _pick_batch_tile(b, t_len, e, hp, n_layers,
                                        weight_bytes, budget,
                                        gen["is_v5e"], gen["is_v7"])
    grid = (pl.cdiv(b, tb),)

    in_specs = [pl.BlockSpec((t_len, tb, e), lambda i: (0, i, 0))] + weight_specs
    out_specs = (
        pl.BlockSpec((t_len, tb, hp), lambda i: (0, i, 0)),
        pl.BlockSpec((n_layers, tb, hp), lambda i: (0, i, 0)),
    )
    out_shape = (
        jax.ShapeDtypeStruct((t_len, b, hp), jnp.bfloat16),
        jax.ShapeDtypeStruct((n_layers, b, hp), jnp.float32),
    )

    kernel = functools.partial(_fused_gru_kernel, n_layers, hp)
    out, hn = pl.pallas_call(
        kernel,
        grid=grid,
        in_specs=in_specs,
        out_specs=out_specs,
        out_shape=out_shape,
        scratch_shapes=[
            pltpu.VMEM((t_len, tb, hp), jnp.bfloat16),       # inter-layer acts
            pltpu.VMEM((t_len, tb, 3 * hp), jnp.bfloat16),   # pre-projected gates
        ],
        compiler_params=pltpu.CompilerParams(
            dimension_semantics=("parallel",),               # batch tiles over TCs
            vmem_limit_bytes=int(budget),                    # same number as picker
        ),
    )(x_tm, *flat_weights)
    return out, hn


# ------------------------------ Encoder wrapper -------------------------------
def init_encoder_params(key, vocab_size, embedding_dim, hidden_dim, n_layers):
    keys = jax.random.split(key, 1 + 4 * n_layers)
    params = {"embedding": jax.random.normal(keys[0], (vocab_size, embedding_dim),
                                             jnp.float32)}
    bound = 1.0 / float(jnp.sqrt(hidden_dim))
    layers = []
    for l in range(n_layers):
        in_dim = embedding_dim if l == 0 else hidden_dim
        k0, k1, k2, k3 = keys[1 + 4 * l: 5 + 4 * l]
        layers.append({
            # stored transposed relative to PyTorch (3H,in)/(3H,H); gate order [r|z|n]
            "wih_t": jax.random.uniform(k0, (in_dim, 3 * hidden_dim), jnp.float32,
                                        -bound, bound),
            "whh_t": jax.random.uniform(k1, (hidden_dim, 3 * hidden_dim), jnp.float32,
                                        -bound, bound),
            "bih": jax.random.uniform(k2, (3 * hidden_dim,), jnp.float32, -bound, bound),
            "bhh": jax.random.uniform(k3, (3 * hidden_dim,), jnp.float32, -bound, bound),
        })
    params["gru"] = layers
    return params


def prepare_encoder_params(params, hidden_dim):
    """Kernel-ready params: per-gate lane padding to Hp, bf16 weights, folded biases."""
    hp = _round_up(hidden_dim, LANE)
    h = hidden_dim

    def pad_gate_cols(w):                     # (K, 3H) -> (K, 3Hp), gate-aligned
        r, z, n = jnp.split(w, 3, axis=-1)
        p = lambda g: jnp.pad(g, ((0, 0), (0, hp - h)))
        return jnp.concatenate([p(r), p(z), p(n)], axis=-1)

    def pad_gate_vec(b):                      # (3H,) -> (3Hp,)
        r, z, n = jnp.split(b, 3)
        p = lambda g: jnp.pad(g, (0, hp - h))
        return jnp.concatenate([p(r), p(z), p(n)])

    prepared_layers = []
    for l, layer in enumerate(params["gru"]):
        wih = pad_gate_cols(layer["wih_t"])
        if l > 0:                             # input of layer>0 is the padded hidden
            wih = jnp.pad(wih, ((0, hp - h), (0, 0)))
        whh = jnp.pad(pad_gate_cols(layer["whh_t"]), ((0, hp - h), (0, 0)))
        bih = pad_gate_vec(layer["bih"])
        bhh = pad_gate_vec(layer["bhh"])
        # fold bhh_r, bhh_z into the batched pre-projection bias; keep bhh_n separate
        b_gx = bih + jnp.concatenate([bhh[:hp], bhh[hp:2 * hp],
                                      jnp.zeros((hp,), jnp.float32)])
        b_hn = bhh[2 * hp:]
        prepared_layers.append({
            "wih_t": wih.astype(jnp.bfloat16),
            "whh_t": whh.astype(jnp.bfloat16),
            "b_gx": b_gx.reshape(1, -1).astype(jnp.float32),
            "b_hn": b_hn.reshape(1, -1).astype(jnp.float32),
        })
    # Populate the Buffered(1) probe cache eagerly (outside any jit trace).
    _single_buffer_weights_supported()
    return {"embedding": params["embedding"].astype(jnp.bfloat16),
            "gru": prepared_layers}


@functools.partial(jax.jit, static_argnames=("hidden_dim",))
def encoder_forward(tokens, prepared, *, hidden_dim):
    # embedding lookup (bf16) + identity dropout (eval-mode), produced time-major
    x_tm = jnp.take(prepared["embedding"], tokens.T, axis=0)      # (T, B, E) bf16
    hp = prepared["gru"][0]["whh_t"].shape[0]
    out_tm, hn = fused_gru_forward(x_tm, prepared["gru"], hp)
    # transpose + lane slice on the bf16 output (half the HBM traffic of f32);
    # outputs stay bf16 (weights are bf16 anyway), hidden stays f32.
    outputs = jnp.swapaxes(out_tm, 0, 1)[:, :, :hidden_dim]       # (B, T, H) bf16
    hidden = hn[:, :, :hidden_dim]                                # (L, B, H) f32
    return outputs, hidden


# ------------------------------ pure-JAX reference -----------------------------
def encoder_reference(tokens, params):
    """PyTorch-semantics GRU with the same precision policy as the kernel
    (bf16 matmul inputs, f32 accumulation / elementwise), unpadded weights."""
    x = jnp.take(params["embedding"], tokens, axis=0).astype(jnp.float32)  # (B,T,E)
    finals = []
    for layer in params["gru"]:
        b, t_len, _ = x.shape
        h_dim = layer["whh_t"].shape[0]
        wih = layer["wih_t"].astype(jnp.bfloat16)
        whh = layer["whh_t"].astype(jnp.bfloat16)
        bih, bhh = layer["bih"], layer["bhh"]
        h = jnp.zeros((b, h_dim), jnp.float32)
        outs = []
        for t in range(t_len):
            xt = x[:, t, :].astype(jnp.bfloat16)
            gxt = jnp.dot(xt, wih, preferred_element_type=jnp.float32) + bih
            gh = jnp.dot(h.astype(jnp.bfloat16), whh,
                         preferred_element_type=jnp.float32) + bhh
            r = jax.nn.sigmoid(gxt[:, :h_dim] + gh[:, :h_dim])
            z = jax.nn.sigmoid(gxt[:, h_dim:2 * h_dim] + gh[:, h_dim:2 * h_dim])
            n = jnp.tanh(gxt[:, 2 * h_dim:] + r * gh[:, 2 * h_dim:])
            h = (1.0 - z) * n + z * h
            outs.append(h)
        x = jnp.stack(outs, axis=1)
        finals.append(h)
    return x, jnp.stack(finals, axis=0)


if __name__ == "__main__":
    # small synthetic config
    VOCAB, EMB, HID, N_LAYERS, DROPOUT = 50, 32, 32, 2, 0.1
    B, T = 2, 8

    key = jax.random.PRNGKey(0)
    pkey, tkey = jax.random.split(key)
    params = init_encoder_params(pkey, VOCAB, EMB, HID, N_LAYERS)
    prepared = prepare_encoder_params(params, HID)
    tokens = jax.random.randint(tkey, (B, T), 0, VOCAB, dtype=jnp.int32)

    outputs, hidden = encoder_forward(tokens, prepared, hidden_dim=HID)
    outputs, hidden = jax.block_until_ready((outputs, hidden))

    ref_out, ref_hid = encoder_reference(tokens, params)
    assert outputs.shape == (B, T, HID) and hidden.shape == (N_LAYERS, B, HID)
    # outputs are bf16 (kernel writeback dtype); compare in f32 with bf16-level tol
    assert jnp.allclose(outputs.astype(jnp.float32), ref_out, atol=1e-2, rtol=1e-2)
    assert jnp.allclose(hidden, ref_hid, atol=1e-2, rtol=1e-2)

    print("KERNEL_OK")
</pallas_src>

<mosaic_0001>
module attributes {stable_mosaic.version = 11 : i64} {
  func.func @probe_kernel(%arg0: i32, %arg1: memref<8x128xf32, #tpu.memory_space<vmem>>, %arg2: memref<8x128xf32, #tpu.memory_space<vmem>>, %arg3: memref<8x128xf32, #tpu.memory_space<vmem>>) attributes {dimension_semantics = [#tpu.dimension_semantics<arbitrary>], iteration_bounds = array<i64: 2>, scalar_prefetch = 0 : i64, scratch_operands = 0 : i64, tpu.core_type = #tpu.core_type<tc>, window_params = [{pipeline_mode = #tpu.pipeline_mode<synchronous>, transform_indices = @transform_0, window_bounds = array<i64: 8, 128>}, {transform_indices = @transform_1, window_bounds = array<i64: 8, 128>}, {transform_indices = @transform_2, window_bounds = array<i64: 8, 128>}]} {
    %c0 = arith.constant 0 : index
    %c0_0 = arith.constant 0 : index
    %0 = vector.load %arg2[%c0, %c0_0] : memref<8x128xf32, #tpu.memory_space<vmem>>, vector<8x128xf32>
    %c0_1 = arith.constant 0 : index
    %c0_2 = arith.constant 0 : index
    %1 = vector.load %arg1[%c0_1, %c0_2] : memref<8x128xf32, #tpu.memory_space<vmem>>, vector<8x128xf32>
    %2 = arith.addf %0, %1 : vector<8x128xf32>
    %c0_3 = arith.constant 0 : index
    %c0_4 = arith.constant 0 : index
    %3 = vector.load %arg3[%c0_3, %c0_4] : memref<8x128xf32, #tpu.memory_space<vmem>>, vector<8x128xf32>
    tpu.vector_store %arg3[%c0_3, %c0_4], %2 {strides = array<i32>} : memref<8x128xf32, #tpu.memory_space<vmem>>, vector<8x128xf32>,
    return
  }
  func.func @transform_0(%arg0: i32) -> (i32, i32) {
    %c0_i32 = arith.constant 0 : i32
    %c0_i32_0 = arith.constant 0 : i32
    %c0_i32_1 = arith.constant 0 : i32
    return %c0_i32, %c0_i32_0 : i32, i32
  }
  func.func @transform_1(%arg0: i32) -> (i32, i32) {
    %c0_i32 = arith.constant 0 : i32
    %c0_i32_0 = arith.constant 0 : i32
    return %arg0, %c0_i32 : i32, i32
  }
  func.func @transform_2(%arg0: i32) -> (i32, i32) {
    %c0_i32 = arith.constant 0 : i32
    %c0_i32_0 = arith.constant 0 : i32
    return %arg0, %c0_i32 : i32, i32
  }
}

module attributes {stable_mosaic.version = 11 : i64} {
  func.func @_fused_gru_kernel(%arg0: i32, %arg1: memref<8x2x32xbf16, #tpu.memory_space<vmem>>, %arg2: memref<32x384xbf16, #tpu.memory_space<vmem>>, %arg3: memref<128x384xbf16, #tpu.memory_space<vmem>>, %arg4: memref<1x384xf32, #tpu.memory_space<vmem>>, %arg5: memref<1x128xf32, #tpu.memory_space<vmem>>, %arg6: memref<128x384xbf16, #tpu.memory_space<vmem>>, %arg7: memref<128x384xbf16, #tpu.memory_space<vmem>>, %arg8: memref<1x384xf32, #tpu.memory_space<vmem>>, %arg9: memref<1x128xf32, #tpu.memory_space<vmem>>, %arg10: memref<8x2x128xbf16, #tpu.memory_space<vmem>>, %arg11: memref<2x2x128xf32, #tpu.memory_space<vmem>>, %arg12: memref<8x2x128xbf16, #tpu.memory_space<vmem>>, %arg13: memref<8x2x384xbf16, #tpu.memory_space<vmem>>) attributes {dimension_semantics = [#tpu.dimension_semantics<parallel>], iteration_bounds = array<i64: 1>, scalar_prefetch = 0 : i64, scratch_operands = 2 : i64, tpu.core_type = #tpu.core_type<tc>, window_params = [{transform_indices = @transform_0, window_bounds = array<i64: 8, 2, 32>}, {pipeline_mode = #tpu.pipeline_mode<synchronous>, transform_indices = @transform_1, window_bounds = array<i64: 32, 384>}, {pipeline_mode = #tpu.pipeline_mode<synchronous>, transform_indices = @transform_2, window_bounds = array<i64: 128, 384>}, {pipeline_mode = #tpu.pipeline_mode<synchronous>, transform_indices = @transform_3, window_bounds = array<i64: 1, 384>}, {pipeline_mode = #tpu.pipeline_mode<synchronous>, transform_indices = @transform_4, window_bounds = array<i64: 1, 128>}, {pipeline_mode = #tpu.pipeline_mode<synchronous>, transform_indices = @transform_5, window_bounds = array<i64: 128, 384>}, {pipeline_mode = #tpu.pipeline_mode<synchronous>, transform_indices = @transform_6, window_bounds = array<i64: 128, 384>}, {pipeline_mode = #tpu.pipeline_mode<synchronous>, transform_indices = @transform_7, window_bounds = array<i64: 1, 384>}, {pipeline_mode = #tpu.pipeline_mode<synchronous>, transform_indices = @transform_8, window_bounds = array<i64: 1, 128>}, {transform_indices = @transform_9, window_bounds = array<i64: 8, 2, 128>}, {transform_indices = @transform_10, window_bounds = array<i64: 2, 2, 128>}]} {
    %c0 = arith.constant 0 : index
    %c0_0 = arith.constant 0 : index
    %c0_1 = arith.constant 0 : index
    %0 = vector.load %arg1[%c0, %c0_0, %c0_1] : memref<8x2x32xbf16, #tpu.memory_space<vmem>>, vector<8x2x32xbf16>
    %1 = vector.shape_cast %0 : vector<8x2x32xbf16> to vector<16x32xbf16>
    %c0_2 = arith.constant 0 : index
    %c0_3 = arith.constant 0 : index
    %2 = vector.load %arg2[%c0_2, %c0_3] : memref<32x384xbf16, #tpu.memory_space<vmem>>, vector<32x384xbf16>
    %cst = arith.constant dense<0.000000e+00> : vector<16x384xf32>
    %3 = tpu.matmul %1, %2, %cst {dimension_numbers = #tpu.dot_dimension_numbers<[1], [0], [0], [1], [0, 0, 1, 1], [], []>} : vector<16x32xbf16>, vector<32x384xbf16>, vector<16x384xf32> -> vector<16x384xf32>
    %c0_4 = arith.constant 0 : index
    %c0_5 = arith.constant 0 : index
    %4 = vector.load %arg4[%c0_4, %c0_5] : memref<1x384xf32, #tpu.memory_space<vmem>>, vector<1x384xf32>
    %5 = vector.broadcast %4 : vector<1x384xf32> to vector<16x384xf32>
    %6 = arith.addf %3, %5 : vector<16x384xf32>
    %7 = vector.shape_cast %6 : vector<16x384xf32> to vector<8x2x384xf32>
    %8 = arith.truncf %7 : vector<8x2x384xf32> to vector<8x2x384xbf16>
    %c0_6 = arith.constant 0 : index
    %c0_7 = arith.constant 0 : index
    %c0_8 = arith.constant 0 : index
    %9 = vector.load %arg13[%c0_6, %c0_7, %c0_8] : memref<8x2x384xbf16, #tpu.memory_space<vmem>>, vector<8x2x384xbf16>
    tpu.vector_store %arg13[%c0_6, %c0_7, %c0_8], %8 {strides = array<i32>} : memref<8x2x384xbf16, #tpu.memory_space<vmem>>, vector<8x2x384xbf16>,
    %c0_9 = arith.constant 0 : index
    %c0_10 = arith.constant 0 : index
    %10 = vector.load %arg3[%c0_9, %c0_10] : memref<128x384xbf16, #tpu.memory_space<vmem>>, vector<128x384xbf16>
    %c0_11 = arith.constant 0 : index
    %c0_12 = arith.constant 0 : index
    %11 = vector.load %arg5[%c0_11, %c0_12] : memref<1x128xf32, #tpu.memory_space<vmem>>, vector<1x128xf32>
    %cst_13 = arith.constant 0.000000e+00 : f32
    %12 = vector.broadcast %cst_13 : f32 to vector<2x128xf32>
    %c0_i32 = arith.constant 0 : i32
    %13 = arith.truncf %12 : vector<2x128xf32> to vector<2x128xbf16>
    %cst_14 = arith.constant dense<0.000000e+00> : vector<2x384xf32>
    %14 = tpu.matmul %13, %10, %cst_14 {dimension_numbers = #tpu.dot_dimension_numbers<[1], [0], [0], [1], [0, 0, 1, 1], [], []>} : vector<2x128xbf16>, vector<128x384xbf16>, vector<2x384xf32> -> vector<2x384xf32>
    %15 = arith.index_cast %c0_i32 : i32 to index
    %c0_15 = arith.constant 0 : index
    %c0_16 = arith.constant 0 : index
    %16 = vector.load %arg13[%15, %c0_15, %c0_16] : memref<8x2x384xbf16, #tpu.memory_space<vmem>>, vector<1x2x384xbf16>
    %17 = vector.shape_cast %16 : vector<1x2x384xbf16> to vector<2x384xbf16>
    %18 = vector.extract_strided_slice %17 {offsets = [0, 0], sizes = [2, 128], strides = [1, 1]} : vector<2x384xbf16> to vector<2x128xbf16>
    %19 = vector.extract_strided_slice %14 {offsets = [0, 0], sizes = [2, 128], strides = [1, 1]} : vector<2x384xf32> to vector<2x128xf32>
    %20 = arith.extf %18 : vector<2x128xbf16> to vector<2x128xf32>
    %21 = arith.addf %20, %19 : vector<2x128xf32>
    %22 = arith.negf %21 : vector<2x128xf32>
    %23 = math.exp %22 : vector<2x128xf32>
    %cst_17 = arith.constant 1.000000e+00 : f32
    %24 = vector.broadcast %cst_17 : f32 to vector<2x128xf32>
    %25 = arith.addf %24, %23 : vector<2x128xf32>
    %26 = arith.divf %24, %25 : vector<2x128xf32>
    %27 = vector.extract_strided_slice %17 {offsets = [0, 128], sizes = [2, 128], strides = [1, 1]} : vector<2x384xbf16> to vector<2x128xbf16>
    %28 = vector.extract_strided_slice %14 {offsets = [0, 128], sizes = [2, 128], strides = [1, 1]} : vector<2x384xf32> to vector<2x128xf32>
    %29 = arith.extf %27 : vector<2x128xbf16> to vector<2x128xf32>
    %30 = arith.addf %29, %28 : vector<2x128xf32>
    %31 = arith.negf %30 : vector<2x128xf32>
    %32 = math.exp %31 : vector<2x128xf32>
    %cst_18 = arith.constant 1.000000e+00 : f32
    %33 = vector.broadcast %cst_18 : f32 to vector<2x128xf32>
    %34 = arith.addf %33, %32 : vector<2x128xf32>
    %35 = arith.divf %33, %34 : vector<2x128xf32>
    %36 = vector.extract_strided_slice %17 {offsets = [0, 256], sizes = [2, 128], strides = [1, 1]} : vector<2x384xbf16> to vector<2x128xbf16>
    %37 = vector.extract_strided_slice %14 {offsets = [0, 256], sizes = [2, 128], strides = [1, 1]} : vector<2x384xf32> to vector<2x128xf32>
    %38 = vector.broadcast %11 : vector<1x128xf32> to vector<2x128xf32>
    %39 = arith.addf %37, %38 : vector<2x128xf32>
    %40 = arith.mulf %26, %39 : vector<2x128xf32>
    %41 = arith.extf %36 : vector<2x128xbf16> to vector<2x128xf32>
    %42 = arith.addf %41, %40 : vector<2x128xf32>
    %43 = math.tanh %42 : vector<2x128xf32>
    %cst_19 = arith.constant 1.000000e+00 : f32
    %44 = vector.broadcast %cst_19 : f32 to vector<2x128xf32>
    %45 = arith.subf %44, %35 : vector<2x128xf32>
    %46 = arith.mulf %45, %43 : vector<2x128xf32>
    %47 = arith.mulf %35, %12 : vector<2x128xf32>
    %48 = arith.addf %46, %47 : vector<2x128xf32>
    %49 = arith.truncf %48 : vector<2x128xf32> to vector<2x128xbf16>
    %50 = arith.index_cast %c0_i32 : i32 to index
    %c0_20 = arith.constant 0 : index
    %c0_21 = arith.constant 0 : index
    %51 = vector.load %arg12[%50, %c0_20, %c0_21] : memref<8x2x128xbf16, #tpu.memory_space<vmem>>, vector<1x2x128xbf16>
    %52 = vector.shape_cast %51 : vector<1x2x128xbf16> to vector<2x128xbf16>
    %53 = vector.shape_cast %49 : vector<2x128xbf16> to vector<1x2x128xbf16>
    tpu.vector_store %arg12[%50, %c0_20, %c0_21], %53 {strides = array<i32>} : memref<8x2x128xbf16, #tpu.memory_space<vmem>>, vector<1x2x128xbf16>,
    %c1_i32 = arith.constant 1 : i32
    %54 = arith.truncf %48 : vector<2x128xf32> to vector<2x128xbf16>
    %cst_22 = arith.constant dense<0.000000e+00> : vector<2x384xf32>
    %55 = tpu.matmul %54, %10, %cst_22 {dimension_numbers = #tpu.dot_dimension_numbers<[1], [0], [0], [1], [0, 0, 1, 1], [], []>} : vector<2x128xbf16>, vector<128x384xbf16>, vector<2x384xf32> -> vector<2x384xf32>
    %56 = arith.index_cast %c1_i32 : i32 to index
    %c0_23 = arith.constant 0 : index
    %c0_24 = arith.constant 0 : index
    %57 = vector.load %arg13[%56, %c0_23, %c0_24] : memref<8x2x384xbf16, #tpu.memory_space<vmem>>, vector<1x2x384xbf16>
    %58 = vector.shape_cast %57 : vector<1x2x384xbf16> to vector<2x384xbf16>
    %59 = vector.extract_strided_slice %58 {offsets = [0, 0], sizes = [2, 128], strides = [1, 1]} : vector<2x384xbf16> to vector<2x128xbf16>
    %60 = vector.extract_strided_slice %55 {offsets = [0, 0], sizes = [2, 128], strides = [1, 1]} : vector<2x384xf32> to vector<2x128xf32>
    %61 = arith.extf %59 : vector<2x128xbf16> to vector<2x128xf32>
    %62 = arith.addf %61, %60 : vector<2x128xf32>
    %63 = arith.negf %62 : vector<2x128xf32>
    %64 = math.exp %63 : vector<2x128xf32>
    %cst_25 = arith.constant 1.000000e+00 : f32
    %65 = vector.broadcast %cst_25 : f32 to vector<2x128xf32>
    %66 = arith.addf %65, %64 : vector<2x128xf32>
    %67 = arith.divf %65, %66 : vector<2x128xf32>
    %68 = vector.extract_strided_slice %58 {offsets = [0, 128], sizes = [2, 128], strides = [1, 1]} : vector<2x384xbf16> to vector<2x128xbf16>
    %69 = vector.extract_strided_slice %55 {offsets = [0, 128], sizes = [2, 128], strides = [1, 1]} : vector<2x384xf32> to vector<2x128xf32>
    %70 = arith.extf %68 : vector<2x128xbf16> to vector<2x128xf32>
    %71 = arith.addf %70, %69 : vector<2x128xf32>
    %72 = arith.negf %71 : vector<2x128xf32>
    %73 = math.exp %72 : vector<2x128xf32>
    %cst_26 = arith.constant 1.000000e+00 : f32
    %74 = vector.broadcast %cst_26 : f32 to vector<2x128xf32>
    %75 = arith.addf %74, %73 : vector<2x128xf32>
    %76 = arith.divf %74, %75 : vector<2x128xf32>
    %77 = vector.extract_strided_slice %58 {offsets = [0, 256], sizes = [2, 128], strides = [1, 1]} : vector<2x384xbf16> to vector<2x128xbf16>
    %78 = vector.extract_strided_slice %55 {offsets = [0, 256], sizes = [2, 128], strides = [1, 1]} : vector<2x384xf32> to vector<2x128xf32>
    %79 = vector.broadcast %11 : vector<1x128xf32> to vector<2x128xf32>
    %80 = arith.addf %78, %79 : vector<2x128xf32>
    %81 = arith.mulf %67, %80 : vector<2x128xf32>
    %82 = arith.extf %77 : vector<2x128xbf16> to vector<2x128xf32>
    %83 = arith.addf %82, %81 : vector<2x128xf32>
    %84 = math.tanh %83 : vector<2x128xf32>
    %cst_27 = arith.constant 1.000000e+00 : f32
    %85 = vector.broadcast %cst_27 : f32 to vector<2x128xf32>
    %86 = arith.subf %85, %76 : vector<2x128xf32>
    %87 = arith.mulf %86, %84 : vector<2x128xf32>
    %88 = arith.mulf %76, %48 : vector<2x128xf32>
    %89 = arith.addf %87, %88 : vector<2x128xf32>
    %90 = arith.truncf %89 : vector<2x128xf32> to vector<2x128xbf16>
    %91 = arith.index_cast %c1_i32 : i32 to index
    %c0_28 = arith.constant 0 : index
    %c0_29 = arith.constant 0 : index
    %92 = vector.load %arg12[%91, %c0_28, %c0_29] : memref<8x2x128xbf16, #tpu.memory_space<vmem>>, vector<1x2x128xbf16>
    %93 = vector.shape_cast %92 : vector<1x2x128xbf16> to vector<2x128xbf16>
    %94 = vector.shape_cast %90 : vector<2x128xbf16> to vector<1x2x128xbf16>
    tpu.vector_store %arg12[%91, %c0_28, %c0_29], %94 {strides = array<i32>} : memref<8x2x128xbf16, #tpu.memory_space<vmem>>, vector<1x2x128xbf16>,
    %c2_i32 = arith.constant 2 : i32
    %95 = arith.truncf %89 : vector<2x128xf32> to vector<2x128xbf16>
    %cst_30 = arith.constant dense<0.000000e+00> : vector<2x384xf32>
    %96 = tpu.matmul %95, %10, %cst_30 {dimension_numbers = #tpu.dot_dimension_numbers<[1], [0], [0], [1], [0, 0, 1, 1], [], []>} : vector<2x128xbf16>, vector<128x384xbf16>, vector<2x384xf32> -> vector<2x384xf32>
    %97 = arith.index_cast %c2_i32 : i32 to index
    %c0_31 = arith.constant 0 : index
    %c0_32 = arith.constant 0 : index
    %98 = vector.load %arg13[%97, %c0_31, %c0_32] : memref<8x2x384xbf16, #tpu.memory_space<vmem>>, vector<1x2x384xbf16>
    %99 = vector.shape_cast %98 : vector<1x2x384xbf16> to vector<2x384xbf16>
    %100 = vector.extract_strided_slice %99 {offsets = [0, 0], sizes = [2, 128], strides = [1, 1]} : vector<2x384xbf16> to vector<2x128xbf16>
    %101 = vector.extract_strided_slice %96 {offsets = [0, 0], sizes = [2, 128], strides = [1, 1]} : vector<2x384xf32> to vector<2x128xf32>
    %102 = arith.extf %100 : vector<2x128xbf16> to vector<2x128xf32>
    %103 = arith.addf %102, %101 : vector<2x128xf32>
    %104 = arith.negf %103 : vector<2x128xf32>
    %105 = math.exp %104 : vector<2x128xf32>
    %cst_33 = arith.constant 1.000000e+00 : f32
    %106 = vector.broadcast %cst_33 : f32 to vector<2x128xf32>
    %107 = arith.addf %106, %105 : vector<2x128xf32>
    %108 = arith.divf %106, %107 : vector<2x128xf32>
    %109 = vector.extract_strided_slice %99 {offsets = [0, 128], sizes = [2, 128], strides = [1, 1]} : vector<2x384xbf16> to vector<2x128xbf16>
    %110 = vector.extract_strided_slice %96 {offsets = [0, 128], sizes = [2, 128], strides = [1, 1]} : vector<2x384xf32> to vector<2x128xf32>
    %111 = arith.extf %109 : vector<2x128xbf16> to vector<2x128xf32>
    %112 = arith.addf %111, %110 : vector<2x128xf32>
    %113 = arith.negf %112 : vector<2x128xf32>
    %114 = math.exp %113 : vector<2x128xf32>
    %cst_34 = arith.constant 1.000000e+00 : f32
    %115 = vector.broadcast %cst_34 : f32 to vector<2x128xf32>
    %116 = arith.addf %115, %114 : vector<2x128xf32>
    %117 = arith.divf %115, %116 : vector<2x128xf32>
    %118 = vector.extract_strided_slice %99 {offsets = [0, 256], sizes = [2, 128], strides = [1, 1]} : vector<2x384xbf16> to vector<2x128xbf16>
    %119 = vector.extract_strided_slice %96 {offsets = [0, 256], sizes = [2, 128], strides = [1, 1]} : vector<2x384xf32> to vector<2x128xf32>
    %120 = vector.broadcast %11 : vector<1x128xf32> to vector<2x128xf32>
    %121 = arith.addf %119, %120 : vector<2x128xf32>
    %122 = arith.mulf %108, %121 : vector<2x128xf32>
    %123 = arith.extf %118 : vector<2x128xbf16> to vector<2x128xf32>
    %124 = arith.addf %123, %122 : vector<2x128xf32>
    %125 = math.tanh %124 : vector<2x128xf32>
    %cst_35 = arith.constant 1.000000e+00 : f32
    %126 = vector.broadcast %cst_35 : f32 to vector<2x128xf32>
    %127 = arith.subf %126, %117 : vector<2x128xf32>
    %128 = arith.mulf %127, %125 : vector<2x128xf32>
    %129 = arith.mulf %117, %89 : vector<2x128xf32>
    %130 = arith.addf %128, %129 : vector<2x128xf32>
    %131 = arith.truncf %130 : vector<2x128xf32> to vector<2x128xbf16>
    %132 = arith.index_cast %c2_i32 : i32 to index
    %c0_36 = arith.constant 0 : index
    %c0_37 = arith.constant 0 : index
    %133 = vector.load %arg12[%132, %c0_36, %c0_37] : memref<8x2x128xbf16, #tpu.memory_space<vmem>>, vector<1x2x128xbf16>
    %134 = vector.shape_cast %133 : vector<1x2x128xbf16> to vector<2x128xbf16>
    %135 = vector.shape_cast %131 : vector<2x128xbf16> to vector<1x2x128xbf16>
    tpu.vector_store %arg12[%132, %c0_36, %c0_37], %135 {strides = array<i32>} : memref<8x2x128xbf16, #tpu.memory_space<vmem>>, vector<1x2x128xbf16>,
    %c3_i32 = arith.constant 3 : i32
    %136 = arith.truncf %130 : vector<2x128xf32> to vector<2x128xbf16>
    %cst_38 = arith.constant dense<0.000000e+00> : vector<2x384xf32>
    %137 = tpu.matmul %136, %10, %cst_38 {dimension_numbers = #tpu.dot_dimension_numbers<[1], [0], [0], [1], [0, 0, 1, 1], [], []>} : vector<2x128xbf16>, vector<128x384xbf16>, vector<2x384xf32> -> vector<2x384xf32>
    %138 = arith.index_cast %c3_i32 : i32 to index
    %c0_39 = arith.constant 0 : index
    %c0_40 = arith.constant 0 : index
    %139 = vector.load %arg13[%138, %c0_39, %c0_40] : memref<8x2x384xbf16, #tpu.memory_space<vmem>>, vector<1x2x384xbf16>
    %140 = vector.shape_cast %139 : vector<1x2x384xbf16> to vector<2x384xbf16>
    %141 = vector.extract_strided_slice %140 {offsets = [0, 0], sizes = [2, 128], strides = [1, 1]} : vector<2x384xbf16> to vector<2x128xbf16>
    %142 = vector.extract_strided_slice %137 {offsets = [0, 0], sizes = [2, 128], strides = [1, 1]} : vector<2x384xf32> to vector<2x128xf32>
    %143 = arith.extf %141 : vector<2x128xbf16> to vector<2x128xf32>
    %144 = arith.addf %143, %142 : vector<2x128xf32>
    %145 = arith.negf %144 : vector<2x128xf32>
    %146 = math.exp %145 : vector<2x128xf32>
    %cst_41 = arith.constant 1.000000e+00 : f32
    %147 = vector.broadcast %cst_41 : f32 to vector<2x128xf32>
    %148 = arith.addf %147, %146 : vector<2x128xf32>
    %149 = arith.divf %147, %148 : vector<2x128xf32>
    %150 = vector.extract_strided_slice %140 {offsets = [0, 128], sizes = [2, 128], strides = [1, 1]} : vector<2x384xbf16> to vector<2x128xbf16>
    %151 = vector.extract_strided_slice %137 {offsets = [0, 128], sizes = [2, 128], strides = [1, 1]} : vector<2x384xf32> to vector<2x128xf32>
    %152 = arith.extf %150 : vector<2x128xbf16> to vector<2x128xf32>
    %153 = arith.addf %152, %151 : vector<2x128xf32>
    %154 = arith.negf %153 : vector<2x128xf32>
    %155 = math.exp %154 : vector<2x128xf32>
    %cst_42 = arith.constant 1.000000e+00 : f32
    %156 = vector.broadcast %cst_42 : f32 to vector<2x128xf32>
    %157 = arith.addf %156, %155 : vector<2x128xf32>
    %158 = arith.divf %156, %157 : vector<2x128xf32>
    %159 = vector.extract_strided_slice %140 {offsets = [0, 256], sizes = [2, 128], strides = [1, 1]} : vector<2x384xbf16> to vector<2x128xbf16>
    %160 = vector.extract_strided_slice %137 {offsets = [0, 256], sizes = [2, 128], strides = [1, 1]} : vector<2x384xf32> to vector<2x128xf32>
    %161 = vector.broadcast %11 : vector<1x128xf32> to vector<2x128xf32>
    %162 = arith.addf %160, %161 : vector<2x128xf32>
    %163 = arith.mulf %149, %162 : vector<2x128xf32>
    %164 = arith.extf %159 : vector<2x128xbf16> to vector<2x128xf32>
    %165 = arith.addf %164, %163 : vector<2x128xf32>
    %166 = math.tanh %165 : vector<2x128xf32>
    %cst_43 = arith.constant 1.000000e+00 : f32
    %167 = vector.broadcast %cst_43 : f32 to vector<2x128xf32>
    %168 = arith.subf %167, %158 : vector<2x128xf32>
    %169 = arith.mulf %168, %166 : vector<2x128xf32>
    %170 = arith.mulf %158, %130 : vector<2x128xf32>
    %171 = arith.addf %169, %170 : vector<2x128xf32>
    %172 = arith.truncf %171 : vector<2x128xf32> to vector<2x128xbf16>
    %173 = arith.index_cast %c3_i32 : i32 to index
    %c0_44 = arith.constant 0 : index
    %c0_45 = arith.constant 0 : index
    %174 = vector.load %arg12[%173, %c0_44, %c0_45] : memref<8x2x128xbf16, #tpu.memory_space<vmem>>, vector<1x2x128xbf16>
    %175 = vector.shape_cast %174 : vector<1x2x128xbf16> to vector<2x128xbf16>
    %176 = vector.shape_cast %172 : vector<2x128xbf16> to vector<1x2x128xbf16>
    tpu.vector_store %arg12[%173, %c0_44, %c0_45], %176 {strides = array<i32>} : memref<8x2x128xbf16, #tpu.memory_space<vmem>>, vector<1x2x128xbf16>,
    %c4_i32 = arith.constant 4 : i32
    %177 = arith.truncf %171 : vector<2x128xf32> to vector<2x128xbf16>
    %cst_46 = arith.constant dense<0.000000e+00> : vector<2x384xf32>
    %178 = tpu.matmul %177, %10, %cst_46 {dimension_numbers = #tpu.dot_dimension_numbers<[1], [0], [0], [1], [0, 0, 1, 1], [], []>} : vector<2x128xbf16>, vector<128x384xbf16>, vector<2x384xf32> -> vector<2x384xf32>
    %179 = arith.index_cast %c4_i32 : i32 to index
    %c0_47 = arith.constant 0 : index
    %c0_48 = arith.constant 0 : index
    %180 = vector.load %arg13[%179, %c0_47, %c0_48] : memref<8x2x384xbf16, #tpu.memory_space<vmem>>, vector<1x2x384xbf16>
    %181 = vector.shape_cast %180 : vector<1x2x384xbf16> to vector<2x384xbf16>
    %182 = vector.extract_strided_slice %181 {offsets = [0, 0], sizes = [2, 128], strides = [1, 1]} : vector<2x384xbf16> to vector<2x128xbf16>
    %183 = vector.extract_strided_slice %178 {offsets = [0, 0], sizes = [2, 128], strides = [1, 1]} : vector<2x384xf32> to vector<2x128xf32>
    %184 = arith.extf %182 : vector<2x128xbf16> to vector<2x128xf32>
    %185 = arith.addf %184, %183 : vector<2x128xf32>
    %186 = arith.negf %185 : vector<2x128xf32>
    %187 = math.exp %186 : vector<2x128xf32>
    %cst_49 = arith.constant 1.000000e+00 : f32
    %188 = vector.broadcast %cst_49 : f32 to vector<2x128xf32>
    %189 = arith.addf %188, %187 : vector<2x128xf32>
    %190 = arith.divf %188, %189 : vector<2x128xf32>
    %191 = vector.extract_strided_slice %181 {offsets = [0, 128], sizes = [2, 128], strides = [1, 1]} : vector<2x384xbf16> to vector<2x128xbf16>
    %192 = vector.extract_strided_slice %178 {offsets = [0, 128], sizes = [2, 128], strides = [1, 1]} : vector<2x384xf32> to vector<2x128xf32>
    %193 = arith.extf %191 : vector<2x128xbf16> to vector<2x128xf32>
    %194 = arith.addf %193, %192 : vector<2x128xf32>
    %195 = arith.negf %194 : vector<2x128xf32>
    %196 = math.exp %195 : vector<2x128xf32>
    %cst_50 = arith.constant 1.000000e+00 : f32
    %197 = vector.broadcast %cst_50 : f32 to vector<2x128xf32>
    %198 = arith.addf %197, %196 : vector<2x128xf32>
    %199 = arith.divf %197, %198 : vector<2x128xf32>
    %200 = vector.extract_strided_slice %181 {offsets = [0, 256], sizes = [2, 128], strides = [1, 1]} : vector<2x384xbf16> to vector<2x128xbf16>
    %201 = vector.extract_strided_slice %178 {offsets = [0, 256], sizes = [2, 128], strides = [1, 1]} : vector<2x384xf32> to vector<2x128xf32>
    %202 = vector.broadcast %11 : vector<1x128xf32> to vector<2x128xf32>
    %203 = arith.addf %201, %202 : vector<2x128xf32>
    %204 = arith.mulf %190, %203 : vector<2x128xf32>
    %205 = arith.extf %200 : vector<2x128xbf16> to vector<2x128xf32>
    %206 = arith.addf %205, %204 : vector<2x128xf32>
    %207 = math.tanh %206 : vector<2x128xf32>
    %cst_51 = arith.constant 1.000000e+00 : f32
    %208 = vector.broadcast %cst_51 : f32 to vector<2x128xf32>
    %209 = arith.subf %208, %199 : vector<2x128xf32>
    %210 = arith.mulf %209, %207 : vector<2x128xf32>
    %211 = arith.mulf %199, %171 : vector<2x128xf32>
    %212 = arith.addf %210, %211 : vector<2x128xf32>
    %213 = arith.truncf %212 : vector<2x128xf32> to vector<2x128xbf16>
    %214 = arith.index_cast %c4_i32 : i32 to index
    %c0_52 = arith.constant 0 : index
    %c0_53 = arith.constant 0 : index
    %215 = vector.load %arg12[%214, %c0_52, %c0_53] : memref<8x2x128xbf16, #tpu.memory_space<vmem>>, vector<1x2x128xbf16>
    %216 = vector.shape_cast %215 : vector<1x2x128xbf16> to vector<2x128xbf16>
    %217 = vector.shape_cast %213 : vector<2x128xbf16> to vector<1x2x128xbf16>
    tpu.vector_store %arg12[%214, %c0_52, %c0_53], %217 {strides = array<i32>} : memref<8x2x128xbf16, #tpu.memory_space<vmem>>, vector<1x2x128xbf16>,
    %c5_i32 = arith.constant 5 : i32
    %218 = arith.truncf %212 : vector<2x128xf32> to vector<2x128xbf16>
    %cst_54 = arith.constant dense<0.000000e+00> : vector<2x384xf32>
    %219 = tpu.matmul %218, %10, %cst_54 {dimension_numbers = #tpu.dot_dimension_numbers<[1], [0], [0], [1], [0, 0, 1, 1], [], []>} : vector<2x128xbf16>, vector<128x384xbf16>, vector<2x384xf32> -> vector<2x384xf32>
    %220 = arith.index_cast %c5_i32 : i32 to index
    %c0_55 = arith.constant 0 : index
    %c0_56 = arith.constant 0 : index
    %221 = vector.load %arg13[%220, %c0_55, %c0_56] : memref<8x2x384xbf16, #tpu.memory_space<vmem>>, vector<1x2x384xbf16>
    %222 = vector.shape_cast %221 : vector<1x2x384xbf16> to vector<2x384xbf16>
    %223 = vector.extract_strided_slice %222 {offsets = [0, 0], sizes = [2, 128], strides = [1, 1]} : vector<2x384xbf16> to vector<2x128xbf16>
    %224 = vector.extract_strided_slice %219 {offsets = [0, 0], sizes = [2, 128], strides = [1, 1]} : vector<2x384xf32> to vector<2x128xf32>
    %225 = arith.extf %223 : vector<2x128xbf16> to vector<2x128xf32>
    %226 = arith.addf %225, %224 : vector<2x128xf32>
    %227 = arith.negf %226 : vector<2x128xf32>
    %228 = math.exp %227 : vector<2x128xf32>
    %cst_57 = arith.constant 1.000000e+00 : f32
    %229 = vector.broadcast %cst_57 : f32 to vector<2x128xf32>
    %230 = arith.addf %229, %228 : vector<2x128xf32>
    %231 = arith.divf %229, %230 : vector<2x128xf32>
    %232 = vector.extract_strided_slice %222 {offsets = [0, 128], sizes = [2, 128], strides = [1, 1]} : vector<2x384xbf16> to vector<2x128xbf16>
    %233 = vector.extract_strided_slice %219 {offsets = [0, 128], sizes = [2, 128], strides = [1, 1]} : vector<2x384xf32> to vector<2x128xf32>
    %234 = arith.extf %232 : vector<2x128xbf16> to vector<2x128xf32>
    %235 = arith.addf %234, %233 : vector<2x128xf32>
    %236 = arith.negf %235 : vector<2x128xf32>
    %237 = math.exp %236 : vector<2x128xf32>
    %cst_58 = arith.constant 1.000000e+00 : f32
    %238 = vector.broadcast %cst_58 : f32 to vector<2x128xf32>
    %239 = arith.addf %238, %237 : vector<2x128xf32>
    %240 = arith.divf %238, %239 : vector<2x128xf32>
    %241 = vector.extract_strided_slice %222 {offsets = [0, 256], sizes = [2, 128], strides = [1, 1]} : vector<2x384xbf16> to vector<2x128xbf16>
    %242 = vector.extract_strided_slice %219 {offsets = [0, 256], sizes = [2, 128], strides = [1, 1]} : vector<2x384xf32> to vector<2x128xf32>
    %243 = vector.broadcast %11 : vector<1x128xf32> to vector<2x128xf32>
    %244 = arith.addf %242, %243 : vector<2x128xf32>
    %245 = arith.mulf %231, %244 : vector<2x128xf32>
    %246 = arith.extf %241 : vector<2x128xbf16> to vector<2x128xf32>
    %247 = arith.addf %246, %245 : vector<2x128xf32>
    %248 = math.tanh %247 : vector<2x128xf32>
    %cst_59 = arith.constant 1.000000e+00 : f32
    %249 = vector.broadcast %cst_59 : f32 to vector<2x128xf32>
    %250 = arith.subf %249, %240 : vector<2x128xf32>
    %251 = arith.mulf %250, %248 : vector<2x128xf32>
    %252 = arith.mulf %240, %212 : vector<2x128xf32>
    %253 = arith.addf %251, %252 : vector<2x128xf32>
    %254 = arith.truncf %253 : vector<2x128xf32> to vector<2x128xbf16>
    %255 = arith.index_cast %c5_i32 : i32 to index
    %c0_60 = arith.constant 0 : index
    %c0_61 = arith.constant 0 : index
    %256 = vector.load %arg12[%255, %c0_60, %c0_61] : memref<8x2x128xbf16, #tpu.memory_space<vmem>>, vector<1x2x128xbf16>
    %257 = vector.shape_cast %256 : vector<1x2x128xbf16> to vector<2x128xbf16>
    %258 = vector.shape_cast %254 : vector<2x128xbf16> to vector<1x2x128xbf16>
    tpu.vector_store %arg12[%255, %c0_60, %c0_61], %258 {strides = array<i32>} : memref<8x2x128xbf16, #tpu.memory_space<vmem>>, vector<1x2x128xbf16>,
    %c6_i32 = arith.constant 6 : i32
    %259 = arith.truncf %253 : vector<2x128xf32> to vector<2x128xbf16>
    %cst_62 = arith.constant dense<0.000000e+00> : vector<2x384xf32>
    %260 = tpu.matmul %259, %10, %cst_62 {dimension_numbers = #tpu.dot_dimension_numbers<[1], [0], [0], [1], [0, 0, 1, 1], [], []>} : vector<2x128xbf16>, vector<128x384xbf16>, vector<2x384xf32> -> vector<2x384xf32>
    %261 = arith.index_cast %c6_i32 : i32 to index
    %c0_63 = arith.constant 0 : index
    %c0_64 = arith.constant 0 : index
    %262 = vector.load %arg13[%261, %c0_63, %c0_64] : memref<8x2x384xbf16, #tpu.memory_space<vmem>>, vector<1x2x384xbf16>
    %263 = vector.shape_cast %262 : vector<1x2x384xbf16> to vector<2x384xbf16>
    %264 = vector.extract_strided_slice %263 {offsets = [0, 0], sizes = [2, 128], strides = [1, 1]} : vector<2x384xbf16> to vector<2x128xbf16>
    %265 = vector.extract_strided_slice %260 {offsets = [0, 0], sizes = [2, 128], strides = [1, 1]} : vector<2x384xf32> to vector<2x128xf32>
    %266 = arith.extf %264 : vector<2x128xbf16> to vector<2x128xf32>
    %267 = arith.addf %266, %265 : vector<2x128xf32>
    %268 = arith.negf %267 : vector<2x128xf32>
    %269 = math.exp %268 : vector<2x128xf32>
    %cst_65 = arith.constant 1.000000e+00 : f32
    %270 = vector.broadcast %cst_65 : f32 to vector<2x128xf32>
    %271 = arith.addf %270, %269 : vector<2x128xf32>
    %272 = arith.divf %270, %271 : vector<2x128xf32>
    %273 = vector.extract_strided_slice %263 {offsets = [0, 128], sizes = [2, 128], strides = [1, 1]} : vector<2x384xbf16> to vector<2x128xbf16>
    %274 = vector.extract_strided_slice %260 {offsets = [0, 128], sizes = [2, 128], strides = [1, 1]} : vector<2x384xf32> to vector<2x128xf32>
    %275 = arith.extf %273 : vector<2x128xbf16> to vector<2x128xf32>
    %276 = arith.addf %275, %274 : vector<2x128xf32>
    %277 = arith.negf %276 : vector<2x128xf32>
    %278 = math.exp %277 : vector<2x128xf32>
    %cst_66 = arith.constant 1.000000e+00 : f32
    %279 = vector.broadcast %cst_66 : f32 to vector<2x128xf32>
    %280 = arith.addf %279, %278 : vector<2x128xf32>
    %281 = arith.divf %279, %280 : vector<2x128xf32>
    %282 = vector.extract_strided_slice %263 {offsets = [0, 256], sizes = [2, 128], strides = [1, 1]} : vector<2x384xbf16> to vector<2x128xbf16>
    %283 = vector.extract_strided_slice %260 {offsets = [0, 256], sizes = [2, 128], strides = [1, 1]} : vector<2x384xf32> to vector<2x128xf32>
    %284 = vector.broadcast %11 : vector<1x128xf32> to vector<2x128xf32>
    %285 = arith.addf %283, %284 : vector<2x128xf32>
    %286 = arith.mulf %272, %285 : vector<2x128xf32>
    %287 = arith.extf %282 : vector<2x128xbf16> to vector<2x128xf32>
    %288 = arith.addf %287, %286 : vector<2x128xf32>
    %289 = math.tanh %288 : vector<2x128xf32>
    %cst_67 = arith.constant 1.000000e+00 : f32
    %290 = vector.broadcast %cst_67 : f32 to vector<2x128xf32>
    %291 = arith.subf %290, %281 : vector<2x128xf32>
    %292 = arith.mulf %291, %289 : vector<2x128xf32>
    %293 = arith.mulf %281, %253 : vector<2x128xf32>
    %294 = arith.addf %292, %293 : vector<2x128xf32>
    %295 = arith.truncf %294 : vector<2x128xf32> to vector<2x128xbf16>
    %296 = arith.index_cast %c6_i32 : i32 to index
    %c0_68 = arith.constant 0 : index
    %c0_69 = arith.constant 0 : index
    %297 = vector.load %arg12[%296, %c0_68, %c0_69] : memref<8x2x128xbf16, #tpu.memory_space<vmem>>, vector<1x2x128xbf16>
    %298 = vector.shape_cast %297 : vector<1x2x128xbf16> to vector<2x128xbf16>
    %299 = vector.shape_cast %295 : vector<2x128xbf16> to vector<1x2x128xbf16>
    tpu.vector_store %arg12[%296, %c0_68, %c0_69], %299 {strides = array<i32>} : memref<8x2x128xbf16, #tpu.memory_space<vmem>>, vector<1x2x128xbf16>,
    %c7_i32 = arith.constant 7 : i32
    %300 = arith.truncf %294 : vector<2x128xf32> to vector<2x128xbf16>
    %cst_70 = arith.constant dense<0.000000e+00> : vector<2x384xf32>
    %301 = tpu.matmul %300, %10, %cst_70 {dimension_numbers = #tpu.dot_dimension_numbers<[1], [0], [0], [1], [0, 0, 1, 1], [], []>} : vector<2x128xbf16>, vector<128x384xbf16>, vector<2x384xf32> -> vector<2x384xf32>
    %302 = arith.index_cast %c7_i32 : i32 to index
    %c0_71 = arith.constant 0 : index
    %c0_72 = arith.constant 0 : index
    %303 = vector.load %arg13[%302, %c0_71, %c0_72] : memref<8x2x384xbf16, #tpu.memory_space<vmem>>, vector<1x2x384xbf16>
    %304 = vector.shape_cast %303 : vector<1x2x384xbf16> to vector<2x384xbf16>
    %305 = vector.extract_strided_slice %304 {offsets = [0, 0], sizes = [2, 128], strides = [1, 1]} : vector<2x384xbf16> to vector<2x128xbf16>
    %306 = vector.extract_strided_slice %301 {offsets = [0, 0], sizes = [2, 128], strides = [1, 1]} : vector<2x384xf32> to vector<2x128xf32>
    %307 = arith.extf %305 : vector<2x128xbf16> to vector<2x128xf32>
    %308 = arith.addf %307, %306 : vector<2x128xf32>
    %309 = arith.negf %308 : vector<2x128xf32>
    %310 = math.exp %309 : vector<2x128xf32>
    %cst_73 = arith.constant 1.000000e+00 : f32
    %311 = vector.broadcast %cst_73 : f32 to vector<2x128xf32>
    %312 = arith.addf %311, %310 : vector<2x128xf32>
    %313 = arith.divf %311, %312 : vector<2x128xf32>
    %314 = vector.extract_strided_slice %304 {offsets = [0, 128], sizes = [2, 128], strides = [1, 1]} : vector<2x384xbf16> to vector<2x128xbf16>
    %315 = vector.extract_strided_slice %301 {offsets = [0, 128], sizes = [2, 128], strides = [1, 1]} : vector<2x384xf32> to vector<2x128xf32>
    %316 = arith.extf %314 : vector<2x128xbf16> to vector<2x128xf32>
    %317 = arith.addf %316, %315 : vector<2x128xf32>
    %318 = arith.negf %317 : vector<2x128xf32>
    %319 = math.exp %318 : vector<2x128xf32>
    %cst_74 = arith.constant 1.000000e+00 : f32
    %320 = vector.broadcast %cst_74 : f32 to vector<2x128xf32>
    %321 = arith.addf %320, %319 : vector<2x128xf32>
    %322 = arith.divf %320, %321 : vector<2x128xf32>
    %323 = vector.extract_strided_slice %304 {offsets = [0, 256], sizes = [2, 128], strides = [1, 1]} : vector<2x384xbf16> to vector<2x128xbf16>
    %324 = vector.extract_strided_slice %301 {offsets = [0, 256], sizes = [2, 128], strides = [1, 1]} : vector<2x384xf32> to vector<2x128xf32>
    %325 = vector.broadcast %11 : vector<1x128xf32> to vector<2x128xf32>
    %326 = arith.addf %324, %325 : vector<2x128xf32>
    %327 = arith.mulf %313, %326 : vector<2x128xf32>
    %328 = arith.extf %323 : vector<2x128xbf16> to vector<2x128xf32>
    %329 = arith.addf %328, %327 : vector<2x128xf32>
    %330 = math.tanh %329 : vector<2x128xf32>
    %cst_75 = arith.constant 1.000000e+00 : f32
    %331 = vector.broadcast %cst_75 : f32 to vector<2x128xf32>
    %332 = arith.subf %331, %322 : vector<2x128xf32>
    %333 = arith.mulf %332, %330 : vector<2x128xf32>
    %334 = arith.mulf %322, %294 : vector<2x128xf32>
    %335 = arith.addf %333, %334 : vector<2x128xf32>
    %336 = arith.truncf %335 : vector<2x128xf32> to vector<2x128xbf16>
    %337 = arith.index_cast %c7_i32 : i32 to index
    %c0_76 = arith.constant 0 : index
    %c0_77 = arith.constant 0 : index
    %338 = vector.load %arg12[%337, %c0_76, %c0_77] : memref<8x2x128xbf16, #tpu.memory_space<vmem>>, vector<1x2x128xbf16>
    %339 = vector.shape_cast %338 : vector<1x2x128xbf16> to vector<2x128xbf16>
    %340 = vector.shape_cast %336 : vector<2x128xbf16> to vector<1x2x128xbf16>
    tpu.vector_store %arg12[%337, %c0_76, %c0_77], %340 {strides = array<i32>} : memref<8x2x128xbf16, #tpu.memory_space<vmem>>, vector<1x2x128xbf16>,
    %c8_i32 = arith.constant 8 : i32
    %c0_78 = arith.constant 0 : index
    %c0_79 = arith.constant 0 : index
    %c0_80 = arith.constant 0 : index
    %341 = vector.load %arg11[%c0_78, %c0_79, %c0_80] : memref<2x2x128xf32, #tpu.memory_space<vmem>>, vector<1x2x128xf32>
    %342 = vector.shape_cast %341 : vector<1x2x128xf32> to vector<2x128xf32>
    %343 = vector.shape_cast %335 : vector<2x128xf32> to vector<1x2x128xf32>
    tpu.vector_store %arg11[%c0_78, %c0_79, %c0_80], %343 {strides = array<i32>} : memref<2x2x128xf32, #tpu.memory_space<vmem>>, vector<1x2x128xf32>,
    %c0_81 = arith.constant 0 : index
    %c0_82 = arith.constant 0 : index
    %c0_83 = arith.constant 0 : index
    %344 = vector.load %arg12[%c0_81, %c0_82, %c0_83] : memref<8x2x128xbf16, #tpu.memory_space<vmem>>, vector<8x2x128xbf16>
    %345 = vector.shape_cast %344 : vector<8x2x128xbf16> to vector<16x128xbf16>
    %c0_84 = arith.constant 0 : index
    %c0_85 = arith.constant 0 : index
    %346 = vector.load %arg6[%c0_84, %c0_85] : memref<128x384xbf16, #tpu.memory_space<vmem>>, vector<128x384xbf16>
    %cst_86 = arith.constant dense<0.000000e+00> : vector<16x384xf32>
    %347 = tpu.matmul %345, %346, %cst_86 {dimension_numbers = #tpu.dot_dimension_numbers<[1], [0], [0], [1], [0, 0, 1, 1], [], []>} : vector<16x128xbf16>, vector<128x384xbf16>, vector<16x384xf32> -> vector<16x384xf32>
    %c0_87 = arith.constant 0 : index
    %c0_88 = arith.constant 0 : index
    %348 = vector.load %arg8[%c0_87, %c0_88] : memref<1x384xf32, #tpu.memory_space<vmem>>, vector<1x384xf32>
    %349 = vector.broadcast %348 : vector<1x384xf32> to vector<16x384xf32>
    %350 = arith.addf %347, %349 : vector<16x384xf32>
    %351 = vector.shape_cast %350 : vector<16x384xf32> to vector<8x2x384xf32>
    %352 = arith.truncf %351 : vector<8x2x384xf32> to vector<8x2x384xbf16>
    %c0_89 = arith.constant 0 : index
    %c0_90 = arith.constant 0 : index
    %c0_91 = arith.constant 0 : index
    %353 = vector.load %arg13[%c0_89, %c0_90, %c0_91] : memref<8x2x384xbf16, #tpu.memory_space<vmem>>, vector<8x2x384xbf16>
    tpu.vector_store %arg13[%c0_89, %c0_90, %c0_91], %352 {strides = array<i32>} : memref<8x2x384xbf16, #tpu.memory_space<vmem>>, vector<8x2x384xbf16>,
    %c0_92 = arith.constant 0 : index
    %c0_93 = arith.constant 0 : index
    %354 = vector.load %arg7[%c0_92, %c0_93] : memref<128x384xbf16, #tpu.memory_space<vmem>>, vector<128x384xbf16>
    %c0_94 = arith.constant 0 : index
    %c0_95 = arith.constant 0 : index
    %355 = vector.load %arg9[%c0_94, %c0_95] : memref<1x128xf32, #tpu.memory_space<vmem>>, vector<1x128xf32>
    %cst_96 = arith.constant 0.000000e+00 : f32
    %356 = vector.broadcast %cst_96 : f32 to vector<2x128xf32>
    %c0_i32_97 = arith.constant 0 : i32
    %357 = arith.truncf %356 : vector<2x128xf32> to vector<2x128xbf16>
    %cst_98 = arith.constant dense<0.000000e+00> : vector<2x384xf32>
    %358 = tpu.matmul %357, %354, %cst_98 {dimension_numbers = #tpu.dot_dimension_numbers<[1], [0], [0], [1], [0, 0, 1, 1], [], []>} : vector<2x128xbf16>, vector<128x384xbf16>, vector<2x384xf32> -> vector<2x384xf32>
    %359 = arith.index_cast %c0_i32_97 : i32 to index
    %c0_99 = arith.constant 0 : index
    %c0_100 = arith.constant 0 : index
    %360 = vector.load %arg13[%359, %c0_99, %c0_100] : memref<8x2x384xbf16, #tpu.memory_space<vmem>>, vector<1x2x384xbf16>
    %361 = vector.shape_cast %360 : vector<1x2x384xbf16> to vector<2x384xbf16>
    %362 = vector.extract_strided_slice %361 {offsets = [0, 0], sizes = [2, 128], strides = [1, 1]} : vector<2x384xbf16> to vector<2x128xbf16>
    %363 = vector.extract_strided_slice %358 {offsets = [0, 0], sizes = [2, 128], strides = [1, 1]} : vector<2x384xf32> to vector<2x128xf32>
    %364 = arith.extf %362 : vector<2x128xbf16> to vector<2x128xf32>
    %365 = arith.addf %364, %363 : vector<2x128xf32>
    %366 = arith.negf %365 : vector<2x128xf32>
    %367 = math.exp %366 : vector<2x128xf32>
    %cst_101 = arith.constant 1.000000e+00 : f32
    %368 = vector.broadcast %cst_101 : f32 to vector<2x128xf32>
    %369 = arith.addf %368, %367 : vector<2x128xf32>
    %370 = arith.divf %368, %369 : vector<2x128xf32>
    %371 = vector.extract_strided_slice %361 {offsets = [0, 128], sizes = [2, 128], strides = [1, 1]} : vector<2x384xbf16> to vector<2x128xbf16>
    %372 = vector.extract_strided_slice %358 {offsets = [0, 128], sizes = [2, 128], strides = [1, 1]} : vector<2x384xf32> to vector<2x128xf32>
    %373 = arith.extf %371 : vector<2x128xbf16> to vector<2x128xf32>
    %374 = arith.addf %373, %372 : vector<2x128xf32>
    %375 = arith.negf %374 : vector<2x128xf32>
    %376 = math.exp %375 : vector<2x128xf32>
    %cst_102 = arith.constant 1.000000e+00 : f32
    %377 = vector.broadcast %cst_102 : f32 to vector<2x128xf32>
    %378 = arith.addf %377, %376 : vector<2x128xf32>
    %379 = arith.divf %377, %378 : vector<2x128xf32>
    %380 = vector.extract_strided_slice %361 {offsets = [0, 256], sizes = [2, 128], strides = [1, 1]} : vector<2x384xbf16> to vector<2x128xbf16>
    %381 = vector.extract_strided_slice %358 {offsets = [0, 256], sizes = [2, 128], strides = [1, 1]} : vector<2x384xf32> to vector<2x128xf32>
    %382 = vector.broadcast %355 : vector<1x128xf32> to vector<2x128xf32>
    %383 = arith.addf %381, %382 : vector<2x128xf32>
    %384 = arith.mulf %370, %383 : vector<2x128xf32>
    %385 = arith.extf %380 : vector<2x128xbf16> to vector<2x128xf32>
    %386 = arith.addf %385, %384 : vector<2x128xf32>
    %387 = math.tanh %386 : vector<2x128xf32>
    %cst_103 = arith.constant 1.000000e+00 : f32
    %388 = vector.broadcast %cst_103 : f32 to vector<2x128xf32>
    %389 = arith.subf %388, %379 : vector<2x128xf32>
    %390 = arith.mulf %389, %387 : vector<2x128xf32>
    %391 = arith.mulf %379, %356 : vector<2x128xf32>
    %392 = arith.addf %390, %391 : vector<2x128xf32>
    %393 = arith.truncf %392 : vector<2x128xf32> to vector<2x128xbf16>
    %394 = arith.index_cast %c0_i32_97 : i32 to index
    %c0_104 = arith.constant 0 : index
    %c0_105 = arith.constant 0 : index
    %395 = vector.load %arg10[%394, %c0_104, %c0_105] : memref<8x2x128xbf16, #tpu.memory_space<vmem>>, vector<1x2x128xbf16>
    %396 = vector.shape_cast %395 : vector<1x2x128xbf16> to vector<2x128xbf16>
    %397 = vector.shape_cast %393 : vector<2x128xbf16> to vector<1x2x128xbf16>
    tpu.vector_store %arg10[%394, %c0_104, %c0_105], %397 {strides = array<i32>} : memref<8x2x128xbf16, #tpu.memory_space<vmem>>, vector<1x2x128xbf16>,
    %c1_i32_106 = arith.constant 1 : i32
    %398 = arith.truncf %392 : vector<2x128xf32> to vector<2x128xbf16>
    %cst_107 = arith.constant dense<0.000000e+00> : vector<2x384xf32>
    %399 = tpu.matmul %398, %354, %cst_107 {dimension_numbers = #tpu.dot_dimension_numbers<[1], [0], [0], [1], [0, 0, 1, 1], [], []>} : vector<2x128xbf16>, vector<128x384xbf16>, vector<2x384xf32> -> vector<2x384xf32>
    %400 = arith.index_cast %c1_i32_106 : i32 to index
    %c0_108 = arith.constant 0 : index
    %c0_109 = arith.constant 0 : index
    %401 = vector.load %arg13[%400, %c0_108, %c0_109] : memref<8x2x384xbf16, #tpu.memory_space<vmem>>, vector<1x2x384xbf16>
    %402 = vector.shape_cast %401 : vector<1x2x384xbf16> to vector<2x384xbf16>
    %403 = vector.extract_strided_slice %402 {offsets = [0, 0], sizes = [2, 128], strides = [1, 1]} : vector<2x384xbf16> to vector<2x128xbf16>
    %404 = vector.extract_strided_slice %399 {offsets = [0, 0], sizes = [2, 128], strides = [1, 1]} : vector<2x384xf32> to vector<2x128xf32>
    %405 = arith.extf %403 : vector<2x128xbf16> to vector<2x128xf32>
    %406 = arith.addf %405, %404 : vector<2x128xf32>
    %407 = arith.negf %406 : vector<2x128xf32>
    %408 = math.exp %407 : vector<2x128xf32>
    %cst_110 = arith.constant 1.000000e+00 : f32
    %409 = vector.broadcast %cst_110 : f32 to vector<2x128xf32>
    %410 = arith.addf %409, %408 : vector<2x128xf32>
    %411 = arith.divf %409, %410 : vector<2x128xf32>
    %412 = vector.extract_strided_slice %402 {offsets = [0, 128], sizes = [2, 128], strides = [1, 1]} : vector<2x384xbf16> to vector<2x128xbf16>
    %413 = vector.extract_strided_slice %399 {offsets = [0, 128], sizes = [2, 128], strides = [1, 1]} : vector<2x384xf32> to vector<2x128xf32>
    %414 = arith.extf %412 : vector<2x128xbf16> to vector<2x128xf32>
    %415 = arith.addf %414, %413 : vector<2x128xf32>
    %416 = arith.negf %415 : vector<2x128xf32>
    %417 = math.exp %416 : vector<2x128xf32>
    %cst_111 = arith.constant 1.000000e+00 : f32
    %418 = vector.broadcast %cst_111 : f32 to vector<2x128xf32>
    %419 = arith.addf %418, %417 : vector<2x128xf32>
    %420 = arith.divf %418, %419 : vector<2x128xf32>
    %421 = vector.extract_strided_slice %402 {offsets = [0, 256], sizes = [2, 128], strides = [1, 1]} : vector<2x384xbf16> to vector<2x128xbf16>
    %422 = vector.extract_strided_slice %399 {offsets = [0, 256], sizes = [2, 128], strides = [1, 1]} : vector<2x384xf32> to vector<2x128xf32>
    %423 = vector.broadcast %355 : vector<1x128xf32> to vector<2x128xf32>
    %424 = arith.addf %422, %423 : vector<2x128xf32>
    %425 = arith.mulf %411, %424 : vector<2x128xf32>
    %426 = arith.extf %421 : vector<2x128xbf16> to vector<2x128xf32>
    %427 = arith.addf %426, %425 : vector<2x128xf32>
    %428 = math.tanh %427 : vector<2x128xf32>
    %cst_112 = arith.constant 1.000000e+00 : f32
    %429 = vector.broadcast %cst_112 : f32 to vector<2x128xf32>
    %430 = arith.subf %429, %420 : vector<2x128xf32>
    %431 = arith.mulf %430, %428 : vector<2x128xf32>
    %432 = arith.mulf %420, %392 : vector<2x128xf32>
    %433 = arith.addf %431, %432 : vector<2x128xf32>
    %434 = arith.truncf %433 : vector<2x128xf32> to vector<2x128xbf16>
    %435 = arith.index_cast %c1_i32_106 : i32 to index
    %c0_113 = arith.constant 0 : index
    %c0_114 = arith.constant 0 : index
    %436 = vector.load %arg10[%435, %c0_113, %c0_114] : memref<8x2x128xbf16, #tpu.memory_space<vmem>>, vector<1x2x128xbf16>
    %437 = vector.shape_cast %436 : vector<1x2x128xbf16> to vector<2x128xbf16>
    %438 = vector.shape_cast %434 : vector<2x128xbf16> to vector<1x2x128xbf16>
    tpu.vector_store %arg10[%435, %c0_113, %c0_114], %438 {strides = array<i32>} : memref<8x2x128xbf16, #tpu.memory_space<vmem>>, vector<1x2x128xbf16>,
    %c2_i32_115 = arith.constant 2 : i32
    %439 = arith.truncf %433 : vector<2x128xf32> to vector<2x128xbf16>
    %cst_116 = arith.constant dense<0.000000e+00> : vector<2x384xf32>
    %440 = tpu.matmul %439, %354, %cst_116 {dimension_numbers = #tpu.dot_dimension_numbers<[1], [0], [0], [1], [0, 0, 1, 1], [], []>} : vector<2x128xbf16>, vector<128x384xbf16>, vector<2x384xf32> -> vector<2x384xf32>
    %441 = arith.index_cast %c2_i32_115 : i32 to index
    %c0_117 = arith.constant 0 : index
    %c0_118 = arith.constant 0 : index
    %442 = vector.load %arg13[%441, %c0_117, %c0_118] : memref<8x2x384xbf16, #tpu.memory_space<vmem>>, vector<1x2x384xbf16>
    %443 = vector.shape_cast %442 : vector<1x2x384xbf16> to vector<2x384xbf16>
    %444 = vector.extract_strided_slice %443 {offsets = [0, 0], sizes = [2, 128], strides = [1, 1]} : vector<2x384xbf16> to vector<2x128xbf16>
    %445 = vector.extract_strided_slice %440 {offsets = [0, 0], sizes = [2, 128], strides = [1, 1]} : vector<2x384xf32> to vector<2x128xf32>
    %446 = arith.extf %444 : vector<2x128xbf16> to vector<2x128xf32>
    %447 = arith.addf %446, %445 : vector<2x128xf32>
    %448 = arith.negf %447 : vector<2x128xf32>
    %449 = math.exp %448 : vector<2x128xf32>
    %cst_119 = arith.constant 1.000000e+00 : f32
    %450 = vector.broadcast %cst_119 : f32 to vector<2x128xf32>
    %451 = arith.addf %450, %449 : vector<2x128xf32>
    %452 = arith.divf %450, %451 : vector<2x128xf32>
    %453 = vector.extract_strided_slice %443 {offsets = [0, 128], sizes = [2, 128], strides = [1, 1]} : vector<2x384xbf16> to vector<2x128xbf16>
    %454 = vector.extract_strided_slice %440 {offsets = [0, 128], sizes = [2, 128], strides = [1, 1]} : vector<2x384xf32> to vector<2x128xf32>
    %455 = arith.extf %453 : vector<2x128xbf16> to vector<2x128xf32>
    %456 = arith.addf %455, %454 : vector<2x128xf32>
    %457 = arith.negf %456 : vector<2x128xf32>
    %458 = math.exp %457 : vector<2x128xf32>
    %cst_120 = arith.constant 1.000000e+00 : f32
    %459 = vector.broadcast %cst_120 : f32 to vector<2x128xf32>
    %460 = arith.addf %459, %458 : vector<2x128xf32>
    %461 = arith.divf %459, %460 : vector<2x128xf32>
    %462 = vector.extract_strided_slice %443 {offsets = [0, 256], sizes = [2, 128], strides = [1, 1]} : vector<2x384xbf16> to vector<2x128xbf16>
    %463 = vector.extract_strided_slice %440 {offsets = [0, 256], sizes = [2, 128], strides = [1, 1]} : vector<2x384xf32> to vector<2x128xf32>
    %464 = vector.broadcast %355 : vector<1x128xf32> to vector<2x128xf32>
    %465 = arith.addf %463, %464 : vector<2x128xf32>
    %466 = arith.mulf %452, %465 : vector<2x128xf32>
    %467 = arith.extf %462 : vector<2x128xbf16> to vector<2x128xf32>
    %468 = arith.addf %467, %466 : vector<2x128xf32>
    %469 = math.tanh %468 : vector<2x128xf32>
    %cst_121 = arith.constant 1.000000e+00 : f32
    %470 = vector.broadcast %cst_121 : f32 to vector<2x128xf32>
    %471 = arith.subf %470, %461 : vector<2x128xf32>
    %472 = arith.mulf %471, %469 : vector<2x128xf32>
    %473 = arith.mulf %461, %433 : vector<2x128xf32>
    %474 = arith.addf %472, %473 : vector<2x128xf32>
    %475 = arith.truncf %474 : vector<2x128xf32> to vector<2x128xbf16>
    %476 = arith.index_cast %c2_i32_115 : i32 to index
    %c0_122 = arith.constant 0 : index
    %c0_123 = arith.constant 0 : index
    %477 = vector.load %arg10[%476, %c0_122, %c0_123] : memref<8x2x128xbf16, #tpu.memory_space<vmem>>, vector<1x2x128xbf16>
    %478 = vector.shape_cast %477 : vector<1x2x128xbf16> to vector<2x128xbf16>
    %479 = vector.shape_cast %475 : vector<2x128xbf16> to vector<1x2x128xbf16>
    tpu.vector_store %arg10[%476, %c0_122, %c0_123], %479 {strides = array<i32>} : memref<8x2x128xbf16, #tpu.memory_space<vmem>>, vector<1x2x128xbf16>,
    %c3_i32_124 = arith.constant 3 : i32
    %480 = arith.truncf %474 : vector<2x128xf32> to vector<2x128xbf16>
    %cst_125 = arith.constant dense<0.000000e+00> : vector<2x384xf32>
    %481 = tpu.matmul %480, %354, %cst_125 {dimension_numbers = #tpu.dot_dimension_numbers<[1], [0], [0], [1], [0, 0, 1, 1], [], []>} : vector<2x128xbf16>, vector<128x384xbf16>, vector<2x384xf32> -> vector<2x384xf32>
    %482 = arith.index_cast %c3_i32_124 : i32 to index
    %c0_126 = arith.constant 0 : index
    %c0_127 = arith.constant 0 : index
    %483 = vector.load %arg13[%482, %c0_126, %c0_127] : memref<8x2x384xbf16, #tpu.memory_space<vmem>>, vector<1x2x384xbf16>
    %484 = vector.shape_cast %483 : vector<1x2x384xbf16> to vector<2x384xbf16>
    %485 = vector.extract_strided_slice %484 {offsets = [0, 0], sizes = [2, 128], strides = [1, 1]} : vector<2x384xbf16> to vector<2x128xbf16>
    %486 = vector.extract_strided_slice %481 {offsets = [0, 0], sizes = [2, 128], strides = [1, 1]} : vector<2x384xf32> to vector<2x128xf32>
    %487 = arith.extf %485 : vector<2x128xbf16> to vector<2x128xf32>
    %488 = arith.addf %487, %486 : vector<2x128xf32>
    %489 = arith.negf %488 : vector<2x128xf32>
    %490 = math.exp %489 : vector<2x128xf32>
    %cst_128 = arith.constant 1.000000e+00 : f32
    %491 = vector.broadcast %cst_128 : f32 to vector<2x128xf32>
    %492 = arith.addf %491, %490 : vector<2x128xf32>
    %493 = arith.divf %491, %492 : vector<2x128xf32>
    %494 = vector.extract_strided_slice %484 {offsets = [0, 128], sizes = [2, 128], strides = [1, 1]} : vector<2x384xbf16> to vector<2x128xbf16>
    %495 = vector.extract_strided_slice %481 {offsets = [0, 128], sizes = [2, 128], strides = [1, 1]} : vector<2x384xf32> to vector<2x128xf32>
    %496 = arith.extf %494 : vector<2x128xbf16> to vector<2x128xf32>
    %497 = arith.addf %496, %495 : vector<2x128xf32>
    %498 = arith.negf %497 : vector<2x128xf32>
    %499 = math.exp %498 : vector<2x128xf32>
    %cst_129 = arith.constant 1.000000e+00 : f32
    %500 = vector.broadcast %cst_129 : f32 to vector<2x128xf32>
    %501 = arith.addf %500, %499 : vector<2x128xf32>
    %502 = arith.divf %500, %501 : vector<2x128xf32>
    %503 = vector.extract_strided_slice %484 {offsets = [0, 256], sizes = [2, 128], strides = [1, 1]} : vector<2x384xbf16> to vector<2x128xbf16>
    %504 = vector.extract_strided_slice %481 {offsets = [0, 256], sizes = [2, 128], strides = [1, 1]} : vector<2x384xf32> to vector<2x128xf32>
    %505 = vector.broadcast %355 : vector<1x128xf32> to vector<2x128xf32>
    %506 = arith.addf %504, %505 : vector<2x128xf32>
    %507 = arith.mulf %493, %506 : vector<2x128xf32>
    %508 = arith.extf %503 : vector<2x128xbf16> to vector<2x128xf32>
    %509 = arith.addf %508, %507 : vector<2x128xf32>
    %510 = math.tanh %509 : vector<2x128xf32>
    %cst_130 = arith.constant 1.000000e+00 : f32
    %511 = vector.broadcast %cst_130 : f32 to vector<2x128xf32>
    %512 = arith.subf %511, %502 : vector<2x128xf32>
    %513 = arith.mulf %512, %510 : vector<2x128xf32>
    %514 = arith.mulf %502, %474 : vector<2x128xf32>
    %515 = arith.addf %513, %514 : vector<2x128xf32>
    %516 = arith.truncf %515 : vector<2x128xf32> to vector<2x128xbf16>
    %517 = arith.index_cast %c3_i32_124 : i32 to index
    %c0_131 = arith.constant 0 : index
    %c0_132 = arith.constant 0 : index
    %518 = vector.load %arg10[%517, %c0_131, %c0_132] : memref<8x2x128xbf16, #tpu.memory_space<vmem>>, vector<1x2x128xbf16>
    %519 = vector.shape_cast %518 : vector<1x2x128xbf16> to vector<2x128xbf16>
    %520 = vector.shape_cast %516 : vector<2x128xbf16> to vector<1x2x128xbf16>
    tpu.vector_store %arg10[%517, %c0_131, %c0_132], %520 {strides = array<i32>} : memref<8x2x128xbf16, #tpu.memory_space<vmem>>, vector<1x2x128xbf16>,
    %c4_i32_133 = arith.constant 4 : i32
    %521 = arith.truncf %515 : vector<2x128xf32> to vector<2x128xbf16>
    %cst_134 = arith.constant dense<0.000000e+00> : vector<2x384xf32>
    %522 = tpu.matmul %521, %354, %cst_134 {dimension_numbers = #tpu.dot_dimension_numbers<[1], [0], [0], [1], [0, 0, 1, 1], [], []>} : vector<2x128xbf16>, vector<128x384xbf16>, vector<2x384xf32> -> vector<2x384xf32>
    %523 = arith.index_cast %c4_i32_133 : i32 to index
    %c0_135 = arith.constant 0 : index
    %c0_136 = arith.constant 0 : index
    %524 = vector.load %arg13[%523, %c0_135, %c0_136] : memref<8x2x384xbf16, #tpu.memory_space<vmem>>, vector<1x2x384xbf16>
    %525 = vector.shape_cast %524 : vector<1x2x384xbf16> to vector<2x384xbf16>
    %526 = vector.extract_strided_slice %525 {offsets = [0, 0], sizes = [2, 128], strides = [1, 1]} : vector<2x384xbf16> to vector<2x128xbf16>
    %527 = vector.extract_strided_slice %522 {offsets = [0, 0], sizes = [2, 128], strides = [1, 1]} : vector<2x384xf32> to vector<2x128xf32>
    %528 = arith.extf %526 : vector<2x128xbf16> to vector<2x128xf32>
    %529 = arith.addf %528, %527 : vector<2x128xf32>
    %530 = arith.negf %529 : vector<2x128xf32>
    %531 = math.exp %530 : vector<2x128xf32>
    %cst_137 = arith.constant 1.000000e+00 : f32
    %532 = vector.broadcast %cst_137 : f32 to vector<2x128xf32>
    %533 = arith.addf %532, %531 : vector<2x128xf32>
    %534 = arith.divf %532, %533 : vector<2x128xf32>
    %535 = vector.extract_strided_slice %525 {offsets = [0, 128], sizes = [2, 128], strides = [1, 1]} : vector<2x384xbf16> to vector<2x128xbf16>
    %536 = vector.extract_strided_slice %522 {offsets = [0, 128], sizes = [2, 128], strides = [1, 1]} : vector<2x384xf32> to vector<2x128xf32>
    %537 = arith.extf %535 : vector<2x128xbf16> to vector<2x128xf32>
    %538 = arith.addf %537, %536 : vector<2x128xf32>
    %539 = arith.negf %538 : vector<2x128xf32>
    %540 = math.exp %539 : vector<2x128xf32>
    %cst_138 = arith.constant 1.000000e+00 : f32
    %541 = vector.broadcast %cst_138 : f32 to vector<2x128xf32>
    %542 = arith.addf %541, %540 : vector<2x128xf32>
    %543 = arith.divf %541, %542 : vector<2x128xf32>
    %544 = vector.extract_strided_slice %525 {offsets = [0, 256], sizes = [2, 128], strides = [1, 1]} : vector<2x384xbf16> to vector<2x128xbf16>
    %545 = vector.extract_strided_slice %522 {offsets = [0, 256], sizes = [2, 128], strides = [1, 1]} : vector<2x384xf32> to vector<2x128xf32>
    %546 = vector.broadcast %355 : vector<1x128xf32> to vector<2x128xf32>
    %547 = arith.addf %545, %546 : vector<2x128xf32>
    %548 = arith.mulf %534, %547 : vector<2x128xf32>
    %549 = arith.extf %544 : vector<2x128xbf16> to vector<2x128xf32>
    %550 = arith.addf %549, %548 : vector<2x128xf32>
    %551 = math.tanh %550 : vector<2x128xf32>
    %cst_139 = arith.constant 1.000000e+00 : f32
    %552 = vector.broadcast %cst_139 : f32 to vector<2x128xf32>
    %553 = arith.subf %552, %543 : vector<2x128xf32>
    %554 = arith.mulf %553, %551 : vector<2x128xf32>
    %555 = arith.mulf %543, %515 : vector<2x128xf32>
    %556 = arith.addf %554, %555 : vector<2x128xf32>
    %557 = arith.truncf %556 : vector<2x128xf32> to vector<2x128xbf16>
    %558 = arith.index_cast %c4_i32_133 : i32 to index
    %c0_140 = arith.constant 0 : index
    %c0_141 = arith.constant 0 : index
    %559 = vector.load %arg10[%558, %c0_140, %c0_141] : memref<8x2x128xbf16, #tpu.memory_space<vmem>>, vector<1x2x128xbf16>
    %560 = vector.shape_cast %559 : vector<1x2x128xbf16> to vector<2x128xbf16>
    %561 = vector.shape_cast %557 : vector<2x128xbf16> to vector<1x2x128xbf16>
    tpu.vector_store %arg10[%558, %c0_140, %c0_141], %561 {strides = array<i32>} : memref<8x2x128xbf16, #tpu.memory_space<vmem>>, vector<1x2x128xbf16>,
    %c5_i32_142 = arith.constant 5 : i32
    %562 = arith.truncf %556 : vector<2x128xf32> to vector<2x128xbf16>
    %cst_143 = arith.constant dense<0.000000e+00> : vector<2x384xf32>
    %563 = tpu.matmul %562, %354, %cst_143 {dimension_numbers = #tpu.dot_dimension_numbers<[1], [0], [0], [1], [0, 0, 1, 1], [], []>} : vector<2x128xbf16>, vector<128x384xbf16>, vector<2x384xf32> -> vector<2x384xf32>
    %564 = arith.index_cast %c5_i32_142 : i32 to index
    %c0_144 = arith.constant 0 : index
    %c0_145 = arith.constant 0 : index
    %565 = vector.load %arg13[%564, %c0_144, %c0_145] : memref<8x2x384xbf16, #tpu.memory_space<vmem>>, vector<1x2x384xbf16>
    %566 = vector.shape_cast %565 : vector<1x2x384xbf16> to vector<2x384xbf16>
    %567 = vector.extract_strided_slice %566 {offsets = [0, 0], sizes = [2, 128], strides = [1, 1]} : vector<2x384xbf16> to vector<2x128xbf16>
    %568 = vector.extract_strided_slice %563 {offsets = [0, 0], sizes = [2, 128], strides = [1, 1]} : vector<2x384xf32> to vector<2x128xf32>
    %569 = arith.extf %567 : vector<2x128xbf16> to vector<2x128xf32>
    %570 = arith.addf %569, %568 : vector<2x128xf32>
    %571 = arith.negf %570 : vector<2x128xf32>
    %572 = math.exp %571 : vector<2x128xf32>
    %cst_146 = arith.constant 1.000000e+00 : f32
    %573 = vector.broadcast %cst_146 : f32 to vector<2x128xf32>
    %574 = arith.addf %573, %572 : vector<2x128xf32>
    %575 = arith.divf %573, %574 : vector<2x128xf32>
    %576 = vector.extract_strided_slice %566 {offsets = [0, 128], sizes = [2, 128], strides = [1, 1]} : vector<2x384xbf16> to vector<2x128xbf16>
    %577 = vector.extract_strided_slice %563 {offsets = [0, 128], sizes = [2, 128], strides = [1, 1]} : vector<2x384xf32> to vector<2x128xf32>
    %578 = arith.extf %576 : vector<2x128xbf16> to vector<2x128xf32>
    %579 = arith.addf %578, %577 : vector<2x128xf32>
    %580 = arith.negf %579 : vector<2x128xf32>
    %581 = math.exp %580 : vector<2x128xf32>
    %cst_147 = arith.constant 1.000000e+00 : f32
    %582 = vector.broadcast %cst_147 : f32 to vector<2x128xf32>
    %583 = arith.addf %582, %581 : vector<2x128xf32>
    %584 = arith.divf %582, %583 : vector<2x128xf32>
    %585 = vector.extract_strided_slice %566 {offsets = [0, 256], sizes = [2, 128], strides = [1, 1]} : vector<2x384xbf16> to vector<2x128xbf16>
    %586 = vector.extract_strided_slice %563 {offsets = [0, 256], sizes = [2, 128], strides = [1, 1]} : vector<2x384xf32> to vector<2x128xf32>
    %587 = vector.broadcast %355 : vector<1x128xf32> to vector<2x128xf32>
    %588 = arith.addf %586, %587 : vector<2x128xf32>
    %589 = arith.mulf %575, %588 : vector<2x128xf32>
    %590 = arith.extf %585 : vector<2x128xbf16> to vector<2x128xf32>
    %591 = arith.addf %590, %589 : vector<2x128xf32>
    %592 = math.tanh %591 : vector<2x128xf32>
    %cst_148 = arith.constant 1.000000e+00 : f32
    %593 = vector.broadcast %cst_148 : f32 to vector<2x128xf32>
    %594 = arith.subf %593, %584 : vector<2x128xf32>
    %595 = arith.mulf %594, %592 : vector<2x128xf32>
    %596 = arith.mulf %584, %556 : vector<2x128xf32>
    %597 = arith.addf %595, %596 : vector<2x128xf32>
    %598 = arith.truncf %597 : vector<2x128xf32> to vector<2x128xbf16>
    %599 = arith.index_cast %c5_i32_142 : i32 to index
    %c0_149 = arith.constant 0 : index
    %c0_150 = arith.constant 0 : index
    %600 = vector.load %arg10[%599, %c0_149, %c0_150] : memref<8x2x128xbf16, #tpu.memory_space<vmem>>, vector<1x2x128xbf16>
    %601 = vector.shape_cast %600 : vector<1x2x128xbf16> to vector<2x128xbf16>
    %602 = vector.shape_cast %598 : vector<2x128xbf16> to vector<1x2x128xbf16>
    tpu.vector_store %arg10[%599, %c0_149, %c0_150], %602 {strides = array<i32>} : memref<8x2x128xbf16, #tpu.memory_space<vmem>>, vector<1x2x128xbf16>,
    %c6_i32_151 = arith.constant 6 : i32
    %603 = arith.truncf %597 : vector<2x128xf32> to vector<2x128xbf16>
    %cst_152 = arith.constant dense<0.000000e+00> : vector<2x384xf32>
    %604 = tpu.matmul %603, %354, %cst_152 {dimension_numbers = #tpu.dot_dimension_numbers<[1], [0], [0], [1], [0, 0, 1, 1], [], []>} : vector<2x128xbf16>, vector<128x384xbf16>, vector<2x384xf32> -> vector<2x384xf32>
    %605 = arith.index_cast %c6_i32_151 : i32 to index
    %c0_153 = arith.constant 0 : index
    %c0_154 = arith.constant 0 : index
    %606 = vector.load %arg13[%605, %c0_153, %c0_154] : memref<8x2x384xbf16, #tpu.memory_space<vmem>>, vector<1x2x384xbf16>
    %607 = vector.shape_cast %606 : vector<1x2x384xbf16> to vector<2x384xbf16>
    %608 = vector.extract_strided_slice %607 {offsets = [0, 0], sizes = [2, 128], strides = [1, 1]} : vector<2x384xbf16> to vector<2x128xbf16>
    %609 = vector.extract_strided_slice %604 {offsets = [0, 0], sizes = [2, 128], strides = [1, 1]} : vector<2x384xf32> to vector<2x128xf32>
    %610 = arith.extf %608 : vector<2x128xbf16> to vector<2x128xf32>
    %611 = arith.addf %610, %609 : vector<2x128xf32>
    %612 = arith.negf %611 : vector<2x128xf32>
    %613 = math.exp %612 : vector<2x128xf32>
    %cst_155 = arith.constant 1.000000e+00 : f32
    %614 = vector.broadcast %cst_155 : f32 to vector<2x128xf32>
    %615 = arith.addf %614, %613 : vector<2x128xf32>
    %616 = arith.divf %614, %615 : vector<2x128xf32>
    %617 = vector.extract_strided_slice %607 {offsets = [0, 128], sizes = [2, 128], strides = [1, 1]} : vector<2x384xbf16> to vector<2x128xbf16>
    %618 = vector.extract_strided_slice %604 {offsets = [0, 128], sizes = [2, 128], strides = [1, 1]} : vector<2x384xf32> to vector<2x128xf32>
    %619 = arith.extf %617 : vector<2x128xbf16> to vector<2x128xf32>
    %620 = arith.addf %619, %618 : vector<2x128xf32>
    %621 = arith.negf %620 : vector<2x128xf32>
    %622 = math.exp %621 : vector<2x128xf32>
    %cst_156 = arith.constant 1.000000e+00 : f32
    %623 = vector.broadcast %cst_156 : f32 to vector<2x128xf32>
    %624 = arith.addf %623, %622 : vector<2x128xf32>
    %625 = arith.divf %623, %624 : vector<2x128xf32>
    %626 = vector.extract_strided_slice %607 {offsets = [0, 256], sizes = [2, 128], strides = [1, 1]} : vector<2x384xbf16> to vector<2x128xbf16>
    %627 = vector.extract_strided_slice %604 {offsets = [0, 256], sizes = [2, 128], strides = [1, 1]} : vector<2x384xf32> to vector<2x128xf32>
    %628 = vector.broadcast %355 : vector<1x128xf32> to vector<2x128xf32>
    %629 = arith.addf %627, %628 : vector<2x128xf32>
    %630 = arith.mulf %616, %629 : vector<2x128xf32>
    %631 = arith.extf %626 : vector<2x128xbf16> to vector<2x128xf32>
    %632 = arith.addf %631, %630 : vector<2x128xf32>
    %633 = math.tanh %632 : vector<2x128xf32>
    %cst_157 = arith.constant 1.000000e+00 : f32
    %634 = vector.broadcast %cst_157 : f32 to vector<2x128xf32>
    %635 = arith.subf %634, %625 : vector<2x128xf32>
    %636 = arith.mulf %635, %633 : vector<2x128xf32>
    %637 = arith.mulf %625, %597 : vector<2x128xf32>
    %638 = arith.addf %636, %637 : vector<2x128xf32>
    %639 = arith.truncf %638 : vector<2x128xf32> to vector<2x128xbf16>
    %640 = arith.index_cast %c6_i32_151 : i32 to index
    %c0_158 = arith.constant 0 : index
    %c0_159 = arith.constant 0 : index
    %641 = vector.load %arg10[%640, %c0_158, %c0_159] : memref<8x2x128xbf16, #tpu.memory_space<vmem>>, vector<1x2x128xbf16>
    %642 = vector.shape_cast %641 : vector<1x2x128xbf16> to vector<2x128xbf16>
    %643 = vector.shape_cast %639 : vector<2x128xbf16> to vector<1x2x128xbf16>
    tpu.vector_store %arg10[%640, %c0_158, %c0_159], %643 {strides = array<i32>} : memref<8x2x128xbf16, #tpu.memory_space<vmem>>, vector<1x2x128xbf16>,
    %c7_i32_160 = arith.constant 7 : i32
    %644 = arith.truncf %638 : vector<2x128xf32> to vector<2x128xbf16>
    %cst_161 = arith.constant dense<0.000000e+00> : vector<2x384xf32>
    %645 = tpu.matmul %644, %354, %cst_161 {dimension_numbers = #tpu.dot_dimension_numbers<[1], [0], [0], [1], [0, 0, 1, 1], [], []>} : vector<2x128xbf16>, vector<128x384xbf16>, vector<2x384xf32> -> vector<2x384xf32>
    %646 = arith.index_cast %c7_i32_160 : i32 to index
    %c0_162 = arith.constant 0 : index
    %c0_163 = arith.constant 0 : index
    %647 = vector.load %arg13[%646, %c0_162, %c0_163] : memref<8x2x384xbf16, #tpu.memory_space<vmem>>, vector<1x2x384xbf16>
    %648 = vector.shape_cast %647 : vector<1x2x384xbf16> to vector<2x384xbf16>
    %649 = vector.extract_strided_slice %648 {offsets = [0, 0], sizes = [2, 128], strides = [1, 1]} : vector<2x384xbf16> to vector<2x128xbf16>
    %650 = vector.extract_strided_slice %645 {offsets = [0, 0], sizes = [2, 128], strides = [1, 1]} : vector<2x384xf32> to vector<2x128xf32>
    %651 = arith.extf %649 : vector<2x128xbf16> to vector<2x128xf32>
    %652 = arith.addf %651, %650 : vector<2x128xf32>
    %653 = arith.negf %652 : vector<2x128xf32>
    %654 = math.exp %653 : vector<2x128xf32>
    %cst_164 = arith.constant 1.000000e+00 : f32
    %655 = vector.broadcast %cst_164 : f32 to vector<2x128xf32>
    %656 = arith.addf %655, %654 : vector<2x128xf32>
    %657 = arith.divf %655, %656 : vector<2x128xf32>
    %658 = vector.extract_strided_slice %648 {offsets = [0, 128], sizes = [2, 128], strides = [1, 1]} : vector<2x384xbf16> to vector<2x128xbf16>
    %659 = vector.extract_strided_slice %645 {offsets = [0, 128], sizes = [2, 128], strides = [1, 1]} : vector<2x384xf32> to vector<2x128xf32>
    %660 = arith.extf %658 : vector<2x128xbf16> to vector<2x128xf32>
    %661 = arith.addf %660, %659 : vector<2x128xf32>
    %662 = arith.negf %661 : vector<2x128xf32>
    %663 = math.exp %662 : vector<2x128xf32>
    %cst_165 = arith.constant 1.000000e+00 : f32
    %664 = vector.broadcast %cst_165 : f32 to vector<2x128xf32>
    %665 = arith.addf %664, %663 : vector<2x128xf32>
    %666 = arith.divf %664, %665 : vector<2x128xf32>
    %667 = vector.extract_strided_slice %648 {offsets = [0, 256], sizes = [2, 128], strides = [1, 1]} : vector<2x384xbf16> to vector<2x128xbf16>
    %668 = vector.extract_strided_slice %645 {offsets = [0, 256], sizes = [2, 128], strides = [1, 1]} : vector<2x384xf32> to vector<2x128xf32>
    %669 = vector.broadcast %355 : vector<1x128xf32> to vector<2x128xf32>
    %670 = arith.addf %668, %669 : vector<2x128xf32>
    %671 = arith.mulf %657, %670 : vector<2x128xf32>
    %672 = arith.extf %667 : vector<2x128xbf16> to vector<2x128xf32>
    %673 = arith.addf %672, %671 : vector<2x128xf32>
    %674 = math.tanh %673 : vector<2x128xf32>
    %cst_166 = arith.constant 1.000000e+00 : f32
    %675 = vector.broadcast %cst_166 : f32 to vector<2x128xf32>
    %676 = arith.subf %675, %666 : vector<2x128xf32>
    %677 = arith.mulf %676, %674 : vector<2x128xf32>
    %678 = arith.mulf %666, %638 : vector<2x128xf32>
    %679 = arith.addf %677, %678 : vector<2x128xf32>
    %680 = arith.truncf %679 : vector<2x128xf32> to vector<2x128xbf16>
    %681 = arith.index_cast %c7_i32_160 : i32 to index
    %c0_167 = arith.constant 0 : index
    %c0_168 = arith.constant 0 : index
    %682 = vector.load %arg10[%681, %c0_167, %c0_168] : memref<8x2x128xbf16, #tpu.memory_space<vmem>>, vector<1x2x128xbf16>
    %683 = vector.shape_cast %682 : vector<1x2x128xbf16> to vector<2x128xbf16>
    %684 = vector.shape_cast %680 : vector<2x128xbf16> to vector<1x2x128xbf16>
    tpu.vector_store %arg10[%681, %c0_167, %c0_168], %684 {strides = array<i32>} : memref<8x2x128xbf16, #tpu.memory_space<vmem>>, vector<1x2x128xbf16>,
    %c8_i32_169 = arith.constant 8 : i32
    %c1 = arith.constant 1 : index
    %c0_170 = arith.constant 0 : index
    %c0_171 = arith.constant 0 : index
    %685 = vector.load %arg11[%c1, %c0_170, %c0_171] : memref<2x2x128xf32, #tpu.memory_space<vmem>>, vector<1x2x128xf32>
    %686 = vector.shape_cast %685 : vector<1x2x128xf32> to vector<2x128xf32>
    %687 = vector.shape_cast %679 : vector<2x128xf32> to vector<1x2x128xf32>
    tpu.vector_store %arg11[%c1, %c0_170, %c0_171], %687 {strides = array<i32>} : memref<2x2x128xf32, #tpu.memory_space<vmem>>, vector<1x2x128xf32>,
    return
  }
  func.func @transform_0(%arg0: i32) -> (i32, i32, i32) {
    %c0_i32 = arith.constant 0 : i32
    %c0_i32_0 = arith.constant 0 : i32
    %c0_i32_1 = arith.constant 0 : i32
    return %c0_i32, %arg0, %c0_i32_0 : i32, i32, i32
  }
  func.func @transform_1(%arg0: i32) -> (i32, i32) {
    %c0_i32 = arith.constant 0 : i32
    %c0_i32_0 = arith.constant 0 : i32
    %c0_i32_1 = arith.constant 0 : i32
    return %c0_i32, %c0_i32_0 : i32, i32
  }
  func.func @transform_2(%arg0: i32) -> (i32, i32) {
    %c0_i32 = arith.constant 0 : i32
    %c0_i32_0 = arith.constant 0 : i32
    %c0_i32_1 = arith.constant 0 : i32
    return %c0_i32, %c0_i32_0 : i32, i32
  }
  func.func @transform_3(%arg0: i32) -> (i32, i32) {
    %c0_i32 = arith.constant 0 : i32
    %c0_i32_0 = arith.constant 0 : i32
    %c0_i32_1 = arith.constant 0 : i32
    return %c0_i32, %c0_i32_0 : i32, i32
  }
  func.func @transform_4(%arg0: i32) -> (i32, i32) {
    %c0_i32 = arith.constant 0 : i32
    %c0_i32_0 = arith.constant 0 : i32
    %c0_i32_1 = arith.constant 0 : i32
    return %c0_i32, %c0_i32_0 : i32, i32
  }
  func.func @transform_5(%arg0: i32) -> (i32, i32) {
    %c0_i32 = arith.constant 0 : i32
    %c0_i32_0 = arith.constant 0 : i32
    %c0_i32_1 = arith.constant 0 : i32
    return %c0_i32, %c0_i32_0 : i32, i32
  }
  func.func @transform_6(%arg0: i32) -> (i32, i32) {
    %c0_i32 = arith.constant 0 : i32
    %c0_i32_0 = arith.constant 0 : i32
    %c0_i32_1 = arith.constant 0 : i32
    return %c0_i32, %c0_i32_0 : i32, i32
  }
  func.func @transform_7(%arg0: i32) -> (i32, i32) {
    %c0_i32 = arith.constant 0 : i32
    %c0_i32_0 = arith.constant 0 : i32
    %c0_i32_1 = arith.constant 0 : i32
    return %c0_i32, %c0_i32_0 : i32, i32
  }
  func.func @transform_8(%arg0: i32) -> (i32, i32) {
    %c0_i32 = arith.constant 0 : i32
    %c0_i32_0 = arith.constant 0 : i32
    %c0_i32_1 = arith.constant 0 : i32
    return %c0_i32, %c0_i32_0 : i32, i32
  }
  func.func @transform_9(%arg0: i32) -> (i32, i32, i32) {
    %c0_i32 = arith.constant 0 : i32
    %c0_i32_0 = arith.constant 0 : i32
    %c0_i32_1 = arith.constant 0 : i32
    return %c0_i32, %arg0, %c0_i32_0 : i32, i32, i32
  }
  func.func @transform_10(%arg0: i32) -> (i32, i32, i32) {
    %c0_i32 = arith.constant 0 : i32
    %c0_i32_0 = arith.constant 0 : i32
    %c0_i32_1 = arith.constant 0 : i32
    return %c0_i32, %arg0, %c0_i32_0 : i32, i32, i32
  }
}

</mosaic_0001>

<bundles_post_ra>
// kernel: tpu_custom_call.1
= control target key start
LH: loop header
LB: loop body
LE: loop exit
PB: predicated region body
PF: predicated region fallthrough
CT: control target
= control target key end

     0   :  { %7 = vsyncpa [#allocation3], 0  ;;  %s692_s0 = inlined_call_operand.hbm [shape: f32[8,128], index: 0, kind: input, shape index: {}]   ;;  %s693_s1 = inlined_call_operand.hbm [shape: f32[16,128], index: 1, kind: input, shape index: {}]   ;;  %s694_s2 = inlined_call_operand.hbm [shape: f32[16,128], index: 2, kind: output, shape index: {}]  }
   0x1   :  { %8 = vsyncpa [#allocation6], 0 }
   0x2   :  { %10 = vsyncpa [#allocation6 + $0x1], 0 }
   0x3   :  { %11 = vsyncpa [#allocation4], 0 }
   0x4   :  { %13 = vsyncpa [#allocation4 + $0x1], 0  ;;  %s491_s9 = smov 0   ;;  %s493_s10 = smov 0  }
   0x5   :  { %s495_s11 = smov 0   ;;  %s497_s12 = smov 0  }
   0x6 LB: > { %s512_s13 = sadd.s32 4294967295, %s471_s12   ;;  %s272_s14 = sadd.s32 4294967294, %s471_s12   ;;  %s471_s12 = sphi %s497_s12, %s718_s12   ;;  %s467_s11 = sphi %s495_s11, %s717_s11   ;;  %s463_s10 = sphi %s493_s10, %s716_s10   ;;  %s459_s9 = sphi %s491_s9, %s715_s9  }
   0x7   : > { %p60_p0 = scmp.ne.s32.totalorder %s463_s10, %s459_s9  ;;  %p695_p1 = scmp.eq.s32.totalorder %s512_s13, 0 }
   0x8   : > { %p90_p3 = scmp.eq.s32.totalorder %s272_s14, 1  ;;  %p273_p5 = scmp.ge.s32.totalorder %s471_s12, 1 }
   0x9   : > { %p521_p4 = por %p695_p1, %p60_p0  ;;  %p97_p7 = scmp.lt.s32.totalorder %s471_s12, 3 }
   0xa   : > { %p526_p6 = por %p90_p3, %p60_p0  ;;  %s473_s18 = smov [#allocation2]  }
   0xb   : > { %s698_s15 = scalar_select %p521_p4, 1, 0 }
   0xc   : > { %s699_s16 = scalar_select %p526_p6, 1, 0 }
   0xd   : > { %p531_p8 = pnand %p273_p5, %p97_p7  ;;  %s110_s19 = sshll.u32 %s473_s18, 4  ;;  %s111_s19 = int_to_ptr.vmem [resolvable:$true] %s110_s19 }
   0xe   : > { %s539_s20 = sadd.s32 1, %s471_s12   ;;  %s47_s24 = sadd.s32 1, %s467_s11 }
   0xf   : > { %s700_s17 = scalar_select %p531_p8, 1, 0 }
  0x10   : > { %p294_p10 = pneg %p531_p8  ;;  %s44_s22 = ssub.s32 %s471_s12, %s539_s20 }
  0x11   : > { %p549_p12 = scmp.eq.s32.totalorder %s44_s22, 0  ;;  %s343_s27 = scalar_lea.hbm %s692_s0, 128 }
  0x12   : > { %p543_p11 = pnand %p294_p10, %p695_p1  ;;  %p344_p0 = scmp.ne.s32.totalorder %s692_s0, %s343_s27 }
  0x13   : > { %s702_s23 = scalar_select %p549_p12, 1, 0 }
  0x14   : > { %p345_p3 = pneg %p543_p11  ;;  %p350_p10 = scmp.lt.u32.totalorder %s343_s27, %s692_s0 }
  0x16   : > { %p346_p5 = pnand %p345_p3, %p344_p0 }
  0x18   : > { %p347_p7 = pneg %p346_p5 }
  0x1a   : > { %p352_p9 = pnand %p350_p10, %p347_p7 }
  0x1c   : > { %355 = shalt.err (!%p352_p9)
}
  0x1d   : > { %s356_s4 = scalar_lea.vmem %s111_s19, 128  ;;  %p364_p6 = scmp.lt.s32.totalorder %s111_s19, %s111_s19 }
  0x1e   : > { %p357_p1 = scmp.ne.s32.totalorder %s111_s19, %s356_s4  ;;  %p365_p4 = scmp.lt.s32.totalorder %s356_s4, %s356_s4 }
  0x20   : > { %p359_p2 = pnand %p357_p1, %p345_p3  ;;  %p366_p8 = por %p365_p4, %p364_p6 }
  0x22   : > { %p360_p13 = pneg %p359_p2 }
  0x24   : > { %p367_p12 = pnand %p366_p8, %p360_p13 }
  0x26   : > { %370 = shalt.err (!%p367_p12)
}
  0x27   : > { %297 = dma.hbm_to_vmem [thread:$0]  (!%p543_p11), %s692_s0, 128, %s111_s19, [#allocation3]  }
  0x28   : > { %p703_p1 = scmp.ne.s32.totalorder %s702_s23, 0  ;;  %p55_p2 = scmp.eq.s32.totalorder %s471_s12, 0 }
  0x29   : > { %p704_p4 = scmp.ne.s32.totalorder %s467_s11, %s463_s10  ;;  %p705_p6 = scmp.eq.s32.totalorder %s512_s13, 1 }
  0x2a   : > { %s575_s7 = scalar_select %p703_p1, %s467_s11, %s47_s24  }
  0x2b   : > { %p583_p8 = por %p705_p6, %p704_p4  ;;  %p307_p9 = scmp.lt.s32.totalorder %s471_s12, 2 }
  0x2c   : > { %s121_s14 = sand.u32 1, %s467_s11   ;;  %p707_p12 = pmov %p704_p4 }
  0x2d   : > { %s276_s18 = sshll.u32 %s121_s14, 3  ;;  %s277_s21 = sshll.u32 %s471_s12, 7 }
  0x2e   : > { %p56_p13 = por %p55_p2, %p707_p12  ;;  %s596_s19 = scalar_lea.hbm %s693_s1, %s277_s21 }
  0x2f   : > { %s125_s23 = scalar_lea.vmem [#allocation5], %s276_s18  ;;  %s122_s27 = scalar_lea.sflag [#allocation6], %s121_s14 }
  0x30   : > { %s132_s24 = sshll.u32 %s125_s23, 4  ;;  %p598_p11 = pnand %p307_p9, %p56_p13  ;;  %s602_s24 = int_to_ptr.vmem [resolvable:$true] %s132_s24 }
  0x31   : > { %s371_s28 = scalar_lea.hbm %s596_s19, 128  ;;  %s376_s3 = scalar_lea.hbm %s693_s1, 256 }
  0x32   : > { %p372_p0 = scmp.ne.s32.totalorder %s596_s19, %s371_s28  ;;  %p373_p3 = pneg %p598_p11 }
  0x33   : > { %p377_p10 = scmp.lt.u32.totalorder %s596_s19, %s693_s1  ;;  %p378_p1 = scmp.lt.u32.totalorder %s376_s3, %s371_s28 }
  0x34   : > { %p374_p5 = pnand %p373_p3, %p372_p0  ;;  %p380_p4 = scmp.lt.u32.totalorder %s371_s28, %s596_s19 }
  0x35   : > { %p379_p2 = por %p378_p1, %p377_p10 }
  0x36   : > { %p375_p7 = pneg %p374_p5 }
  0x37   : > { %p381_p6 = por %p380_p4, %p379_p2 }
  0x39   : > { %p382_p9 = pnand %p381_p6, %p375_p7 }
  0x3b   : > { %385 = shalt.err (!%p382_p9)
}
  0x3c   : > { %s386_s6 = scalar_lea.vmem %s602_s24, 128  ;;  %s474_s14 = smov [#allocation5]  }
  0x3d   : > { %p387_p12 = scmp.ne.s32.totalorder %s602_s24, %s386_s6  ;;  %s391_s18 = sshll.u32 %s474_s14, 4  ;;  %s392_s18 = int_to_ptr.vmem [resolvable:$false] %s391_s18 }
  0x3e   : > { %s393_s21 = scalar_lea.vmem %s392_s18, 256  ;;  %p394_p5 = scmp.lt.s32.totalorder %s602_s24, %s392_s18 }
  0x3f   : > { %p389_p13 = pnand %p387_p12, %p373_p3  ;;  %p395_p10 = scmp.lt.s32.totalorder %s393_s21, %s386_s6 }
  0x41   : > { %p390_p0 = pneg %p389_p13  ;;  %p396_p1 = por %p395_p10, %p394_p5 }
  0x43   : > { %p397_p2 = pnand %p396_p1, %p390_p0 }
  0x45   : > { %400 = shalt.err (!%p397_p2)
}
  0x46   : > { %301 = dma.hbm_to_vmem [thread:$0]  (!%p598_p11), %s596_s19, 128, %s602_s24, %s122_s27  }
  0x47   : > { %p709_p7 = scmp.ne.s32.totalorder %s700_s17, 0 }
  0x48   : > { %p710_p3 = scmp.eq.s32.totalorder (!%p709_p7), %s512_s13, 0 }
  0x49   : > { %141 = sbr.rel (%p709_p7) target bundleno = 110 (0x6e), region = 28 }
  0x50   : > { %446 = dma.done.wait (%p710_p3), [#allocation3], 128   ;;  %p711_p4 = pmov %p710_p3 }
  0x51   : > { %s636_s22 = sand.u32 1, %s463_s10   ;;  %p712_p6 = scmp.ne.s32.totalorder %s698_s15, 0 }
  0x52   : > { %448 = vsyncadd (%p711_p4), [#allocation3], 4294967168  ;;  %s280_s25 = sshll.u32 %s636_s22, 3  ;;  %s148_s23 = scalar_lea.sflag [#allocation6], %s636_s22 }
  0x53   : > { %s151_s26 = scalar_lea.vmem [#allocation5], %s280_s25 }
  0x54   : > { %450 = dma.done.wait (%p712_p6), %s148_s23, 128  }
  0x55   : > { %452 = vsyncadd (%p712_p6), %s148_s23, 4294967168  ;;  %s171_s17 = scalar_lea.vmem [#allocation7], %s280_s25  ;;  %s283_s24 = sshll.u32 %s512_s13, 7  ;;  %v172_v0 = vld [vmem:[%s151_s26] sm:$0xff]  ;;  %v173_v1 = vld [vmem:[#allocation2] sm:$0xff] }
  0x56   : > { %s190_s19 = sshll.u32 %s171_s17, 4  ;;  %v174_v2 = vadd.f32 %v173_v1, %v172_v0  ;;  %s650_s29 = scalar_lea.hbm %s694_s2, %s283_s24  ;;  %s645_s19 = int_to_ptr.vmem [resolvable:$true] %s190_s19 }
  0x57   : > { %s177_s15 = scalar_lea.sflag [#allocation4], %s636_s22  ;;  %s401_s30 = scalar_lea.vmem %s645_s19, 128 }
  0x58   : > { %175 = vst [vmem:[%s171_s17] sm:$0xff] %v174_v2  ;;  %p402_p11 = scmp.ne.s32.totalorder %s645_s19, %s401_s30  ;;  %s475_s13 = smov [#allocation7]  }
  0x59   : > { %s405_s3 = sshll.u32 %s475_s13, 4  ;;  %s406_s3 = int_to_ptr.vmem [resolvable:$false] %s405_s3 }
  0x5a   : > { %p403_p9 = pnand %p402_p11, %p583_p8  ;;  %s407_s4 = scalar_lea.vmem %s406_s3, 256 }
  0x5b   : > { %p408_p13 = scmp.lt.s32.totalorder %s645_s19, %s406_s3  ;;  %p409_p0 = scmp.lt.s32.totalorder %s407_s4, %s401_s30 }
  0x5c   : > { %p404_p12 = pneg %p403_p9 }
  0x5d   : > { %p410_p5 = por %p409_p0, %p408_p13 }
  0x5f   : > { %p411_p10 = pnand %p410_p5, %p404_p12 }
  0x61   : > { %414 = shalt.err (!%p411_p10)
}
  0x62   : > { %s415_s5 = scalar_lea.hbm %s650_s29, 128  ;;  %s419_s18 = scalar_lea.hbm %s694_s2, 256 }
  0x63   : > { %p416_p1 = scmp.ne.s32.totalorder %s650_s29, %s415_s5  ;;  %p420_p3 = scmp.lt.u32.totalorder %s650_s29, %s694_s2 }
  0x64   : > { %p421_p4 = scmp.lt.u32.totalorder %s419_s18, %s415_s5  ;;  %p423_p11 = scmp.lt.u32.totalorder %s415_s5, %s650_s29 }
  0x65   : > { %p417_p2 = pnand %p416_p1, %p583_p8 }
  0x66   : > { %p422_p6 = por %p421_p4, %p420_p3 }
  0x67   : > { %p418_p7 = pneg %p417_p2 }
  0x68   : > { %p424_p9 = por %p423_p11, %p422_p6 }
  0x6a   : > { %p425_p12 = pnand %p424_p9, %p418_p7 }
  0x6c   : > { %428 = shalt.err (!%p425_p12)
}
  0x6d   : > { %292 = dma.vmem_to_hbm [thread:$0]  (%p583_p8), %s645_s19, 128, %s650_s29, %s177_s15  }
  0x6e PF: > { %s202_s25 = sand.u32 1, %s459_s9   ;;  %p713_p13 = scmp.ne.s32.totalorder %s699_s16, 0 }
  0x6f   : > { %p714_p0 = scmp.ge.s32.totalorder %s471_s12, 2  ;;  %s203_s23 = scalar_lea.sflag [#allocation4], %s202_s25 }
  0x71   : > { %p303_p5 = pnand %p714_p0, %p713_p13 }
  0x73   : > { %454 = dma.done.wait (!%p303_p5), %s203_s23, 128  }
  0x74   : > { %456 = vsyncadd (!%p303_p5), %s203_s23, 4294967168  ;;  %p16_p10 = scmp.ge.s32.totalorder %s539_s20, 4   ;;  %s715_s9 = smov %s463_s10 }
  0x75   : > { %s716_s10 = smov %s467_s11  ;;  %s717_s11 = smov %s575_s7 }
  0x76   : > { %s718_s12 = smov %s539_s20  ;;  %18 = sbr.rel (!%p16_p10) target bundleno = 6 (0x6), region = 78 }
  0x7d   :  { %208 = vsyncpa [#allocation3], 1 }
  0x7e   :  { %210 = vsyncpa [#allocation3 + $0x1], 1 }
  0x7f   :  { %211 = vsyncpa [#allocation6], 1 }
  0x80   :  { %213 = vsyncpa [#allocation6 + $0x1], 1 }
  0x81   :  { %214 = vsyncpa [#allocation4], 1 }
  0x82   :  { %216 = vsyncpa [#allocation4 + $0x1], 1 }

// kernel: encoder_forward.1
= control target key start
LH: loop header
LB: loop body
LE: loop exit
PB: predicated region body
PF: predicated region fallthrough
CT: control target
= control target key end

     0   :  { %16 = vsyncpa [#allocation5], 0  ;;  %s6225_s0 = inlined_call_operand.vmem [shape: bf16[8,2,32], index: 0, kind: input, shape index: {}]   ;;  %s6226_s1 = inlined_call_operand.hbm [shape: bf16[32,384], index: 1, kind: input, shape index: {}]   ;;  %s6227_s2 = inlined_call_operand.vmem [shape: bf16[128,384], index: 2, kind: input, shape index: {}]   ;;  %s6228_s3 = inlined_call_operand.vmem [shape: f32[1,384], index: 3, kind: input, shape index: {}]   ;;  %s6229_s4 = inlined_call_operand.vmem [shape: f32[1,128], index: 4, kind: input, shape index: {}]   ;;  %s6230_s5 = inlined_call_operand.hbm [shape: bf16[128,384], index: 5, kind: input, shape index: {}]   ;;  %s6231_s6 = inlined_call_operand.hbm [shape: bf16[128,384], index: 6, kind: input, shape index: {}]   ;;  %s6232_s7 = inlined_call_operand.vmem [shape: f32[1,384], index: 7, kind: input, shape index: {}]   ;;  %s6233_s8 = inlined_call_operand.hbm [shape: f32[1,128], index: 8, kind: input, shape index: {}]   ;;  %s6234_s9 = inlined_call_operand.vmem [shape: bf16[8,2,128], index: 9, kind: output, shape index: {0}]   ;;  %s6235_s10 = inlined_call_operand.hbm [shape: f32[2,2,128], index: 10, kind: output, shape index: {1}]  }
   0x1   :  { %17 = vsyncpa [#allocation8], 0 }
   0x2   :  { %18 = vsyncpa [#allocation11], 0 }
   0x3   :  { %19 = vsyncpa [#allocation6], 0  ;;  %s4901_s13 = smov [#allocation7]   ;;  %s4902_s15 = smov [#allocation4]  }
   0x4   :  { %s45_s14 = sshll.u32 %s4901_s13, 4  ;;  %s27_s16 = sshll.u32 %s4902_s15, 4  ;;  %s46_s14 = int_to_ptr.vmem [resolvable:$true] %s45_s14  ;;  %s4970_s16 = int_to_ptr.vmem [resolvable:$true] %s27_s16 }
   0x5   :  { %s4783_s19 = scalar_lea.hbm %s6230_s5, 3072 }
   0x6   :  { %p4784_p0 = scmp.ne.s32.totalorder %s6230_s5, %s4783_s19  ;;  %p4787_p1 = scmp.lt.u32.totalorder %s4783_s19, %s6230_s5 }
   0x8   :  { %p4789_p2 = pnand %p4787_p1, %p4784_p0 }
   0xa   :  { %4792 = shalt.err (!%p4789_p2)
}
   0xb   :  { %s4793_s24 = scalar_lea.vmem %s46_s14, 3072  ;;  %p4798_p4 = scmp.lt.s32.totalorder %s46_s14, %s46_s14 }
   0xc   :  { %p4794_p3 = scmp.ne.s32.totalorder %s46_s14, %s4793_s24  ;;  %p4799_p5 = scmp.lt.s32.totalorder %s4793_s24, %s4793_s24 }
   0xe   :  { %p4800_p6 = por %p4799_p5, %p4798_p4 }
  0x10   :  { %p4801_p7 = pnand %p4800_p6, %p4794_p3 }
  0x12   :  { %4804 = shalt.err (!%p4801_p7)
}
  0x13   :  { %s4903_s25 = smov 192   ;;  %s4904_s26 = smov 12  }
  0x14   :  { %51 = dma.hbm_to_vmem [thread:$0]  %s6230_s5, 3072, %s46_s14, [#allocation8], %s4903_s25, %s4903_s25, %s4904_s26  }
  0x15   :  { %s4805_s11 = scalar_lea.hbm %s6226_s1, 768 }
  0x16   :  { %p4806_p8 = scmp.ne.s32.totalorder %s6226_s1, %s4805_s11  ;;  %p4809_p9 = scmp.lt.u32.totalorder %s4805_s11, %s6226_s1 }
  0x18   :  { %p4811_p10 = pnand %p4809_p9, %p4806_p8 }
  0x1a   :  { %4814 = shalt.err (!%p4811_p10)
}
  0x1b   :  { %s4815_s18 = scalar_lea.vmem %s4970_s16, 768  ;;  %p4820_p12 = scmp.lt.s32.totalorder %s4970_s16, %s4970_s16 }
  0x1c   :  { %p4816_p11 = scmp.ne.s32.totalorder %s4970_s16, %s4815_s18  ;;  %p4821_p13 = scmp.lt.s32.totalorder %s4815_s18, %s4815_s18 }
  0x1e   :  { %p4822_p0 = por %p4821_p13, %p4820_p12 }
  0x20   :  { %p4823_p1 = pnand %p4822_p0, %p4816_p11 }
  0x22   :  { %4826 = shalt.err (!%p4823_p1)
}
  0x23   :  { %33 = dma.hbm_to_vmem [thread:$0]  %s6226_s1, 768, %s4970_s16, [#allocation5], %s4903_s25, %s4903_s25, %s4904_s26  }
  0x24   :  { %s4905_s19 = smov [#allocation9]   ;;  %s4906_s21 = smov [#allocation10]  }
  0x25   :  { %s57_s20 = sshll.u32 %s4905_s19, 4  ;;  %s72_s22 = sshll.u32 %s4906_s21, 4  ;;  %s58_s20 = int_to_ptr.vmem [resolvable:$true] %s57_s20  ;;  %s73_s22 = int_to_ptr.vmem [resolvable:$true] %s72_s22 }
  0x26   :  { %s4827_s27 = scalar_lea.hbm %s6231_s6, 3072 }
  0x27   :  { %p4828_p2 = scmp.ne.s32.totalorder %s6231_s6, %s4827_s27  ;;  %p4831_p3 = scmp.lt.u32.totalorder %s4827_s27, %s6231_s6 }
  0x29   :  { %p4833_p4 = pnand %p4831_p3, %p4828_p2 }
  0x2b   :  { %4836 = shalt.err (!%p4833_p4)
}
  0x2c   :  { %s4837_s1 = scalar_lea.vmem %s58_s20, 3072  ;;  %p4842_p6 = scmp.lt.s32.totalorder %s58_s20, %s58_s20 }
  0x2d   :  { %p4838_p5 = scmp.ne.s32.totalorder %s58_s20, %s4837_s1  ;;  %p4843_p7 = scmp.lt.s32.totalorder %s4837_s1, %s4837_s1 }
  0x2f   :  { %p4844_p8 = por %p4843_p7, %p4842_p6 }
  0x31   :  { %p4845_p9 = pnand %p4844_p8, %p4838_p5 }
  0x33   :  { %4848 = shalt.err (!%p4845_p9)
}
  0x34   :  { %63 = dma.hbm_to_vmem [thread:$0]  %s6231_s6, 3072, %s58_s20, [#allocation8], %s4903_s25, %s4903_s25, %s4904_s26  }
  0x35   :  { %s4849_s17 = scalar_lea.hbm %s6233_s8, 16 }
  0x36   :  { %p4850_p10 = scmp.ne.s32.totalorder %s6233_s8, %s4849_s17  ;;  %p4853_p11 = scmp.lt.u32.totalorder %s4849_s17, %s6233_s8 }
  0x38   :  { %p4855_p12 = pnand %p4853_p11, %p4850_p10 }
  0x3a   :  { %4858 = shalt.err (!%p4855_p12)
}
  0x3b   :  { %s4859_s21 = scalar_lea.vmem %s73_s22, 16  ;;  %s4863_s23 = scalar_lea.vmem %s73_s22, 32 }
  0x3c   :  { %p4860_p13 = scmp.ne.s32.totalorder %s73_s22, %s4859_s21  ;;  %p4864_p0 = scmp.lt.s32.totalorder %s73_s22, %s73_s22 }
  0x3d   :  { %p4865_p1 = scmp.lt.s32.totalorder %s4863_s23, %s4859_s21 }
  0x3f   :  { %p4866_p2 = por %p4865_p1, %p4864_p0 }
  0x41   :  { %p4867_p3 = pnand %p4866_p2, %p4860_p13 }
  0x43   :  { %4870 = shalt.err (!%p4867_p3)
}
  0x44   :  { %75 = dma.hbm_to_vmem [thread:$0]  %s6233_s8, 16, %s73_s22, [#allocation11]  }
  0x45   :  { %4893 = dma.done.wait [#allocation5], 768  }
  0x46   :  { %4894 = vsyncadd [#allocation5], 4294966528 }
  0x47   :  { %4895 = dma.done.wait [#allocation8], 6144  }
  0x48   :  { %4896 = vsyncadd [#allocation8], 4294961152 }
  0x49   :  { %4897 = dma.done.wait [#allocation11], 16  }
  0x4a   :  { %4898 = vsyncadd [#allocation11], 4294967280  ;;  %v4907_v0 = vmov 0.0   ;;  %v4908_v1 = vmov 0   ;;  %vm4909_vm0 = vmmov 0   ;;  %v107_v2 = vlaneseq  ;;  %s4912_s22 = smov [#allocation12]  }
  0x4b   :  { %4108 = vmatprep.subr.bf16.mxu1 %v4907_v0  ;;  %247 = vmatprep.mubr.bf16.mxu0 %v4908_v1  ;;  %v4910_v3 = vmov 1966171168   ;;  %v4470_v5 = vld [vmem:[#allocation4 + $0x4] ss:$12 sps:$4 sm:$0xff]   ;;  %v4472_v8 = vld [vmem:[#allocation4] ss:$12 sps:$4 sm:$0xff]  }
  0x4c   :  { %4112 = vmatprep.mubr.msk.bf16.mxu1 %vm4909_vm0, %v4907_v0  ;;  %v135_v4 = vunpack.c.l.s4 %v4910_v3  ;;  %v5038_v6 = vshrl.u32 %v107_v2, 7  ;;  %215 = vmatprep.subr.bf16.mxu0 %v4470_v5  ;;  %v4473_v9 = vld [vmem:[#allocation4 + $0x8] ss:$12 sps:$4 sm:$0xff]   ;;  %v4476_v11 = vld [vmem:[#allocation4 + $0x18] ss:$12 sps:$4 sm:$0xff]   ;;  %vm211_vm1 = vcmask 261120  }
  0x4d   :  { %216 = vmatpush1.bf16.msra.mxu0 %v4472_v8  ;;  %v4474_v10 = vld [vmem:[#allocation4 + $0x1c] ss:$12 sps:$4 sm:$0xff]   ;;  %4109 = vmatpush3.bf16.msra.mxu1 %v4473_v9  ;;  %v4477_v12 = vld [vmem:[#allocation4 + $0x20] ss:$12 sps:$4 sm:$0xff]   ;;  %v93_v18 = vld [vmem:[%s6225_s0 + $0x4] sm:$0x1] }
  0x4e   :  { %v136_v7 = vunpack.c.0.s8 %v135_v4  ;;  %v89_v13 = vld [vmem:[%s6225_s0] sm:$0x1]  ;;  %217 = vmatprep.subr.bf16.mxu0 %v4474_v10  ;;  %4110 = vmatprep.subr.bf16.mxu1 %v4907_v0  ;;  %v90_v15 = vld [vmem:[%s6225_s0 + $0x1] sm:$0x1]  ;;  %v91_v16 = vld [vmem:[%s6225_s0 + $0x2] sm:$0x1] }
  0x4f   :  { %v92_v17 = vld [vmem:[%s6225_s0 + $0x3] sm:$0x1]  ;;  %v94_v19 = vld [vmem:[%s6225_s0 + $0x5] sm:$0x1]  ;;  %v95_v20 = vld [vmem:[%s6225_s0 + $0x6] sm:$0x1]  ;;  %v130_v21 = vcombine.low %v89_v13, %v90_v15 }
  0x50   :  { %v5044_v14 = vsub.s32 %v136_v7, %v5038_v6  ;;  %v131_v22 = vcombine.low %v91_v16, %v92_v17  ;;  %v96_v23 = vld [vmem:[%s6225_s0 + $0x7] sm:$0x1]  ;;  %v132_v24 = vcombine.low %v93_v18, %v94_v19  ;;  %v5084_v35 = vld [vmem:[%s6227_s2] ss:$12 sps:$4 sm:$0xff]   ;;  %v5089_v37 = vld [vmem:[%s6227_s2 + $0x1c] ss:$12 sps:$4 sm:$0xff]  }
  0x51   :  { %218 = vmatpush1.bf16.msra.mxu0 %v4476_v11  ;;  %4111 = vmatpush3.bf16.msra.mxu1 %v4477_v12  ;;  %v133_v25 = vcombine.low %v95_v20, %v96_v23  ;;  %v5073_v28 = vld [vmem:[%s6227_s2 + $0x4] ss:$12 sps:$4 sm:$0xff]   ;;  %v5094_v38 = vld [vmem:[%s6227_s2 + $0x8] ss:$12 sps:$4 sm:$0xff]   ;;  %v5106_v40 = vld [vmem:[%s6227_s2 + $0x20] ss:$12 sps:$4 sm:$0xff]  }
  0x52   :  { %v140_v26 = vrot.slane %v130_v21, %v5044_v14  ;;  %v147_v27 = vrot.slane %v131_v22, %v5044_v14  ;;  %v154_v29 = vrot.slane %v132_v24, %v5044_v14  ;;  %4116 = vmatprep.subr.bf16.mxu1 %v4907_v0  ;;  %936 = vmatprep.subr.bf16.mxu0 %v5073_v28  ;;  %v5100_v39 = vld [vmem:[%s6227_s2 + $0x18] ss:$12 sps:$4 sm:$0xff]   ;;  %v5112_v41 = vld [vmem:[%s6227_s2 + $0x34] ss:$12 sps:$4 sm:$0xff]   ;;  %v5121_v42 = vld [vmem:[%s6227_s2 + $0x30] ss:$12 sps:$4 sm:$0xff]  }
  0x53   :  { %v161_v30 = vrot.slane %v133_v25, %v5044_v14  ;;  %v5128_v43 = vld [vmem:[%s6227_s2 + $0x38] ss:$12 sps:$4 sm:$0xff]   ;;  %v5140_v45 = vld [vmem:[%s6227_s2 + $0x48] ss:$12 sps:$4 sm:$0xff]   ;;  %v5150_v47 = vld [vmem:[%s6227_s2 + $0x50] ss:$12 sps:$4 sm:$0xff]  }
  0x54   :  { %v162_v31 = vcombine.low %v140_v26, %v147_v27  ;;  %v5134_v44 = vld [vmem:[%s6227_s2 + $0x4c] ss:$12 sps:$4 sm:$0xff]   ;;  %v5145_v46 = vld [vmem:[%s6227_s2 + $0x64] ss:$12 sps:$4 sm:$0xff]   ;;  %v5164_v49 = vld [vmem:[%s6227_s2 + $0x68] ss:$12 sps:$4 sm:$0xff]  }
  0x55   :  { %v163_v32 = vcombine.low %v154_v29, %v161_v30  ;;  %v5159_v48 = vld [vmem:[%s6227_s2 + $0x60] ss:$12 sps:$4 sm:$0xff]   ;;  %v5169_v50 = vld [vmem:[%s6227_s2 + $0x7c] ss:$12 sps:$4 sm:$0xff]   ;;  %v5178_v51 = vld [vmem:[%s6227_s2 + $0x78] ss:$12 sps:$4 sm:$0xff]  }
  0x56   :  { %v170_v33 = vrot.slane %v162_v31, %v5044_v14  ;;  %v5183_v52 = vld [vmem:[%s6227_s2 + $0x80] ss:$12 sps:$4 sm:$0xff]   ;;  %v5197_v54 = vld [vmem:[%s6227_s2 + $0x90] ss:$12 sps:$4 sm:$0xff]   ;;  %v5202_v55 = vld [vmem:[%s6227_s2 + $0x98] ss:$12 sps:$4 sm:$0xff]  }
  0x57   :  { %v177_v34 = vrot.slane %v163_v32, %v5044_v14  ;;  %v5188_v53 = vld [vmem:[%s6227_s2 + $0x94] ss:$12 sps:$4 sm:$0xff]   ;;  %v5207_v56 = vld [vmem:[%s6227_s2 + $0xac] ss:$12 sps:$4 sm:$0xff]   ;;  %v5221_v58 = vld [vmem:[%s6227_s2 + $0xb0] ss:$12 sps:$4 sm:$0xff]  }
  0x58   :  { %v5216_v57 = vld [vmem:[%s6227_s2 + $0xa8] ss:$12 sps:$4 sm:$0xff]   ;;  %v4911_v59 = vmov 1983009808   ;;  %v109_v61 = vsub.s32 0, %v5038_v6  ;;  %v117_v62 = vsub.s32 2, %v5038_v6 }
  0x59   :  { %v178_v36 = vcombine.low %v170_v33, %v177_v34  ;;  %v309_v60 = vunpack.c.l.s4 %v4911_v59  ;;  %v105_v63 = vld [vmem:[%s6228_s3] sm:$0x7]  ;;  %v113_v2 = vsub.s32 1, %v5038_v6  ;;  %s3767_s24 = sshll.u32 %s4912_s22, 4  ;;  %s3768_s24 = int_to_ptr.vmem [resolvable:$true] %s3767_s24 }
  0x5a   :  { %v110_v4 = vrot.slane %v105_v63, %v109_v61  ;;  %v118_v5 = vrot.slane %v105_v63, %v117_v62  ;;  %s4871_s27 = scalar_lea.vmem %s3768_s24, 64  ;;  %p4876_p5 = scmp.lt.s32.totalorder %s3768_s24, %s3768_s24 }
  0x5b   :  { %3789 = vmatmul.mubr.msk.bf16.vlgmr.msra.gmra.mrb[0].mxu0 %vm211_vm1, %v178_v36  ;;  %4113 = vmatmul.mubr.msk.bf16.vlgmr.msra.gmra.mrb[0].mxu1 %vm211_vm1, %v178_v36  ;;  %v310_v3 = vunpack.c.0.s8 %v309_v60  ;;  %v114_v7 = vrot.slane %v105_v63, %v113_v2  ;;  %p4872_p4 = scmp.ne.s32.totalorder %s3768_s24, %s4871_s27  ;;  %p4877_p6 = scmp.lt.s32.totalorder %s4871_s27, %s4871_s27 }
  0x5c   :  { %937 = vmatpush1.bf16.msra.mxu0 %v5084_v35  ;;  %4117 = vmatpush3.bf16.msra.mxu1 %v5094_v38 }
  0x5d   :  { %938 = vmatprep.subr.bf16.mxu0 %v5089_v37  ;;  %4118 = vmatprep.subr.bf16.mxu1 %v4907_v0  ;;  %v5281_v8 = vsub.s32 %v310_v3, %v5038_v6  ;;  %p4878_p7 = por %p4877_p6, %p4876_p5 }
  0x5e   :  { %968 = vmatprep.mubr.bf16.mxu0 %v4908_v1  ;;  %4132 = vmatprep.mubr.msk.bf16.mxu1 %vm4909_vm0, %v4907_v0 }
  0x5f   :  { %p4879_p8 = pnand %p4878_p7, %p4872_p4 }
  0x60   :  { %939 = vmatpush1.bf16.msra.mxu0 %v5100_v39  ;;  %4119 = vmatpush3.bf16.msra.mxu1 %v5106_v40 }
  0x61   :  { %940 = vmatprep.subr.bf16.mxu0 %v5112_v41  ;;  %4120 = vmatprep.subr.bf16.mxu1 %v4907_v0 }
  0x64   :  { %941 = vmatpush1.bf16.msra.mxu0 %v5121_v42  ;;  %4121 = vmatpush3.bf16.msra.mxu1 %v5128_v43 }
  0x65   :  { %942 = vmatprep.subr.bf16.mxu0 %v5134_v44  ;;  %4122 = vmatprep.subr.bf16.mxu1 %v4907_v0 }
  0x68   :  { %943 = vmatpush1.bf16.msra.mxu0 %v5140_v45  ;;  %4123 = vmatpush3.bf16.msra.mxu1 %v5150_v47 }
  0x69   :  { %944 = vmatprep.subr.bf16.mxu0 %v5145_v46  ;;  %4124 = vmatprep.subr.bf16.mxu1 %v4907_v0 }
  0x6c   :  { %945 = vmatpush1.bf16.msra.mxu0 %v5159_v48  ;;  %4125 = vmatpush3.bf16.msra.mxu1 %v5164_v49 }
  0x6d   :  { %946 = vmatprep.subr.bf16.mxu0 %v5169_v50  ;;  %4126 = vmatprep.subr.bf16.mxu1 %v4907_v0 }
  0x70   :  { %947 = vmatpush1.bf16.msra.mxu0 %v5178_v51  ;;  %4127 = vmatpush3.bf16.msra.mxu1 %v5183_v52 }
  0x71   :  { %948 = vmatprep.subr.bf16.mxu0 %v5188_v53  ;;  %4128 = vmatprep.subr.bf16.mxu1 %v4907_v0 }
  0x74   :  { %949 = vmatpush1.bf16.msra.mxu0 %v5197_v54  ;;  %4129 = vmatpush3.bf16.msra.mxu1 %v5202_v55 }
  0x75   :  { %950 = vmatprep.subr.bf16.mxu0 %v5207_v56  ;;  %4130 = vmatprep.subr.bf16.mxu1 %v4907_v0 }
  0x78   :  { %951 = vmatpush1.bf16.msra.mxu0 %v5216_v57  ;;  %4131 = vmatpush3.bf16.msra.mxu1 %v5221_v58 }
  0x79   :  { %1056 = vmatprep.subr.bf16.mxu0 %v5073_v28  ;;  %4136 = vmatprep.subr.bf16.mxu1 %v4907_v0 }
  0x7b   :  { %969 = vmatmul.mubr.bf16.vlgmr.msra.gmra.mrb[4].mxu0 %v4908_v1  ;;  %4133 = vmatmul.mubr.bf16.vlgmr.msra.gmra.mrb[4].mxu1 %v4908_v1 }
  0x7c   :  { %1057 = vmatpush1.bf16.msra.mxu0 %v5084_v35  ;;  %4137 = vmatpush3.bf16.msra.mxu1 %v5094_v38 }
  0x7d   :  { %1058 = vmatprep.subr.bf16.mxu0 %v5089_v37  ;;  %4138 = vmatprep.subr.bf16.mxu1 %v4907_v0 }
  0x7e   :  { %1088 = vmatprep.mubr.bf16.mxu0 %v4908_v1  ;;  %4152 = vmatprep.mubr.msk.bf16.mxu1 %vm4909_vm0, %v4907_v0 }
  0x80   :  { %1059 = vmatpush1.bf16.msra.mxu0 %v5100_v39  ;;  %4139 = vmatpush3.bf16.msra.mxu1 %v5106_v40 }
  0x81   :  { %1060 = vmatprep.subr.bf16.mxu0 %v5112_v41  ;;  %4140 = vmatprep.subr.bf16.mxu1 %v4907_v0 }
  0x84   :  { %1061 = vmatpush1.bf16.msra.mxu0 %v5121_v42  ;;  %4141 = vmatpush3.bf16.msra.mxu1 %v5128_v43 }
  0x85   :  { %1062 = vmatprep.subr.bf16.mxu0 %v5134_v44  ;;  %4142 = vmatprep.subr.bf16.mxu1 %v4907_v0 }
  0x88   :  { %1063 = vmatpush1.bf16.msra.mxu0 %v5140_v45  ;;  %4143 = vmatpush3.bf16.msra.mxu1 %v5150_v47 }
  0x89   :  { %1064 = vmatprep.subr.bf16.mxu0 %v5145_v46  ;;  %4144 = vmatprep.subr.bf16.mxu1 %v4907_v0 }
  0x8c   :  { %1065 = vmatpush1.bf16.msra.mxu0 %v5159_v48  ;;  %4145 = vmatpush3.bf16.msra.mxu1 %v5164_v49 }
  0x8d   :  { %1066 = vmatprep.subr.bf16.mxu0 %v5169_v50  ;;  %4146 = vmatprep.subr.bf16.mxu1 %v4907_v0 }
  0x90   :  { %1067 = vmatpush1.bf16.msra.mxu0 %v5178_v51  ;;  %4147 = vmatpush3.bf16.msra.mxu1 %v5183_v52 }
  0x91   :  { %1068 = vmatprep.subr.bf16.mxu0 %v5188_v53  ;;  %4148 = vmatprep.subr.bf16.mxu1 %v4907_v0 }
  0x94   :  { %1069 = vmatpush1.bf16.msra.mxu0 %v5197_v54  ;;  %4149 = vmatpush3.bf16.msra.mxu1 %v5202_v55 }
  0x95   :  { %1070 = vmatprep.subr.bf16.mxu0 %v5207_v56  ;;  %4150 = vmatprep.subr.bf16.mxu1 %v4907_v0 }
  0x98   :  { %1071 = vmatpush1.bf16.msra.mxu0 %v5216_v57  ;;  %4151 = vmatpush3.bf16.msra.mxu1 %v5221_v58 }
  0x99   :  { %1172 = vmatprep.subr.bf16.mxu0 %v5073_v28  ;;  %4156 = vmatprep.subr.bf16.mxu1 %v4907_v0 }
 0x12e   :  { %v249_v9 = vpop.f32.mrb[0].mxu0  ;;  %v292_v10 = vpop.f32.mrb[0].mxu1 }
 0x12f   :  { %v250_v11 = vadd.f32 %v249_v9, %v110_v4  ;;  %v251_v12 = vpop.f32.mrb[1].mxu0  ;;  %v293_v13 = vadd.f32 %v292_v10, %v118_v5  ;;  %v4114_v15 = vpop.f32.mrb[1].mxu1 }
 0x130   :  { %v252_v16 = vadd.f32 %v251_v12, %v114_v7  ;;  %v253_v17 = vpop.f32.mrb[2].mxu0  ;;  %v295_v18 = vpop.f32.mrb[2].mxu1 }
 0x131   :  { %v307_v19 = vcombine.high %v293_v13, %v293_v13  ;;  %v328_v20 = vrot.slane %v293_v13, %v5281_v8  ;;  %v254_v21 = vadd.f32 %v253_v17, %v110_v4  ;;  %v255_v22 = vpop.f32.mrb[3].mxu0  ;;  %v296_v23 = vadd.f32 %v295_v18, %v118_v5  ;;  %v4115_v24 = vpop.f32.mrb[3].mxu1 }
 0x132   :  { %v305_v25 = vcombine.low %v250_v11, %v252_v16  ;;  %v306_v26 = vcombine.high %v250_v11, %v252_v16  ;;  %v256_v27 = vadd.f32 %v255_v22, %v114_v7 }
 0x133   :  { %v335_v29 = vrot.slane %v307_v19, %v5281_v8  ;;  %v3791_v30 = vcombine.low %v328_v20, %v328_v20  ;;  %v3792_v31 = vcombine.high %v328_v20, %v328_v20  ;;  %v342_v32 = vcombine.high %v296_v23, %v296_v23 }
 0x134   :  { %v314_v33 = vrot.slane %v305_v25, %v5281_v8  ;;  %v321_v34 = vrot.slane %v306_v26, %v5281_v8  ;;  %v340_v36 = vcombine.low %v254_v21, %v256_v27  ;;  %v341_v59 = vcombine.high %v254_v21, %v256_v27 }
 0x135   :  { %v389_v60 = vrot.slane %v3791_v30, %v5281_v8  ;;  %v405_v63 = vrot.slane %v3792_v31, %v5281_v8  ;;  %v3793_v3 = vcombine.low %v335_v29, %v335_v29  ;;  %v3794_v4 = vcombine.high %v335_v29, %v335_v29 }
 0x136   :  { %v336_v5 = vcombine.low %v314_v33, %v328_v20  ;;  %v337_v9 = vcombine.high %v314_v33, %v328_v20  ;;  %v338_v7 = vcombine.low %v321_v34, %v335_v29  ;;  %v339_v10 = vcombine.high %v321_v34, %v335_v29 }
 0x137   :  { %v421_v11 = vrot.slane %v3793_v3, %v5281_v8  ;;  %v437_v12 = vrot.slane %v3794_v4, %v5281_v8  ;;  %v529_v13 = vpack.c.bf16 %v389_v60, %v389_v60  ;;  %v532_v15 = vpack.c.bf16 %v405_v63, %v405_v63 }
 0x138   :  { %v382_v16 = vrot.slane %v336_v5, %v5281_v8  ;;  %v398_v17 = vrot.slane %v337_v9, %v5281_v8  ;;  %v414_v18 = vrot.slane %v338_v7, %v5281_v8  ;;  %v430_v19 = vrot.slane %v339_v10, %v5281_v8 }
 0x139   :  { %v535_v21 = vpack.c.bf16 %v421_v11, %v421_v11  ;;  %v538_v22 = vpack.c.bf16 %v437_v12, %v437_v12  ;;  %v589_v20 = vrot.slane %v529_v13, %v5044_v14  ;;  %v612_v24 = vrot.slane %v532_v15, %v5044_v14 }
 0x13a   :  { %v390_v25 = vcombine.high %v382_v16, %v382_v16  ;;  %v406_v26 = vcombine.high %v398_v17, %v398_v17  ;;  %v422_v27 = vcombine.high %v414_v18, %v414_v18  ;;  %v438_v29 = vcombine.high %v430_v19, %v430_v19 }
 0x13b   :  { %v635_v30 = vrot.slane %v535_v21, %v5044_v14  ;;  %v658_v31 = vrot.slane %v538_v22, %v5044_v14  ;;  %v349_v33 = vrot.slane %v340_v36, %v5281_v8  ;;  %v356_v34 = vrot.slane %v341_v59, %v5281_v8 }
 0x13c   :  { %v3799_v60 = vpack.c.bf16 %v390_v25, %v382_v16  ;;  %v3800_v63 = vpack.c.bf16 %v406_v26, %v398_v17  ;;  %v3801_v3 = vpack.c.bf16 %v422_v27, %v414_v18  ;;  %v3802_v4 = vpack.c.bf16 %v438_v29, %v430_v19 }
 0x13d   :  { %v363_v5 = vrot.slane %v296_v23, %v5281_v8  ;;  %v370_v9 = vrot.slane %v342_v32, %v5281_v8 }
 0x13e   :  { %v582_v7 = vrot.slane %v3799_v60, %v5044_v14  ;;  %v605_v10 = vrot.slane %v3800_v63, %v5044_v14  ;;  %v628_v11 = vrot.slane %v3801_v3, %v5044_v14  ;;  %v651_v12 = vrot.slane %v3802_v4, %v5044_v14 }
 0x13f   :  { %v371_v13 = vcombine.low %v349_v33, %v363_v5  ;;  %v372_v36 = vcombine.high %v349_v33, %v363_v5  ;;  %v373_v15 = vcombine.low %v356_v34, %v370_v9  ;;  %v374_v59 = vcombine.high %v356_v34, %v370_v9 }
 0x140   :  { %v590_v16 = vcombine.low %v582_v7, %v589_v20  ;;  %v613_v17 = vcombine.low %v605_v10, %v612_v24  ;;  %v636_v18 = vcombine.low %v628_v11, %v635_v30  ;;  %v659_v19 = vcombine.low %v651_v12, %v658_v31 }
 0x141   :  { %v3795_v21 = vcombine.low %v363_v5, %v363_v5  ;;  %v446_v23 = vrot.slane %v371_v13, %v5281_v8  ;;  %v3796_v32 = vcombine.high %v363_v5, %v363_v5  ;;  %v462_v22 = vrot.slane %v372_v36, %v5281_v8 }
 0x142   :  { %3807 = vst.sshfl [vmem:[#allocation3] sm:$0x15 pattern:$0x73625140] %v590_v16  ;;  %v3797_v25 = vcombine.low %v370_v9, %v370_v9  ;;  %v478_v26 = vrot.slane %v373_v15, %v5281_v8  ;;  %v3798_v27 = vcombine.high %v370_v9, %v370_v9  ;;  %v494_v29 = vrot.slane %v374_v59, %v5281_v8 }
 0x143   :  { %3808 = vst.sshfl [vmem:[#allocation3 + $0x3] sm:$0x15 pattern:$0x73625140] %v613_v17  ;;  %v453_v20 = vrot.slane %v3795_v21, %v5281_v8  ;;  %v454_v24 = vcombine.high %v446_v23, %v446_v23  ;;  %v469_v30 = vrot.slane %v3796_v32, %v5281_v8  ;;  %v470_v31 = vcombine.high %v462_v22, %v462_v22 }
 0x144   :  { %3809 = vst.sshfl [vmem:[#allocation3 + $0x6] sm:$0x15 pattern:$0x73625140] %v636_v18  ;;  %v485_v33 = vrot.slane %v3797_v25, %v5281_v8  ;;  %v486_v34 = vcombine.high %v478_v26, %v478_v26  ;;  %v501_v60 = vrot.slane %v3798_v27, %v5281_v8  ;;  %v502_v63 = vcombine.high %v494_v29, %v494_v29 }
 0x145   :  { %3810 = vst.sshfl [vmem:[#allocation3 + $0x9] sm:$0x15 pattern:$0x73625140] %v659_v19  ;;  %v541_v3 = vpack.c.bf16 %v453_v20, %v453_v20  ;;  %v544_v4 = vpack.c.bf16 %v469_v30, %v469_v30  ;;  %v3803_v5 = vpack.c.bf16 %v454_v24, %v446_v23  ;;  %v3804_v7 = vpack.c.bf16 %v470_v31, %v462_v22 }
 0x146   :  { %v547_v10 = vpack.c.bf16 %v485_v33, %v485_v33  ;;  %v550_v9 = vpack.c.bf16 %v501_v60, %v501_v60  ;;  %v3805_v11 = vpack.c.bf16 %v486_v34, %v478_v26  ;;  %v3806_v12 = vpack.c.bf16 %v502_v63, %v494_v29 }
 0x147   :  { %v674_v13 = vrot.slane %v3803_v5, %v5044_v14  ;;  %v681_v36 = vrot.slane %v541_v3, %v5044_v14  ;;  %v697_v15 = vrot.slane %v3804_v7, %v5044_v14  ;;  %v704_v59 = vrot.slane %v544_v4, %v5044_v14 }
 0x148   :  { %v720_v16 = vrot.slane %v3805_v11, %v5044_v14  ;;  %v727_v17 = vrot.slane %v547_v10, %v5044_v14  ;;  %v743_v18 = vrot.slane %v3806_v12, %v5044_v14  ;;  %v750_v19 = vrot.slane %v550_v9, %v5044_v14  ;;  %v5326_v12 = vld [vmem:[%s6229_s4] ss:$0 sm:$0xff] }
 0x149   :  { %v682_v21 = vcombine.low %v674_v13, %v681_v36  ;;  %v705_v23 = vcombine.low %v697_v15, %v704_v59  ;;  %v1017_v32 = vld [vmem:[#allocation3] sm:$0x7] }
 0x14a   :  { %v728_v22 = vcombine.low %v720_v16, %v727_v17  ;;  %v751_v25 = vcombine.low %v743_v18, %v750_v19  ;;  %v1027_v26 = vrot.slane %v1017_v32, 1  ;;  %v1018_v27 = vunpack.c.l.bf16 %v1017_v32 }
 0x14b   :  { %3811 = vst.sshfl [vmem:[#allocation3 + $0xc] sm:$0x15 pattern:$0x73625140] %v682_v21  ;;  %v1045_v15 = vrot.slane %v1017_v32, 2 }
 0x14c   :  { %3812 = vst.sshfl [vmem:[#allocation3 + $0xf] sm:$0x15 pattern:$0x73625140] %v705_v23  ;;  %v1029_v20 = vunpack.c.l.bf16 %v1027_v26  ;;  %v1138_v32 = vld [vmem:[#allocation3 + $0x3] sm:$0x7] }
 0x14d   :  { %3813 = vst.sshfl [vmem:[#allocation3 + $0x12] sm:$0x15 pattern:$0x73625140] %v728_v22  ;;  %v1047_v17 = vunpack.c.l.bf16 %v1045_v15  ;;  %v1160_v15 = vrot.slane %v1138_v32, 2 }
 0x14e   :  { %3814 = vst.sshfl [vmem:[#allocation3 + $0x15] sm:$0x15 pattern:$0x73625140] %v751_v25  ;;  %v970_v29 = vpop.f32.mrb[4].mxu0  ;;  %v1011_v24 = vpop.f32.mrb[4].mxu1 }
 0x14f   :  { %v1019_v30 = vadd.f32 %v1018_v27, %v970_v29  ;;  %v972_v31 = vpop.f32.mrb[5].mxu0  ;;  %v4134_v33 = vpop.f32.mrb[5].mxu1  ;;  %v1043_v36 = vadd.f32 %v5326_v12, %v1011_v24  ;;  %v1148_v29 = vrot.slane %v1138_v32, 1 }
 0x150   :  { %v974_v34 = vpop.f32.mrb[6].mxu0  ;;  %v1014_v60 = vpop.f32.mrb[6].mxu1  ;;  %v1030_v5 = vadd.f32 %v1029_v20, %v972_v31  ;;  %v1139_v20 = vunpack.c.l.bf16 %v1138_v32 }
 0x151   :  { %v3839_v63 = vmul.f32 -1.442695, %v1019_v30  ;;  %v975_v3 = vpop.f32.mrb[7].mxu0  ;;  %v4135_v4 = vpop.f32.mrb[7].mxu1  ;;  %v1150_v60 = vunpack.c.l.bf16 %v1148_v29 }
 0x152   :  { %v3840_v7 = vmul.f32 -1.442695, %v1030_v5 }
 0x153   :  { %4574 = vpow2.f32 %v3839_v63 }
 0x154   :  { %4576 = vpow2.f32 %v3840_v7 }
 0x15d   :  { %v4575_v10 = vpop.eup %4574 }
 0x15e   :  { %v1023_v9 = vadd.f32 1.0, %v4575_v10  ;;  %v4577_v11 = vpop.eup %4576 }
 0x15f   :  { %v1034_v13 = vadd.f32 1.0, %v4577_v11 }
 0x160   :  { %4578 = vrcp.f32 %v1023_v9 }
 0x161   :  { %4580 = vrcp.f32 %v1034_v13 }
 0x16a   :  { %v4579_v59 = vpop.eup %4578 }
 0x16b   :  { %v1044_v16 = vmul.f32 %v4579_v59, %v1043_v36  ;;  %v4581_v19 = vpop.eup %4580 }
 0x16c   :  { %v1050_v21 = vsub.f32 1.0, %v4581_v19  ;;  %v1052_v25 = vmul.f32 0.0, %v4581_v19  ;;  %v1162_v19 = vunpack.c.l.bf16 %v1160_v15 }
 0x16d   :  { %v1048_v18 = vadd.f32 %v1047_v17, %v1044_v16 }
 0x16f   :  { %4582 = vtanh.f32 %v1048_v18 }
 0x179   :  { %v4583_v23 = vpop.eup %4582 }
 0x17a   :  { %v1051_v22 = vmul.f32 %v4583_v23, %v1050_v21 }
 0x17c   :  { %v5329_v26 = vadd.f32 %v1052_v25, %v1051_v22 }
 0x17e   :  { %v1054_v27 = vpack.c.bf16 %v5329_v26, %v5329_v26 }
 0x180   :  { %1055 = vst [vmem:[#allocation2] sm:$0x1] %v1054_v27  ;;  %1089 = vmatmul.mubr.bf16.vlgmr.msra.gmra.mrb[8].mxu0 %v1054_v27  ;;  %4153 = vmatmul.mubr.bf16.vlgmr.msra.gmra.mrb[8].mxu1 %v1054_v27 }
 0x181   :  { %1173 = vmatpush1.bf16.msra.mxu0 %v5084_v35  ;;  %4157 = vmatpush3.bf16.msra.mxu1 %v5094_v38 }
 0x182   :  { %1174 = vmatprep.subr.bf16.mxu0 %v5089_v37  ;;  %4158 = vmatprep.subr.bf16.mxu1 %v4907_v0 }
 0x183   :  { %1204 = vmatprep.mubr.bf16.mxu0 %v4908_v1  ;;  %4172 = vmatprep.mubr.msk.bf16.mxu1 %vm4909_vm0, %v4907_v0 }
 0x185   :  { %1175 = vmatpush1.bf16.msra.mxu0 %v5100_v39  ;;  %4159 = vmatpush3.bf16.msra.mxu1 %v5106_v40 }
 0x186   :  { %1176 = vmatprep.subr.bf16.mxu0 %v5112_v41  ;;  %4160 = vmatprep.subr.bf16.mxu1 %v4907_v0 }
 0x189   :  { %1177 = vmatpush1.bf16.msra.mxu0 %v5121_v42  ;;  %4161 = vmatpush3.bf16.msra.mxu1 %v5128_v43 }
 0x18a   :  { %1178 = vmatprep.subr.bf16.mxu0 %v5134_v44  ;;  %4162 = vmatprep.subr.bf16.mxu1 %v4907_v0 }
 0x18d   :  { %1179 = vmatpush1.bf16.msra.mxu0 %v5140_v45  ;;  %4163 = vmatpush3.bf16.msra.mxu1 %v5150_v47 }
 0x18e   :  { %1180 = vmatprep.subr.bf16.mxu0 %v5145_v46  ;;  %4164 = vmatprep.subr.bf16.mxu1 %v4907_v0 }
 0x191   :  { %1181 = vmatpush1.bf16.msra.mxu0 %v5159_v48  ;;  %4165 = vmatpush3.bf16.msra.mxu1 %v5164_v49 }
 0x192   :  { %1182 = vmatprep.subr.bf16.mxu0 %v5169_v50  ;;  %4166 = vmatprep.subr.bf16.mxu1 %v4907_v0 }
 0x195   :  { %1183 = vmatpush1.bf16.msra.mxu0 %v5178_v51  ;;  %4167 = vmatpush3.bf16.msra.mxu1 %v5183_v52 }
 0x196   :  { %1184 = vmatprep.subr.bf16.mxu0 %v5188_v53  ;;  %4168 = vmatprep.subr.bf16.mxu1 %v4907_v0 }
 0x199   :  { %1185 = vmatpush1.bf16.msra.mxu0 %v5197_v54  ;;  %4169 = vmatpush3.bf16.msra.mxu1 %v5202_v55 }
 0x19a   :  { %1186 = vmatprep.subr.bf16.mxu0 %v5207_v56  ;;  %4170 = vmatprep.subr.bf16.mxu1 %v4907_v0 }
 0x19d   :  { %1187 = vmatpush1.bf16.msra.mxu0 %v5216_v57  ;;  %4171 = vmatpush3.bf16.msra.mxu1 %v5221_v58 }
 0x19e   :  { %1288 = vmatprep.subr.bf16.mxu0 %v5073_v28  ;;  %4176 = vmatprep.subr.bf16.mxu1 %v4907_v0 }
 0x253   :  { %v1090_v24 = vpop.f32.mrb[8].mxu0  ;;  %v1131_v30 = vpop.f32.mrb[8].mxu1 }
 0x254   :  { %v1140_v31 = vadd.f32 %v1139_v20, %v1090_v24  ;;  %v1092_v33 = vpop.f32.mrb[9].mxu0  ;;  %v4154_v34 = vpop.f32.mrb[9].mxu1  ;;  %v1158_v16 = vadd.f32 %v5326_v12, %v1131_v30 }
 0x255   :  { %v1094_v63 = vpop.f32.mrb[10].mxu0  ;;  %v1134_v3 = vpop.f32.mrb[10].mxu1  ;;  %v1151_v10 = vadd.f32 %v1150_v60, %v1092_v33 }
 0x256   :  { %v3842_v4 = vmul.f32 -1.442695, %v1140_v31  ;;  %v1095_v5 = vpop.f32.mrb[11].mxu0  ;;  %v4155_v7 = vpop.f32.mrb[11].mxu1 }
 0x257   :  { %v3843_v9 = vmul.f32 -1.442695, %v1151_v10 }
 0x258   :  { %4584 = vpow2.f32 %v3842_v4 }
 0x259   :  { %4586 = vpow2.f32 %v3843_v9 }
 0x262   :  { %v4585_v11 = vpop.eup %4584 }
 0x263   :  { %v1144_v13 = vadd.f32 1.0, %v4585_v11  ;;  %v4587_v36 = vpop.eup %4586 }
 0x264   :  { %v1155_v59 = vadd.f32 1.0, %v4587_v36 }
 0x265   :  { %4588 = vrcp.f32 %v1144_v13 }
 0x266   :  { %4590 = vrcp.f32 %v1155_v59 }
 0x26f   :  { %v4589_v17 = vpop.eup %4588 }
 0x270   :  { %v1159_v18 = vmul.f32 %v4589_v17, %v1158_v16  ;;  %v4591_v23 = vpop.eup %4590 }
 0x271   :  { %v1165_v22 = vsub.f32 1.0, %v4591_v23  ;;  %v1167_v29 = vmul.f32 %v4591_v23, %v5329_v26  ;;  %v1254_v26 = vld [vmem:[#allocation3 + $0x6] sm:$0x7] }
 0x272   :  { %v1163_v21 = vadd.f32 %v1162_v19, %v1159_v18  ;;  %v1264_v24 = vrot.slane %v1254_v26, 1  ;;  %v1255_v30 = vunpack.c.l.bf16 %v1254_v26  ;;  %v1276_v59 = vrot.slane %v1254_v26, 2 }
 0x274   :  { %4592 = vtanh.f32 %v1163_v21  ;;  %v1266_v3 = vunpack.c.l.bf16 %v1264_v24  ;;  %v1278_v21 = vunpack.c.l.bf16 %v1276_v59  ;;  %v5476_v59 = vld [vmem:[%s6227_s2 + $0x1c] ss:$12 sps:$4 sm:$0xff]  }
 0x27e   :  { %v4593_v25 = vpop.eup %4592 }
 0x27f   :  { %v1166_v27 = vmul.f32 %v4593_v25, %v1165_v22 }
 0x281   :  { %v5370_v20 = vadd.f32 %v1167_v29, %v1166_v27 }
 0x283   :  { %v1169_v32 = vpack.c.bf16 %v5370_v20, %v5370_v20 }
 0x285   :  { %1171 = vst [vmem:[#allocation2 + $0x1] sm:$0x1] %v1169_v32  ;;  %1205 = vmatmul.mubr.bf16.vlgmr.msra.gmra.mrb[12].mxu0 %v1169_v32  ;;  %4173 = vmatmul.mubr.bf16.vlgmr.msra.gmra.mrb[12].mxu1 %v1169_v32 }
 0x286   :  { %1289 = vmatpush1.bf16.msra.mxu0 %v5084_v35  ;;  %4177 = vmatpush3.bf16.msra.mxu1 %v5094_v38 }
 0x287   :  { %1290 = vmatprep.subr.bf16.mxu0 %v5089_v37  ;;  %4178 = vmatprep.subr.bf16.mxu1 %v4907_v0 }
 0x288   :  { %1320 = vmatprep.mubr.bf16.mxu0 %v4908_v1  ;;  %4192 = vmatprep.mubr.msk.bf16.mxu1 %vm4909_vm0, %v4907_v0 }
 0x28a   :  { %1291 = vmatpush1.bf16.msra.mxu0 %v5100_v39  ;;  %4179 = vmatpush3.bf16.msra.mxu1 %v5106_v40 }
 0x28b   :  { %1292 = vmatprep.subr.bf16.mxu0 %v5112_v41  ;;  %4180 = vmatprep.subr.bf16.mxu1 %v4907_v0 }
 0x28e   :  { %1293 = vmatpush1.bf16.msra.mxu0 %v5121_v42  ;;  %4181 = vmatpush3.bf16.msra.mxu1 %v5128_v43 }
 0x28f   :  { %1294 = vmatprep.subr.bf16.mxu0 %v5134_v44  ;;  %4182 = vmatprep.subr.bf16.mxu1 %v4907_v0 }
 0x292   :  { %1295 = vmatpush1.bf16.msra.mxu0 %v5140_v45  ;;  %4183 = vmatpush3.bf16.msra.mxu1 %v5150_v47 }
 0x293   :  { %1296 = vmatprep.subr.bf16.mxu0 %v5145_v46  ;;  %4184 = vmatprep.subr.bf16.mxu1 %v4907_v0 }
 0x296   :  { %1297 = vmatpush1.bf16.msra.mxu0 %v5159_v48  ;;  %4185 = vmatpush3.bf16.msra.mxu1 %v5164_v49 }
 0x297   :  { %1298 = vmatprep.subr.bf16.mxu0 %v5169_v50  ;;  %4186 = vmatprep.subr.bf16.mxu1 %v4907_v0 }
 0x29a   :  { %1299 = vmatpush1.bf16.msra.mxu0 %v5178_v51  ;;  %4187 = vmatpush3.bf16.msra.mxu1 %v5183_v52 }
 0x29b   :  { %1300 = vmatprep.subr.bf16.mxu0 %v5188_v53  ;;  %4188 = vmatprep.subr.bf16.mxu1 %v4907_v0 }
 0x29e   :  { %1301 = vmatpush1.bf16.msra.mxu0 %v5197_v54  ;;  %4189 = vmatpush3.bf16.msra.mxu1 %v5202_v55 }
 0x29f   :  { %1302 = vmatprep.subr.bf16.mxu0 %v5207_v56  ;;  %4190 = vmatprep.subr.bf16.mxu1 %v4907_v0 }
 0x2a2   :  { %1303 = vmatpush1.bf16.msra.mxu0 %v5216_v57  ;;  %4191 = vmatpush3.bf16.msra.mxu1 %v5221_v58 }
 0x2a3   :  { %1404 = vmatprep.subr.bf16.mxu0 %v5073_v28  ;;  %4196 = vmatprep.subr.bf16.mxu1 %v4907_v0 }
 0x358   :  { %v1206_v31 = vpop.f32.mrb[12].mxu0  ;;  %v1247_v33 = vpop.f32.mrb[12].mxu1 }
 0x359   :  { %v1256_v34 = vadd.f32 %v1255_v30, %v1206_v31  ;;  %v1208_v60 = vpop.f32.mrb[13].mxu0  ;;  %v4174_v63 = vpop.f32.mrb[13].mxu1  ;;  %v1274_v17 = vadd.f32 %v5326_v12, %v1247_v33 }
 0x35a   :  { %v1210_v4 = vpop.f32.mrb[14].mxu0  ;;  %v1250_v5 = vpop.f32.mrb[14].mxu1  ;;  %v1267_v11 = vadd.f32 %v1266_v3, %v1208_v60 }
 0x35b   :  { %v3844_v7 = vmul.f32 -1.442695, %v1256_v34  ;;  %v1211_v10 = vpop.f32.mrb[15].mxu0  ;;  %v4175_v9 = vpop.f32.mrb[15].mxu1 }
 0x35c   :  { %v3845_v13 = vmul.f32 -1.442695, %v1267_v11 }
 0x35d   :  { %4594 = vpow2.f32 %v3844_v7 }
 0x35e   :  { %4596 = vpow2.f32 %v3845_v13 }
 0x367   :  { %v4595_v28 = vpop.eup %4594 }
 0x368   :  { %v1260_v36 = vadd.f32 1.0, %v4595_v28  ;;  %v4597_v15 = vpop.eup %4596 }
 0x369   :  { %v1271_v16 = vadd.f32 1.0, %v4597_v15  ;;  %v5470_v15 = vld [vmem:[%s6227_s2 + $0x8] ss:$12 sps:$4 sm:$0xff]  }
 0x36a   :  { %4598 = vrcp.f32 %v1260_v36  ;;  %v5464_v36 = vld [vmem:[%s6227_s2] ss:$12 sps:$4 sm:$0xff]  }
 0x36b   :  { %4600 = vrcp.f32 %v1271_v16  ;;  %v5486_v16 = vld [vmem:[%s6227_s2 + $0x18] ss:$12 sps:$4 sm:$0xff]  }
 0x374   :  { %v4599_v18 = vpop.eup %4598 }
 0x375   :  { %v1275_v19 = vmul.f32 %v4599_v18, %v1274_v17  ;;  %v4601_v22 = vpop.eup %4600  ;;  %v5492_v17 = vld [vmem:[%s6227_s2 + $0x20] ss:$12 sps:$4 sm:$0xff]  }
 0x376   :  { %v1281_v25 = vsub.f32 1.0, %v4601_v22  ;;  %v1283_v32 = vmul.f32 %v4601_v22, %v5370_v20  ;;  %v5498_v18 = vld [vmem:[%s6227_s2 + $0x34] ss:$12 sps:$4 sm:$0xff]  }
 0x377   :  { %v1279_v23 = vadd.f32 %v1278_v21, %v1275_v19  ;;  %v5505_v19 = vld [vmem:[%s6227_s2 + $0x30] ss:$12 sps:$4 sm:$0xff]   ;;  %v5511_v21 = vld [vmem:[%s6227_s2 + $0x38] ss:$12 sps:$4 sm:$0xff]   ;;  %v5524_v22 = vld [vmem:[%s6227_s2 + $0x48] ss:$12 sps:$4 sm:$0xff]  }
 0x379   :  { %4602 = vtanh.f32 %v1279_v23  ;;  %v5517_v23 = vld [vmem:[%s6227_s2 + $0x4c] ss:$12 sps:$4 sm:$0xff]  }
 0x383   :  { %v4603_v27 = vpop.eup %4602 }
 0x384   :  { %v1282_v29 = vmul.f32 %v4603_v27, %v1281_v25  ;;  %v5530_v25 = vld [vmem:[%s6227_s2 + $0x50] ss:$12 sps:$4 sm:$0xff]  }
 0x385   :  { %v5536_v27 = vld [vmem:[%s6227_s2 + $0x64] ss:$12 sps:$4 sm:$0xff]  }
 0x386   :  { %v5411_v24 = vadd.f32 %v1283_v32, %v1282_v29  ;;  %v5543_v29 = vld [vmem:[%s6227_s2 + $0x60] ss:$12 sps:$4 sm:$0xff]   ;;  %v5549_v32 = vld [vmem:[%s6227_s2 + $0x68] ss:$12 sps:$4 sm:$0xff]  }
 0x388   :  { %v1285_v26 = vpack.c.bf16 %v5411_v24, %v5411_v24 }
 0x38a   :  { %1287 = vst [vmem:[#allocation2 + $0x2] sm:$0x1] %v1285_v26  ;;  %1321 = vmatmul.mubr.bf16.vlgmr.msra.gmra.mrb[16].mxu0 %v1285_v26  ;;  %4193 = vmatmul.mubr.bf16.vlgmr.msra.gmra.mrb[16].mxu1 %v1285_v26  ;;  %v5562_v26 = vld [vmem:[%s6227_s2 + $0x78] ss:$12 sps:$4 sm:$0xff]  }
 0x38b   :  { %1405 = vmatpush1.bf16.msra.mxu0 %v5084_v35  ;;  %4197 = vmatpush3.bf16.msra.mxu1 %v5094_v38  ;;  %v5451_v35 = vld [vmem:[%s6227_s2 + $0x4] ss:$12 sps:$4 sm:$0xff]  }
 0x38c   :  { %1406 = vmatprep.subr.bf16.mxu0 %v5089_v37  ;;  %4198 = vmatprep.subr.bf16.mxu1 %v4907_v0  ;;  %v1370_v37 = vld [vmem:[#allocation3 + $0x9] sm:$0x7] }
 0x38d   :  { %1436 = vmatprep.mubr.bf16.mxu0 %v4908_v1  ;;  %4212 = vmatprep.mubr.msk.bf16.mxu1 %vm4909_vm0, %v4907_v0  ;;  %v1380_v38 = vrot.slane %v1370_v37, 1  ;;  %v1392_v31 = vrot.slane %v1370_v37, 2 }
 0x38f   :  { %1407 = vmatpush1.bf16.msra.mxu0 %v5100_v39  ;;  %4199 = vmatpush3.bf16.msra.mxu1 %v5106_v40  ;;  %v1371_v39 = vunpack.c.l.bf16 %v1370_v37  ;;  %v1394_v3 = vunpack.c.l.bf16 %v1392_v31  ;;  %v5568_v37 = vld [vmem:[%s6227_s2 + $0x80] ss:$12 sps:$4 sm:$0xff]  }
 0x390   :  { %1408 = vmatprep.subr.bf16.mxu0 %v5112_v41  ;;  %4200 = vmatprep.subr.bf16.mxu1 %v4907_v0 }
 0x393   :  { %1409 = vmatpush1.bf16.msra.mxu0 %v5121_v42  ;;  %4201 = vmatpush3.bf16.msra.mxu1 %v5128_v43 }
 0x394   :  { %1410 = vmatprep.subr.bf16.mxu0 %v5134_v44  ;;  %4202 = vmatprep.subr.bf16.mxu1 %v4907_v0 }
 0x397   :  { %1411 = vmatpush1.bf16.msra.mxu0 %v5140_v45  ;;  %4203 = vmatpush3.bf16.msra.mxu1 %v5150_v47  ;;  %v1382_v45 = vunpack.c.l.bf16 %v1380_v38  ;;  %v5574_v38 = vld [vmem:[%s6227_s2 + $0x94] ss:$12 sps:$4 sm:$0xff]  }
 0x398   :  { %1412 = vmatprep.subr.bf16.mxu0 %v5145_v46  ;;  %4204 = vmatprep.subr.bf16.mxu1 %v4907_v0 }
 0x39b   :  { %1413 = vmatpush1.bf16.msra.mxu0 %v5159_v48  ;;  %4205 = vmatpush3.bf16.msra.mxu1 %v5164_v49 }
 0x39c   :  { %1414 = vmatprep.subr.bf16.mxu0 %v5169_v50  ;;  %4206 = vmatprep.subr.bf16.mxu1 %v4907_v0 }
 0x39f   :  { %1415 = vmatpush1.bf16.msra.mxu0 %v5178_v51  ;;  %4207 = vmatpush3.bf16.msra.mxu1 %v5183_v52 }
 0x3a0   :  { %1416 = vmatprep.subr.bf16.mxu0 %v5188_v53  ;;  %4208 = vmatprep.subr.bf16.mxu1 %v4907_v0 }
 0x3a3   :  { %1417 = vmatpush1.bf16.msra.mxu0 %v5197_v54  ;;  %4209 = vmatpush3.bf16.msra.mxu1 %v5202_v55 }
 0x3a4   :  { %1418 = vmatprep.subr.bf16.mxu0 %v5207_v56  ;;  %4210 = vmatprep.subr.bf16.mxu1 %v4907_v0 }
 0x3a7   :  { %1419 = vmatpush1.bf16.msra.mxu0 %v5216_v57  ;;  %4211 = vmatpush3.bf16.msra.mxu1 %v5221_v58 }
 0x3a8   :  { %1520 = vmatprep.subr.bf16.mxu0 %v5451_v35  ;;  %4216 = vmatprep.subr.bf16.mxu1 %v4907_v0 }
 0x45d   :  { %v1322_v40 = vpop.f32.mrb[16].mxu0  ;;  %v1363_v41 = vpop.f32.mrb[16].mxu1 }
 0x45e   :  { %v1372_v42 = vadd.f32 %v1371_v39, %v1322_v40  ;;  %v1324_v43 = vpop.f32.mrb[17].mxu0  ;;  %v4194_v44 = vpop.f32.mrb[17].mxu1  ;;  %v1390_v34 = vadd.f32 %v5326_v12, %v1363_v41  ;;  %v1486_v39 = vld [vmem:[#allocation3 + $0xc] sm:$0x7] }
 0x45f   :  { %v1326_v46 = vpop.f32.mrb[18].mxu0  ;;  %v1366_v47 = vpop.f32.mrb[18].mxu1  ;;  %v1383_v51 = vadd.f32 %v1382_v45, %v1324_v43  ;;  %v1496_v40 = vrot.slane %v1486_v39, 1  ;;  %v1487_v41 = vunpack.c.l.bf16 %v1486_v39 }
 0x460   :  { %v3846_v48 = vmul.f32 -1.442695, %v1372_v42  ;;  %v1327_v49 = vpop.f32.mrb[19].mxu0  ;;  %v4195_v50 = vpop.f32.mrb[19].mxu1 }
 0x461   :  { %v3847_v52 = vmul.f32 -1.442695, %v1383_v51  ;;  %v1498_v45 = vunpack.c.l.bf16 %v1496_v40  ;;  %v5647_v40 = vld [vmem:[%s6227_s2 + $0xb0] ss:$12 sps:$4 sm:$0xff]  }
 0x462   :  { %4604 = vpow2.f32 %v3846_v48 }
 0x463   :  { %4606 = vpow2.f32 %v3847_v52 }
 0x46c   :  { %v4605_v53 = vpop.eup %4604 }
 0x46d   :  { %v1376_v20 = vadd.f32 1.0, %v4605_v53  ;;  %v4607_v30 = vpop.eup %4606  ;;  %v1508_v53 = vrot.slane %v1486_v39, 2  ;;  %v5641_v39 = vld [vmem:[%s6227_s2 + $0xa8] ss:$12 sps:$4 sm:$0xff]  }
 0x46e   :  { %v1387_v33 = vadd.f32 1.0, %v4607_v30 }
 0x46f   :  { %4608 = vrcp.f32 %v1376_v20 }
 0x470   :  { %4610 = vrcp.f32 %v1387_v33 }
 0x479   :  { %v4609_v60 = vpop.eup %4608 }
 0x47a   :  { %v1391_v63 = vmul.f32 %v4609_v60, %v1390_v34  ;;  %v4611_v5 = vpop.eup %4610  ;;  %v1510_v34 = vunpack.c.l.bf16 %v1508_v53 }
 0x47b   :  { %v1397_v7 = vsub.f32 1.0, %v4611_v5  ;;  %v1399_v11 = vmul.f32 %v4611_v5, %v5411_v24  ;;  %v5555_v24 = vld [vmem:[%s6227_s2 + $0x7c] ss:$12 sps:$4 sm:$0xff]  }
 0x47c   :  { %v1395_v4 = vadd.f32 %v1394_v3, %v1391_v63 }
 0x47e   :  { %4612 = vtanh.f32 %v1395_v4 }
 0x488   :  { %v4613_v10 = vpop.eup %4612 }
 0x489   :  { %v1398_v9 = vmul.f32 %v4613_v10, %v1397_v7 }
 0x48b   :  { %v5457_v13 = vadd.f32 %v1399_v11, %v1398_v9  ;;  %v5622_v11 = vld [vmem:[%s6227_s2 + $0x90] ss:$12 sps:$4 sm:$0xff]  }
 0x48d   :  { %v1401_v28 = vpack.c.bf16 %v5457_v13, %v5457_v13 }
 0x48f   :  { %1403 = vst [vmem:[#allocation2 + $0x3] sm:$0x1] %v1401_v28  ;;  %1437 = vmatmul.mubr.bf16.vlgmr.msra.gmra.mrb[20].mxu0 %v1401_v28  ;;  %4213 = vmatmul.mubr.bf16.vlgmr.msra.gmra.mrb[20].mxu1 %v1401_v28  ;;  %v5634_v28 = vld [vmem:[%s6227_s2 + $0xac] ss:$12 sps:$4 sm:$0xff]  }
 0x490   :  { %1521 = vmatpush1.bf16.msra.mxu0 %v5464_v36  ;;  %4217 = vmatpush3.bf16.msra.mxu1 %v5470_v15 }
 0x491   :  { %1522 = vmatprep.subr.bf16.mxu0 %v5476_v59  ;;  %4218 = vmatprep.subr.bf16.mxu1 %v4907_v0 }
 0x492   :  { %1552 = vmatprep.mubr.bf16.mxu0 %v4908_v1  ;;  %4232 = vmatprep.mubr.msk.bf16.mxu1 %vm4909_vm0, %v4907_v0 }
 0x494   :  { %1523 = vmatpush1.bf16.msra.mxu0 %v5486_v16  ;;  %4219 = vmatpush3.bf16.msra.mxu1 %v5492_v17 }
 0x495   :  { %1524 = vmatprep.subr.bf16.mxu0 %v5498_v18  ;;  %4220 = vmatprep.subr.bf16.mxu1 %v4907_v0 }
 0x498   :  { %1525 = vmatpush1.bf16.msra.mxu0 %v5505_v19  ;;  %4221 = vmatpush3.bf16.msra.mxu1 %v5511_v21 }
 0x499   :  { %1526 = vmatprep.subr.bf16.mxu0 %v5517_v23  ;;  %4222 = vmatprep.subr.bf16.mxu1 %v4907_v0 }
 0x49c   :  { %1527 = vmatpush1.bf16.msra.mxu0 %v5524_v22  ;;  %4223 = vmatpush3.bf16.msra.mxu1 %v5530_v25 }
 0x49d   :  { %1528 = vmatprep.subr.bf16.mxu0 %v5536_v27  ;;  %4224 = vmatprep.subr.bf16.mxu1 %v4907_v0 }
 0x4a0   :  { %1529 = vmatpush1.bf16.msra.mxu0 %v5543_v29  ;;  %4225 = vmatpush3.bf16.msra.mxu1 %v5549_v32 }
 0x4a1   :  { %1530 = vmatprep.subr.bf16.mxu0 %v5555_v24  ;;  %4226 = vmatprep.subr.bf16.mxu1 %v4907_v0 }
 0x4a4   :  { %1531 = vmatpush1.bf16.msra.mxu0 %v5562_v26  ;;  %4227 = vmatpush3.bf16.msra.mxu1 %v5568_v37 }
 0x4a5   :  { %1532 = vmatprep.subr.bf16.mxu0 %v5574_v38  ;;  %4228 = vmatprep.subr.bf16.mxu1 %v4907_v0 }
 0x4a8   :  { %1533 = vmatpush1.bf16.msra.mxu0 %v5197_v54  ;;  %4229 = vmatpush3.bf16.msra.mxu1 %v5202_v55 }
 0x4a9   :  { %1534 = vmatprep.subr.bf16.mxu0 %v5207_v56  ;;  %4230 = vmatprep.subr.bf16.mxu1 %v4907_v0 }
 0x4ac   :  { %1535 = vmatpush1.bf16.msra.mxu0 %v5216_v57  ;;  %4231 = vmatpush3.bf16.msra.mxu1 %v5221_v58 }
 0x4ad   :  { %1636 = vmatprep.subr.bf16.mxu0 %v5451_v35  ;;  %4236 = vmatprep.subr.bf16.mxu1 %v4907_v0 }
 0x562   :  { %v1438_v42 = vpop.f32.mrb[20].mxu0  ;;  %v1479_v43 = vpop.f32.mrb[20].mxu1 }
 0x563   :  { %v1488_v54 = vadd.f32 %v1487_v41, %v1438_v42  ;;  %v1440_v44 = vpop.f32.mrb[21].mxu0  ;;  %v4214_v55 = vpop.f32.mrb[21].mxu1  ;;  %v1506_v30 = vadd.f32 %v5326_v12, %v1479_v43  ;;  %v1602_v41 = vld [vmem:[#allocation3 + $0xf] sm:$0x7] }
 0x564   :  { %v1442_v56 = vpop.f32.mrb[22].mxu0  ;;  %v1482_v46 = vpop.f32.mrb[22].mxu1  ;;  %v1499_v49 = vadd.f32 %v1498_v45, %v1440_v44  ;;  %v1612_v42 = vrot.slane %v1602_v41, 1  ;;  %v1603_v43 = vunpack.c.l.bf16 %v1602_v41 }
 0x565   :  { %v3848_v47 = vmul.f32 -1.442695, %v1488_v54  ;;  %v1443_v48 = vpop.f32.mrb[23].mxu0  ;;  %v4215_v57 = vpop.f32.mrb[23].mxu1 }
 0x566   :  { %v3849_v58 = vmul.f32 -1.442695, %v1499_v49  ;;  %v1614_v46 = vunpack.c.l.bf16 %v1612_v42 }
 0x567   :  { %4614 = vpow2.f32 %v3848_v47 }
 0x568   :  { %4616 = vpow2.f32 %v3849_v58 }
 0x571   :  { %v4615_v50 = vpop.eup %4614 }
 0x572   :  { %v1492_v51 = vadd.f32 1.0, %v4615_v50  ;;  %v4617_v52 = vpop.eup %4616 }
 0x573   :  { %v1503_v20 = vadd.f32 1.0, %v4617_v52 }
 0x574   :  { %4618 = vrcp.f32 %v1492_v51 }
 0x575   :  { %4620 = vrcp.f32 %v1503_v20  ;;  %v1624_v20 = vrot.slane %v1602_v41, 2 }
 0x57e   :  { %v4619_v31 = vpop.eup %4618 }
 0x57f   :  { %v1507_v33 = vmul.f32 %v4619_v31, %v1506_v30  ;;  %v4621_v63 = vpop.eup %4620 }
 0x580   :  { %v1513_v3 = vsub.f32 1.0, %v4621_v63  ;;  %v1515_v7 = vmul.f32 %v4621_v63, %v5457_v13  ;;  %v5628_v13 = vld [vmem:[%s6227_s2 + $0x98] ss:$12 sps:$4 sm:$0xff]  }
 0x581   :  { %v1511_v60 = vadd.f32 %v1510_v34, %v1507_v33 }
 0x583   :  { %4622 = vtanh.f32 %v1511_v60  ;;  %v1626_v60 = vunpack.c.l.bf16 %v1624_v20  ;;  %v4524_v20 = vld [vmem:[#allocation7 + $0x4c] ss:$12 sps:$4 sm:$0xff]  }
 0x58d   :  { %v4623_v4 = vpop.eup %4622 }
 0x58e   :  { %v1514_v5 = vmul.f32 %v4623_v4, %v1513_v3 }
 0x590   :  { %v5588_v10 = vadd.f32 %v1515_v7, %v1514_v5 }
 0x592   :  { %v1517_v9 = vpack.c.bf16 %v5588_v10, %v5588_v10 }
 0x594   :  { %1519 = vst [vmem:[#allocation2 + $0x4] sm:$0x1] %v1517_v9  ;;  %1553 = vmatmul.mubr.bf16.vlgmr.msra.gmra.mrb[24].mxu0 %v1517_v9  ;;  %4233 = vmatmul.mubr.bf16.vlgmr.msra.gmra.mrb[24].mxu1 %v1517_v9 }
 0x595   :  { %1637 = vmatpush1.bf16.msra.mxu0 %v5464_v36  ;;  %4237 = vmatpush3.bf16.msra.mxu1 %v5470_v15 }
 0x596   :  { %1638 = vmatprep.subr.bf16.mxu0 %v5476_v59  ;;  %4238 = vmatprep.subr.bf16.mxu1 %v4907_v0 }
 0x597   :  { %1668 = vmatprep.mubr.bf16.mxu0 %v4908_v1  ;;  %4252 = vmatprep.mubr.msk.bf16.mxu1 %vm4909_vm0, %v4907_v0 }
 0x599   :  { %1639 = vmatpush1.bf16.msra.mxu0 %v5486_v16  ;;  %4239 = vmatpush3.bf16.msra.mxu1 %v5492_v17 }
 0x59a   :  { %1640 = vmatprep.subr.bf16.mxu0 %v5498_v18  ;;  %4240 = vmatprep.subr.bf16.mxu1 %v4907_v0 }
 0x59d   :  { %1641 = vmatpush1.bf16.msra.mxu0 %v5505_v19  ;;  %4241 = vmatpush3.bf16.msra.mxu1 %v5511_v21 }
 0x59e   :  { %1642 = vmatprep.subr.bf16.mxu0 %v5517_v23  ;;  %4242 = vmatprep.subr.bf16.mxu1 %v4907_v0 }
 0x5a1   :  { %1643 = vmatpush1.bf16.msra.mxu0 %v5524_v22  ;;  %4243 = vmatpush3.bf16.msra.mxu1 %v5530_v25 }
 0x5a2   :  { %1644 = vmatprep.subr.bf16.mxu0 %v5536_v27  ;;  %4244 = vmatprep.subr.bf16.mxu1 %v4907_v0 }
 0x5a5   :  { %1645 = vmatpush1.bf16.msra.mxu0 %v5543_v29  ;;  %4245 = vmatpush3.bf16.msra.mxu1 %v5549_v32 }
 0x5a6   :  { %1646 = vmatprep.subr.bf16.mxu0 %v5555_v24  ;;  %4246 = vmatprep.subr.bf16.mxu1 %v4907_v0 }
 0x5a9   :  { %1647 = vmatpush1.bf16.msra.mxu0 %v5562_v26  ;;  %4247 = vmatpush3.bf16.msra.mxu1 %v5568_v37 }
 0x5aa   :  { %1648 = vmatprep.subr.bf16.mxu0 %v5574_v38  ;;  %4248 = vmatprep.subr.bf16.mxu1 %v4907_v0 }
 0x5ad   :  { %1649 = vmatpush1.bf16.msra.mxu0 %v5622_v11  ;;  %4249 = vmatpush3.bf16.msra.mxu1 %v5628_v13 }
 0x5ae   :  { %1650 = vmatprep.subr.bf16.mxu0 %v5634_v28  ;;  %4250 = vmatprep.subr.bf16.mxu1 %v4907_v0 }
 0x5b1   :  { %1651 = vmatpush1.bf16.msra.mxu0 %v5641_v39  ;;  %4251 = vmatpush3.bf16.msra.mxu1 %v5647_v40 }
 0x5b2   :  { %1752 = vmatprep.subr.bf16.mxu0 %v5451_v35  ;;  %4256 = vmatprep.subr.bf16.mxu1 %v4907_v0 }
 0x667   :  { %v1554_v54 = vpop.f32.mrb[24].mxu0  ;;  %v1595_v44 = vpop.f32.mrb[24].mxu1 }
 0x668   :  { %v1604_v55 = vadd.f32 %v1603_v43, %v1554_v54  ;;  %v1556_v45 = vpop.f32.mrb[25].mxu0  ;;  %v4234_v56 = vpop.f32.mrb[25].mxu1  ;;  %v1622_v31 = vadd.f32 %v5326_v12, %v1595_v44 }
 0x669   :  { %v1558_v47 = vpop.f32.mrb[26].mxu0  ;;  %v1598_v48 = vpop.f32.mrb[26].mxu1  ;;  %v1615_v50 = vadd.f32 %v1614_v46, %v1556_v45 }
 0x66a   :  { %v3850_v57 = vmul.f32 -1.442695, %v1604_v55  ;;  %v1559_v49 = vpop.f32.mrb[27].mxu0  ;;  %v4235_v58 = vpop.f32.mrb[27].mxu1 }
 0x66b   :  { %v3851_v51 = vmul.f32 -1.442695, %v1615_v50  ;;  %v4513_v49 = vld [vmem:[#allocation7 + $0x8] ss:$12 sps:$4 sm:$0xff]   ;;  %v4514_v50 = vld [vmem:[#allocation7 + $0x18] ss:$12 sps:$4 sm:$0xff]  }
 0x66c   :  { %4624 = vpow2.f32 %v3850_v57  ;;  %v4510_v57 = vld [vmem:[#allocation7] ss:$12 sps:$4 sm:$0xff]   ;;  %v4516_v58 = vld [vmem:[#allocation7 + $0x1c] ss:$12 sps:$4 sm:$0xff]  }
 0x66d   :  { %4626 = vpow2.f32 %v3851_v51  ;;  %v4517_v51 = vld [vmem:[#allocation7 + $0x20] ss:$12 sps:$4 sm:$0xff]  }
 0x676   :  { %v4625_v35 = vpop.eup %4624 }
 0x677   :  { %v1608_v52 = vadd.f32 1.0, %v4625_v35  ;;  %v4627_v53 = vpop.eup %4626  ;;  %v4518_v35 = vld [vmem:[#allocation7 + $0x30] ss:$12 sps:$4 sm:$0xff]  }
 0x678   :  { %v1619_v30 = vadd.f32 1.0, %v4627_v53  ;;  %v4521_v53 = vld [vmem:[#allocation7 + $0x38] ss:$12 sps:$4 sm:$0xff]  }
 0x679   :  { %4628 = vrcp.f32 %v1608_v52  ;;  %v4520_v52 = vld [vmem:[#allocation7 + $0x34] ss:$12 sps:$4 sm:$0xff]  }
 0x67a   :  { %4630 = vrcp.f32 %v1619_v30  ;;  %v4522_v30 = vld [vmem:[#allocation7 + $0x48] ss:$12 sps:$4 sm:$0xff]  }
 0x683   :  { %v4629_v33 = vpop.eup %4628 }
 0x684   :  { %v1623_v34 = vmul.f32 %v4629_v33, %v1622_v31  ;;  %v4631_v3 = vpop.eup %4630  ;;  %v4525_v31 = vld [vmem:[#allocation7 + $0x50] ss:$12 sps:$4 sm:$0xff]  }
 0x685   :  { %v1629_v4 = vsub.f32 1.0, %v4631_v3  ;;  %v1631_v9 = vmul.f32 %v4631_v3, %v5588_v10  ;;  %v4528_v33 = vld [vmem:[#allocation7 + $0x64] ss:$12 sps:$4 sm:$0xff]  }
 0x686   :  { %v1627_v63 = vadd.f32 %v1626_v60, %v1623_v34  ;;  %v4526_v34 = vld [vmem:[#allocation7 + $0x60] ss:$12 sps:$4 sm:$0xff]   ;;  %v4529_v60 = vld [vmem:[#allocation7 + $0x68] ss:$12 sps:$4 sm:$0xff]   ;;  %v4530_v3 = vld [vmem:[#allocation7 + $0x78] ss:$12 sps:$4 sm:$0xff]  }
 0x688   :  { %4632 = vtanh.f32 %v1627_v63  ;;  %v4532_v63 = vld [vmem:[#allocation7 + $0x7c] ss:$12 sps:$4 sm:$0xff]  }
 0x692   :  { %v4633_v5 = vpop.eup %4632 }
 0x693   :  { %v1630_v7 = vmul.f32 %v4633_v5, %v1629_v4  ;;  %v4533_v4 = vld [vmem:[#allocation7 + $0x80] ss:$12 sps:$4 sm:$0xff]  }
 0x694   :  { %v4536_v5 = vld [vmem:[#allocation7 + $0x94] ss:$12 sps:$4 sm:$0xff]  }
 0x695   :  { %v5654_v42 = vadd.f32 %v1631_v9, %v1630_v7  ;;  %v4534_v7 = vld [vmem:[#allocation7 + $0x90] ss:$12 sps:$4 sm:$0xff]   ;;  %v4537_v9 = vld [vmem:[#allocation7 + $0x98] ss:$12 sps:$4 sm:$0xff]  }
 0x697   :  { %v1633_v41 = vpack.c.bf16 %v5654_v42, %v5654_v42 }
 0x699   :  { %1635 = vst [vmem:[#allocation2 + $0x5] sm:$0x1] %v1633_v41  ;;  %1669 = vmatmul.mubr.bf16.vlgmr.msra.gmra.mrb[28].mxu0 %v1633_v41  ;;  %4253 = vmatmul.mubr.bf16.vlgmr.msra.gmra.mrb[28].mxu1 %v1633_v41  ;;  %v4538_v41 = vld [vmem:[#allocation7 + $0xa8] ss:$12 sps:$4 sm:$0xff]  }
 0x69a   :  { %1753 = vmatpush1.bf16.msra.mxu0 %v5464_v36  ;;  %4257 = vmatpush3.bf16.msra.mxu1 %v5470_v15  ;;  %v1718_v36 = vld [vmem:[#allocation3 + $0x12] sm:$0x7] }
 0x69b   :  { %1754 = vmatprep.subr.bf16.mxu0 %v5476_v59  ;;  %4258 = vmatprep.subr.bf16.mxu1 %v4907_v0  ;;  %v1728_v15 = vrot.slane %v1718_v36, 1  ;;  %v1719_v59 = vunpack.c.l.bf16 %v1718_v36 }
 0x69c   :  { %1784 = vmatprep.mubr.bf16.mxu0 %v4908_v1  ;;  %4272 = vmatprep.mubr.msk.bf16.mxu1 %vm4909_vm0, %v4907_v0 }
 0x69e   :  { %1755 = vmatpush1.bf16.msra.mxu0 %v5486_v16  ;;  %4259 = vmatpush3.bf16.msra.mxu1 %v5492_v17 }
 0x69f   :  { %1756 = vmatprep.subr.bf16.mxu0 %v5498_v18  ;;  %4260 = vmatprep.subr.bf16.mxu1 %v4907_v0 }
 0x6a2   :  { %1757 = vmatpush1.bf16.msra.mxu0 %v5505_v19  ;;  %4261 = vmatpush3.bf16.msra.mxu1 %v5511_v21 }
 0x6a3   :  { %1758 = vmatprep.subr.bf16.mxu0 %v5517_v23  ;;  %4262 = vmatprep.subr.bf16.mxu1 %v4907_v0  ;;  %v1730_v23 = vunpack.c.l.bf16 %v1728_v15  ;;  %v5707_v15 = vld [vmem:[#allocation9 + $0x4] ss:$12 sps:$4 sm:$0xff]  }
 0x6a6   :  { %1759 = vmatpush1.bf16.msra.mxu0 %v5524_v22  ;;  %4263 = vmatpush3.bf16.msra.mxu1 %v5530_v25 }
 0x6a7   :  { %1760 = vmatprep.subr.bf16.mxu0 %v5536_v27  ;;  %4264 = vmatprep.subr.bf16.mxu1 %v4907_v0 }
 0x6aa   :  { %1761 = vmatpush1.bf16.msra.mxu0 %v5543_v29  ;;  %4265 = vmatpush3.bf16.msra.mxu1 %v5549_v32 }
 0x6ab   :  { %1762 = vmatprep.subr.bf16.mxu0 %v5555_v24  ;;  %4266 = vmatprep.subr.bf16.mxu1 %v4907_v0 }
 0x6ae   :  { %1763 = vmatpush1.bf16.msra.mxu0 %v5562_v26  ;;  %4267 = vmatpush3.bf16.msra.mxu1 %v5568_v37 }
 0x6af   :  { %1764 = vmatprep.subr.bf16.mxu0 %v5574_v38  ;;  %4268 = vmatprep.subr.bf16.mxu1 %v4907_v0 }
 0x6b2   :  { %1765 = vmatpush1.bf16.msra.mxu0 %v5622_v11  ;;  %4269 = vmatpush3.bf16.msra.mxu1 %v5628_v13  ;;  %v1740_v11 = vrot.slane %v1718_v36, 2  ;;  %v4541_v36 = vld [vmem:[#allocation7 + $0xb0] ss:$12 sps:$4 sm:$0xff]  }
 0x6b3   :  { %1766 = vmatprep.subr.bf16.mxu0 %v5634_v28  ;;  %4270 = vmatprep.subr.bf16.mxu1 %v4907_v0 }
 0x6b4   :  { %v1742_v43 = vunpack.c.l.bf16 %v1740_v11 }
 0x6b6   :  { %1767 = vmatpush1.bf16.msra.mxu0 %v5641_v39  ;;  %4271 = vmatpush3.bf16.msra.mxu1 %v5647_v40 }
 0x6b7   :  { %4276 = vmatprep.subr.bf16.mxu1 %v4907_v0 }
 0x76c   :  { %v1670_v16 = vpop.f32.mrb[28].mxu0  ;;  %v1711_v17 = vpop.f32.mrb[28].mxu1 }
 0x76d   :  { %v1720_v18 = vadd.f32 %v1719_v59, %v1670_v16  ;;  %v1672_v19 = vpop.f32.mrb[29].mxu0  ;;  %v4254_v21 = vpop.f32.mrb[29].mxu1  ;;  %v1738_v28 = vadd.f32 %v5326_v12, %v1711_v17  ;;  %v4512_v12 = vld [vmem:[#allocation7 + $0x4] ss:$12 sps:$4 sm:$0xff]   ;;  %v1834_v59 = vld [vmem:[#allocation3 + $0x15] sm:$0x7] }
 0x76e   :  { %v1674_v22 = vpop.f32.mrb[30].mxu0  ;;  %v1714_v25 = vpop.f32.mrb[30].mxu1  ;;  %v1731_v24 = vadd.f32 %v1730_v23, %v1672_v19  ;;  %2112 = vmatprep.subr.bf16.mxu0 %v4512_v12  ;;  %v1844_v16 = vrot.slane %v1834_v59, 1  ;;  %v1835_v17 = vunpack.c.l.bf16 %v1834_v59 }
 0x76f   :  { %v3852_v27 = vmul.f32 -1.442695, %v1720_v18  ;;  %v1675_v29 = vpop.f32.mrb[31].mxu0  ;;  %v4255_v32 = vpop.f32.mrb[31].mxu1 }
 0x770   :  { %v3853_v26 = vmul.f32 -1.442695, %v1731_v24  ;;  %v1846_v25 = vunpack.c.l.bf16 %v1844_v16 }
 0x771   :  { %4634 = vpow2.f32 %v3852_v27 }
 0x772   :  { %4636 = vpow2.f32 %v3853_v26 }
 0x77b   :  { %v4635_v37 = vpop.eup %4634 }
 0x77c   :  { %v1724_v38 = vadd.f32 1.0, %v4635_v37  ;;  %v4637_v10 = vpop.eup %4636 }
 0x77d   :  { %v1735_v13 = vadd.f32 1.0, %v4637_v10 }
 0x77e   :  { %4638 = vrcp.f32 %v1724_v38 }
 0x77f   :  { %4640 = vrcp.f32 %v1735_v13 }
 0x788   :  { %v4639_v39 = vpop.eup %4638 }
 0x789   :  { %v1739_v40 = vmul.f32 %v4639_v39, %v1738_v28  ;;  %v4641_v44 = vpop.eup %4640  ;;  %v1856_v28 = vrot.slane %v1834_v59, 2  ;;  %v5724_v59 = vld [vmem:[#allocation9 + $0x8] ss:$12 sps:$4 sm:$0xff]  }
 0x78a   :  { %v1745_v55 = vsub.f32 1.0, %v4641_v44  ;;  %v1747_v46 = vmul.f32 %v4641_v44, %v5654_v42  ;;  %v4540_v42 = vld [vmem:[#allocation7 + $0xac] ss:$12 sps:$4 sm:$0xff]  }
 0x78b   :  { %v1743_v54 = vadd.f32 %v1742_v43, %v1739_v40  ;;  %v4758_v40 = vld [vmem:[%s6229_s4] ss:$0 sm:$0xff] }
 0x78d   :  { %4642 = vtanh.f32 %v1743_v54 }
 0x797   :  { %v4643_v45 = vpop.eup %4642 }
 0x798   :  { %v1746_v56 = vmul.f32 %v4643_v45, %v1745_v55  ;;  %v1858_v55 = vunpack.c.l.bf16 %v1856_v28  ;;  %v5785_v28 = vld [vmem:[#allocation9 + $0x98] ss:$12 sps:$4 sm:$0xff]  }
 0x79a   :  { %v5694_v47 = vadd.f32 %v1747_v46, %v1746_v56 }
 0x79c   :  { %v1749_v48 = vpack.c.bf16 %v5694_v47, %v5694_v47 }
 0x79e   :  { %1751 = vst [vmem:[#allocation2 + $0x6] sm:$0x1] %v1749_v48  ;;  %1785 = vmatmul.mubr.bf16.vlgmr.msra.gmra.mrb[32].mxu0 %v1749_v48  ;;  %4273 = vmatmul.mubr.bf16.vlgmr.msra.gmra.mrb[32].mxu1 %v1749_v48 }
 0x79f   :  { %2144 = vmatprep.mubr.bf16.mxu0 %v4908_v1  ;;  %4292 = vmatprep.mubr.msk.bf16.mxu1 %vm4909_vm0, %v4907_v0 }
 0x7a0   :  { %2113 = vmatpush1.bf16.msra.mxu0 %v4510_v57  ;;  %4277 = vmatpush3.bf16.msra.mxu1 %v4513_v49 }
 0x7a1   :  { %4278 = vmatprep.subr.bf16.mxu1 %v4907_v0  ;;  %2114 = vmatprep.subr.bf16.mxu0 %v4516_v58 }
 0x7a4   :  { %2115 = vmatpush1.bf16.msra.mxu0 %v4514_v50  ;;  %4279 = vmatpush3.bf16.msra.mxu1 %v4517_v51  ;;  %v1872_v50 = vld [vmem:[#allocation2 + $0x3] sm:$0x1]  ;;  %v1870_v51 = vld [vmem:[#allocation2 + $0x1] sm:$0x1] }
 0x7a5   :  { %2116 = vmatprep.subr.bf16.mxu0 %v4520_v52  ;;  %4280 = vmatprep.subr.bf16.mxu1 %v4907_v0 }
 0x7a8   :  { %2117 = vmatpush1.bf16.msra.mxu0 %v4518_v35  ;;  %4281 = vmatpush3.bf16.msra.mxu1 %v4521_v53  ;;  %v1871_v35 = vld [vmem:[#allocation2 + $0x2] sm:$0x1]  ;;  %v1869_v53 = vld [vmem:[#allocation2] sm:$0x1] }
 0x7a9   :  { %2118 = vmatprep.subr.bf16.mxu0 %v4524_v20  ;;  %4282 = vmatprep.subr.bf16.mxu1 %v4907_v0  ;;  %v1935_v52 = vcombine.low %v1871_v35, %v1872_v50  ;;  %v1874_v20 = vld [vmem:[#allocation2 + $0x5] sm:$0x1] }
 0x7ac   :  { %2119 = vmatpush1.bf16.msra.mxu0 %v4522_v30  ;;  %4283 = vmatpush3.bf16.msra.mxu1 %v4525_v31  ;;  %v1934_v30 = vcombine.low %v1869_v53, %v1870_v51  ;;  %v1873_v31 = vld [vmem:[#allocation2 + $0x4] sm:$0x1] }
 0x7ad   :  { %2120 = vmatprep.subr.bf16.mxu0 %v4528_v33  ;;  %4284 = vmatprep.subr.bf16.mxu1 %v4907_v0  ;;  %v1936_v33 = vcombine.low %v1873_v31, %v1874_v20 }
 0x7b0   :  { %2121 = vmatpush1.bf16.msra.mxu0 %v4526_v34  ;;  %4285 = vmatpush3.bf16.msra.mxu1 %v4529_v60  ;;  %v1951_v34 = vrot.slane %v1935_v52, %v5044_v14  ;;  %v1875_v60 = vld [vmem:[#allocation2 + $0x6] sm:$0x1] }
 0x7b1   :  { %2122 = vmatprep.subr.bf16.mxu0 %v4532_v63  ;;  %4286 = vmatprep.subr.bf16.mxu1 %v4907_v0 }
 0x7b4   :  { %2123 = vmatpush1.bf16.msra.mxu0 %v4530_v3  ;;  %4287 = vmatpush3.bf16.msra.mxu1 %v4533_v4  ;;  %v1958_v4 = vrot.slane %v1936_v33, %v5044_v14 }
 0x7b5   :  { %2124 = vmatprep.subr.bf16.mxu0 %v4536_v5  ;;  %4288 = vmatprep.subr.bf16.mxu1 %v4907_v0 }
 0x7b8   :  { %2125 = vmatpush1.bf16.msra.mxu0 %v4534_v7  ;;  %4289 = vmatpush3.bf16.msra.mxu1 %v4537_v9 }
 0x7b9   :  { %2126 = vmatprep.subr.bf16.mxu0 %v4540_v42  ;;  %4290 = vmatprep.subr.bf16.mxu1 %v4907_v0 }
 0x7bc   :  { %2127 = vmatpush1.bf16.msra.mxu0 %v4538_v41  ;;  %4291 = vmatpush3.bf16.msra.mxu1 %v4541_v36  ;;  %v5722_v36 = vld [vmem:[#allocation9] ss:$12 sps:$4 sm:$0xff]  }
 0x7bd   :  { %2833 = vmatprep.subr.bf16.mxu0 %v5707_v15  ;;  %4296 = vmatprep.subr.bf16.mxu1 %v4907_v0 }
 0x871   :  { %v1786_v18 = vpop.f32.mrb[32].mxu0  ;;  %v1827_v19 = vpop.f32.mrb[32].mxu1 }
 0x872   :  { %v1836_v21 = vadd.f32 %v1835_v17, %v1786_v18  ;;  %v1788_v23 = vpop.f32.mrb[33].mxu0  ;;  %v4274_v22 = vpop.f32.mrb[33].mxu1  ;;  %v1854_v43 = vadd.f32 %v4758_v40, %v1827_v19  ;;  %v5726_v17 = vld [vmem:[#allocation9 + $0x1c] ss:$12 sps:$4 sm:$0xff]   ;;  %v5729_v18 = vld [vmem:[#allocation9 + $0x18] ss:$12 sps:$4 sm:$0xff]  }
 0x873   :  { %v1790_v27 = vpop.f32.mrb[34].mxu0  ;;  %v1830_v29 = vpop.f32.mrb[34].mxu1  ;;  %v1847_v37 = vadd.f32 %v1846_v25, %v1788_v23  ;;  %v5732_v19 = vld [vmem:[#allocation9 + $0x20] ss:$12 sps:$4 sm:$0xff]   ;;  %v5742_v23 = vld [vmem:[#allocation9 + $0x30] ss:$12 sps:$4 sm:$0xff]  }
 0x874   :  { %v3854_v32 = vmul.f32 -1.442695, %v1836_v21  ;;  %v1791_v24 = vpop.f32.mrb[35].mxu0  ;;  %v4275_v26 = vpop.f32.mrb[35].mxu1  ;;  %v5735_v21 = vld [vmem:[#allocation9 + $0x34] ss:$12 sps:$4 sm:$0xff]  }
 0x875   :  { %v3855_v38 = vmul.f32 -1.442695, %v1847_v37  ;;  %v5745_v22 = vld [vmem:[#allocation9 + $0x38] ss:$12 sps:$4 sm:$0xff]   ;;  %v5752_v27 = vld [vmem:[#allocation9 + $0x48] ss:$12 sps:$4 sm:$0xff]  }
 0x876   :  { %4644 = vpow2.f32 %v3854_v32  ;;  %v5748_v25 = vld [vmem:[#allocation9 + $0x4c] ss:$12 sps:$4 sm:$0xff]   ;;  %v5755_v29 = vld [vmem:[#allocation9 + $0x50] ss:$12 sps:$4 sm:$0xff]   ;;  %v5765_v26 = vld [vmem:[#allocation9 + $0x68] ss:$12 sps:$4 sm:$0xff]  }
 0x877   :  { %4646 = vpow2.f32 %v3855_v38  ;;  %v5758_v32 = vld [vmem:[#allocation9 + $0x64] ss:$12 sps:$4 sm:$0xff]   ;;  %v5762_v24 = vld [vmem:[#allocation9 + $0x60] ss:$12 sps:$4 sm:$0xff]   ;;  %v5768_v37 = vld [vmem:[#allocation9 + $0x7c] ss:$12 sps:$4 sm:$0xff]  }
 0x878   :  { %v5772_v38 = vld [vmem:[#allocation9 + $0x78] ss:$12 sps:$4 sm:$0xff]   ;;  %v5792_v40 = vld [vmem:[#allocation9 + $0xa8] ss:$12 sps:$4 sm:$0xff]  }
 0x880   :  { %v4645_v10 = vpop.eup %4644 }
 0x881   :  { %v1840_v11 = vadd.f32 1.0, %v4645_v10  ;;  %v4647_v13 = vpop.eup %4646  ;;  %v5775_v10 = vld [vmem:[#allocation9 + $0x80] ss:$12 sps:$4 sm:$0xff]  }
 0x882   :  { %v1851_v39 = vadd.f32 1.0, %v4647_v13  ;;  %v5782_v13 = vld [vmem:[#allocation9 + $0x90] ss:$12 sps:$4 sm:$0xff]  }
 0x883   :  { %4648 = vrcp.f32 %v1840_v11  ;;  %v5778_v11 = vld [vmem:[#allocation9 + $0x94] ss:$12 sps:$4 sm:$0xff]  }
 0x884   :  { %4650 = vrcp.f32 %v1851_v39  ;;  %v5788_v39 = vld [vmem:[#allocation9 + $0xac] ss:$12 sps:$4 sm:$0xff]  }
 0x88d   :  { %v4649_v54 = vpop.eup %4648 }
 0x88e   :  { %v1855_v44 = vmul.f32 %v4649_v54, %v1854_v43  ;;  %v4651_v56 = vpop.eup %4650  ;;  %v5795_v43 = vld [vmem:[#allocation9 + $0xb0] ss:$12 sps:$4 sm:$0xff]  }
 0x88f   :  { %v1861_v46 = vsub.f32 1.0, %v4651_v56  ;;  %v1863_v57 = vmul.f32 %v4651_v56, %v5694_v47  ;;  %v1944_v47 = vrot.slane %v1934_v30, %v5044_v14  ;;  %v1909_v54 = vld [vmem:[%s6232_s7] sm:$0x7] }
 0x890   :  { %v1859_v45 = vadd.f32 %v1858_v55, %v1855_v44  ;;  %v1914_v44 = vrot.slane %v1909_v54, %v109_v61  ;;  %v1922_v55 = vrot.slane %v1909_v54, %v117_v62 }
 0x891   :  { %v1966_v7 = vcombine.low %v1944_v47, %v1951_v34 }
 0x892   :  { %4652 = vtanh.f32 %v1859_v45  ;;  %v1918_v45 = vrot.slane %v1909_v54, %v113_v2 }
 0x893   :  { %v1974_v42 = vrot.slane %v1966_v7, %v5044_v14 }
 0x89c   :  { %v4653_v48 = vpop.eup %4652 }
 0x89d   :  { %v1862_v12 = vmul.f32 %v4653_v48, %v1861_v46 }
 0x89f   :  { %v1864_v49 = vadd.f32 %v1863_v57, %v1862_v12 }
 0x8a1   :  { %v1865_v58 = vpack.c.bf16 %v1864_v49, %v1864_v49  ;;  %1868 = vst [vmem:[#allocation12] sm:$0x3] %v1864_v49 }
 0x8a3   :  { %1867 = vst [vmem:[#allocation2 + $0x7] sm:$0x1] %v1865_v58 }
 0x8aa   :  { %v1876_v63 = vld [vmem:[#allocation2 + $0x7] sm:$0x1] }
 0x8ab   :  { %v1937_v3 = vcombine.low %v1875_v60, %v1876_v63 }
 0x8ad   :  { %v1965_v5 = vrot.slane %v1937_v3, %v5044_v14 }
 0x8af   :  { %v1967_v9 = vcombine.low %v1958_v4, %v1965_v5 }
 0x8b1   :  { %v1981_v41 = vrot.slane %v1967_v9, %v5044_v14 }
 0x8b3   :  { %v1982_v16 = vcombine.low %v1974_v42, %v1981_v41 }
 0x8b5   :  { %2145 = vmatmul.mubr.bf16.vlgmr.msra.gmra.mrb[36].mxu0 %v1982_v16  ;;  %4293 = vmatmul.mubr.bf16.vlgmr.msra.gmra.mrb[36].mxu1 %v1982_v16 }
 0x8b6   :  { %2834 = vmatpush1.bf16.msra.mxu0 %v5722_v36  ;;  %4297 = vmatpush3.bf16.msra.mxu1 %v5724_v59 }
 0x8b7   :  { %2835 = vmatprep.subr.bf16.mxu0 %v5726_v17  ;;  %4298 = vmatprep.subr.bf16.mxu1 %v4907_v0 }
 0x8b8   :  { %2865 = vmatprep.mubr.bf16.mxu0 %v4908_v1  ;;  %4312 = vmatprep.mubr.msk.bf16.mxu1 %vm4909_vm0, %v4907_v0 }
 0x8ba   :  { %2836 = vmatpush1.bf16.msra.mxu0 %v5729_v18  ;;  %4299 = vmatpush3.bf16.msra.mxu1 %v5732_v19 }
 0x8bb   :  { %2837 = vmatprep.subr.bf16.mxu0 %v5735_v21  ;;  %4300 = vmatprep.subr.bf16.mxu1 %v4907_v0 }
 0x8be   :  { %2838 = vmatpush1.bf16.msra.mxu0 %v5742_v23  ;;  %4301 = vmatpush3.bf16.msra.mxu1 %v5745_v22 }
 0x8bf   :  { %2839 = vmatprep.subr.bf16.mxu0 %v5748_v25  ;;  %4302 = vmatprep.subr.bf16.mxu1 %v4907_v0 }
 0x8c2   :  { %2840 = vmatpush1.bf16.msra.mxu0 %v5752_v27  ;;  %4303 = vmatpush3.bf16.msra.mxu1 %v5755_v29 }
 0x8c3   :  { %2841 = vmatprep.subr.bf16.mxu0 %v5758_v32  ;;  %4304 = vmatprep.subr.bf16.mxu1 %v4907_v0 }
 0x8c6   :  { %2842 = vmatpush1.bf16.msra.mxu0 %v5762_v24  ;;  %4305 = vmatpush3.bf16.msra.mxu1 %v5765_v26 }
 0x8c7   :  { %2843 = vmatprep.subr.bf16.mxu0 %v5768_v37  ;;  %4306 = vmatprep.subr.bf16.mxu1 %v4907_v0 }
 0x8ca   :  { %2844 = vmatpush1.bf16.msra.mxu0 %v5772_v38  ;;  %4307 = vmatpush3.bf16.msra.mxu1 %v5775_v10 }
 0x8cb   :  { %2845 = vmatprep.subr.bf16.mxu0 %v5778_v11  ;;  %4308 = vmatprep.subr.bf16.mxu1 %v4907_v0 }
 0x8ce   :  { %2846 = vmatpush1.bf16.msra.mxu0 %v5782_v13  ;;  %4309 = vmatpush3.bf16.msra.mxu1 %v5785_v28 }
 0x8cf   :  { %2847 = vmatprep.subr.bf16.mxu0 %v5788_v39  ;;  %4310 = vmatprep.subr.bf16.mxu1 %v4907_v0 }
 0x8d2   :  { %2848 = vmatpush1.bf16.msra.mxu0 %v5792_v40  ;;  %4311 = vmatpush3.bf16.msra.mxu1 %v5795_v43 }
 0x8d3   :  { %2953 = vmatprep.subr.bf16.mxu0 %v5707_v15  ;;  %4316 = vmatprep.subr.bf16.mxu1 %v4907_v0 }
 0x8d5   :  { %2866 = vmatmul.mubr.bf16.vlgmr.msra.gmra.mrb[40].mxu0 %v4908_v1  ;;  %4313 = vmatmul.mubr.bf16.vlgmr.msra.gmra.mrb[40].mxu1 %v4908_v1 }
 0x8d6   :  { %2954 = vmatpush1.bf16.msra.mxu0 %v5722_v36  ;;  %4317 = vmatpush3.bf16.msra.mxu1 %v5724_v59 }
 0x8d7   :  { %2955 = vmatprep.subr.bf16.mxu0 %v5726_v17  ;;  %4318 = vmatprep.subr.bf16.mxu1 %v4907_v0 }
 0x8d8   :  { %2985 = vmatprep.mubr.bf16.mxu0 %v4908_v1  ;;  %4332 = vmatprep.mubr.msk.bf16.mxu1 %vm4909_vm0, %v4907_v0 }
 0x8da   :  { %2956 = vmatpush1.bf16.msra.mxu0 %v5729_v18  ;;  %4319 = vmatpush3.bf16.msra.mxu1 %v5732_v19 }
 0x8db   :  { %2957 = vmatprep.subr.bf16.mxu0 %v5735_v21  ;;  %4320 = vmatprep.subr.bf16.mxu1 %v4907_v0 }
 0x8de   :  { %2958 = vmatpush1.bf16.msra.mxu0 %v5742_v23  ;;  %4321 = vmatpush3.bf16.msra.mxu1 %v5745_v22 }
 0x8df   :  { %2959 = vmatprep.subr.bf16.mxu0 %v5748_v25  ;;  %4322 = vmatprep.subr.bf16.mxu1 %v4907_v0 }
 0x8e2   :  { %2960 = vmatpush1.bf16.msra.mxu0 %v5752_v27  ;;  %4323 = vmatpush3.bf16.msra.mxu1 %v5755_v29 }
 0x8e3   :  { %2961 = vmatprep.subr.bf16.mxu0 %v5758_v32  ;;  %4324 = vmatprep.subr.bf16.mxu1 %v4907_v0 }
 0x8e6   :  { %2962 = vmatpush1.bf16.msra.mxu0 %v5762_v24  ;;  %4325 = vmatpush3.bf16.msra.mxu1 %v5765_v26 }
 0x8e7   :  { %2963 = vmatprep.subr.bf16.mxu0 %v5768_v37  ;;  %4326 = vmatprep.subr.bf16.mxu1 %v4907_v0 }
 0x8ea   :  { %2964 = vmatpush1.bf16.msra.mxu0 %v5772_v38  ;;  %4327 = vmatpush3.bf16.msra.mxu1 %v5775_v10 }
 0x8eb   :  { %2965 = vmatprep.subr.bf16.mxu0 %v5778_v11  ;;  %4328 = vmatprep.subr.bf16.mxu1 %v4907_v0 }
 0x8ee   :  { %2966 = vmatpush1.bf16.msra.mxu0 %v5782_v13  ;;  %4329 = vmatpush3.bf16.msra.mxu1 %v5785_v28 }
 0x8ef   :  { %2967 = vmatprep.subr.bf16.mxu0 %v5788_v39  ;;  %4330 = vmatprep.subr.bf16.mxu1 %v4907_v0 }
 0x8f2   :  { %2968 = vmatpush1.bf16.msra.mxu0 %v5792_v40  ;;  %4331 = vmatpush3.bf16.msra.mxu1 %v5795_v43 }
 0x8f3   :  { %3068 = vmatprep.subr.bf16.mxu0 %v5707_v15  ;;  %4336 = vmatprep.subr.bf16.mxu1 %v4907_v0 }
 0x988   :  { %v2146_v56 = vpop.f32.mrb[36].mxu0  ;;  %v2189_v46 = vpop.f32.mrb[36].mxu1 }
 0x989   :  { %v2147_v48 = vadd.f32 %v2146_v56, %v1914_v44  ;;  %v2190_v12 = vadd.f32 %v2189_v46, %v1922_v55  ;;  %v2148_v57 = vpop.f32.mrb[37].mxu0  ;;  %v4294_v49 = vpop.f32.mrb[37].mxu1 }
 0x98a   :  { %v2149_v58 = vadd.f32 %v2148_v57, %v1918_v45  ;;  %v2150_v50 = vpop.f32.mrb[38].mxu0  ;;  %v2192_v51 = vpop.f32.mrb[38].mxu1 }
 0x98b   :  { %v2204_v35 = vcombine.high %v2190_v12, %v2190_v12  ;;  %v2225_v52 = vrot.slane %v2190_v12, %v5281_v8  ;;  %v5850_v53 = vadd.f32 %v2150_v50, %v1914_v44  ;;  %v2152_v61 = vpop.f32.mrb[39].mxu0  ;;  %v4295_v20 = vpop.f32.mrb[39].mxu1  ;;  %v2193_v63 = vadd.f32 %v2192_v51, %v1922_v55 }
 0x98c   :  { %v2202_v62 = vcombine.low %v2147_v48, %v2149_v58  ;;  %v2203_v30 = vcombine.high %v2147_v48, %v2149_v58  ;;  %v2153_v6 = vadd.f32 %v2152_v61, %v1918_v45 }
 0x98d   :  { %v2232_v2 = vrot.slane %v2204_v35, %v5281_v8  ;;  %v3880_v31 = vcombine.low %v2225_v52, %v2225_v52  ;;  %v3881_v33 = vcombine.high %v2225_v52, %v2225_v52  ;;  %v2239_v58 = vcombine.high %v2193_v63, %v2193_v63 }
 0x98e   :  { %v2211_v34 = vrot.slane %v2202_v62, %v5281_v8  ;;  %v2218_v60 = vrot.slane %v2203_v30, %v5281_v8  ;;  %v2237_v3 = vcombine.low %v5850_v53, %v2153_v6  ;;  %v2260_v20 = vrot.slane %v2193_v63, %v5281_v8 }
 0x98f   :  { %v2286_v47 = vrot.slane %v3880_v31, %v5281_v8  ;;  %v2302_v4 = vrot.slane %v3881_v33, %v5281_v8  ;;  %v3882_v5 = vcombine.low %v2232_v2, %v2232_v2  ;;  %v3883_v7 = vcombine.high %v2232_v2, %v2232_v2 }
 0x990   :  { %v2233_v9 = vcombine.low %v2211_v34, %v2225_v52  ;;  %v2234_v42 = vcombine.high %v2211_v34, %v2225_v52  ;;  %v2235_v41 = vcombine.low %v2218_v60, %v2232_v2  ;;  %v2236_v16 = vcombine.high %v2218_v60, %v2232_v2 }
 0x991   :  { %v2318_v54 = vrot.slane %v3882_v5, %v5281_v8  ;;  %v2334_v44 = vrot.slane %v3883_v7, %v5281_v8  ;;  %v2426_v45 = vpack.c.bf16 %v2286_v47, %v2286_v47  ;;  %v2429_v12 = vpack.c.bf16 %v2302_v4, %v2302_v4 }
 0x992   :  { %v2279_v56 = vrot.slane %v2233_v9, %v5281_v8  ;;  %v2295_v55 = vrot.slane %v2234_v42, %v5281_v8  ;;  %v2311_v46 = vrot.slane %v2235_v41, %v5281_v8  ;;  %v2327_v48 = vrot.slane %v2236_v16, %v5281_v8 }
 0x993   :  { %v2432_v57 = vpack.c.bf16 %v2318_v54, %v2318_v54  ;;  %v2435_v49 = vpack.c.bf16 %v2334_v44, %v2334_v44  ;;  %v2486_v61 = vrot.slane %v2426_v45, %v5044_v14  ;;  %v2509_v33 = vrot.slane %v2429_v12, %v5044_v14 }
 0x994   :  { %v2287_v50 = vcombine.high %v2279_v56, %v2279_v56  ;;  %v2303_v51 = vcombine.high %v2295_v55, %v2295_v55  ;;  %v2319_v35 = vcombine.high %v2311_v46, %v2311_v46  ;;  %v2335_v52 = vcombine.high %v2327_v48, %v2327_v48 }
 0x995   :  { %v2532_v34 = vrot.slane %v2432_v57, %v5044_v14  ;;  %v2555_v60 = vrot.slane %v2435_v49, %v5044_v14  ;;  %v2267_v47 = vrot.slane %v2239_v58, %v5281_v8  ;;  %v3884_v9 = vcombine.low %v2260_v20, %v2260_v20 }
 0x996   :  { %v3888_v62 = vpack.c.bf16 %v2287_v50, %v2279_v56  ;;  %v3889_v30 = vpack.c.bf16 %v2303_v51, %v2295_v55  ;;  %v3890_v2 = vpack.c.bf16 %v2319_v35, %v2311_v46  ;;  %v3891_v31 = vpack.c.bf16 %v2335_v52, %v2327_v48 }
 0x997   :  { %v3885_v42 = vcombine.high %v2260_v20, %v2260_v20  ;;  %v3886_v45 = vcombine.low %v2267_v47, %v2267_v47  ;;  %v3887_v56 = vcombine.high %v2267_v47, %v2267_v47  ;;  %v2238_v55 = vcombine.high %v5850_v53, %v2153_v6 }
 0x998   :  { %v2479_v4 = vrot.slane %v3888_v62, %v5044_v14  ;;  %v2502_v5 = vrot.slane %v3889_v30, %v5044_v14  ;;  %v2525_v7 = vrot.slane %v3890_v2, %v5044_v14  ;;  %v2548_v63 = vrot.slane %v3891_v31, %v5044_v14 }
 0x999   :  { %v2246_v46 = vrot.slane %v2237_v3, %v5281_v8  ;;  %v2350_v48 = vrot.slane %v3884_v9, %v5281_v8  ;;  %v2366_v12 = vrot.slane %v3885_v42, %v5281_v8  ;;  %v2253_v57 = vrot.slane %v2238_v55, %v5281_v8 }
 0x99a   :  { %v2487_v41 = vcombine.low %v2479_v4, %v2486_v61  ;;  %v2510_v16 = vcombine.low %v2502_v5, %v2509_v33  ;;  %v2533_v54 = vcombine.low %v2525_v7, %v2532_v34  ;;  %v2556_v44 = vcombine.low %v2548_v63, %v2555_v60 }
 0x99b   :  { %v2268_v49 = vcombine.low %v2246_v46, %v2260_v20  ;;  %v2269_v58 = vcombine.high %v2246_v46, %v2260_v20  ;;  %v2382_v50 = vrot.slane %v3886_v45, %v5281_v8  ;;  %v2398_v51 = vrot.slane %v3887_v56, %v5281_v8 }
 0x99c   :  { %3896 = vst.sshfl [vmem:[#allocation3] sm:$0x15 pattern:$0x73625140] %v2487_v41  ;;  %v2270_v35 = vcombine.low %v2253_v57, %v2267_v47  ;;  %v2271_v52 = vcombine.high %v2253_v57, %v2267_v47  ;;  %v2438_v6 = vpack.c.bf16 %v2350_v48, %v2350_v48  ;;  %v2441_v3 = vpack.c.bf16 %v2366_v12, %v2366_v12 }
 0x99d   :  { %3897 = vst.sshfl [vmem:[#allocation3 + $0x3] sm:$0x15 pattern:$0x73625140] %v2510_v16  ;;  %v2343_v61 = vrot.slane %v2268_v49, %v5281_v8  ;;  %v2359_v53 = vrot.slane %v2269_v58, %v5281_v8  ;;  %v2444_v33 = vpack.c.bf16 %v2382_v50, %v2382_v50  ;;  %v2447_v20 = vpack.c.bf16 %v2398_v51, %v2398_v51 }
 0x99e   :  { %3898 = vst.sshfl [vmem:[#allocation3 + $0x6] sm:$0x15 pattern:$0x73625140] %v2533_v54  ;;  %v2375_v2 = vrot.slane %v2270_v35, %v5281_v8  ;;  %v2391_v31 = vrot.slane %v2271_v52, %v5281_v8  ;;  %v2578_v47 = vrot.slane %v2438_v6, %v5044_v14  ;;  %v2601_v63 = vrot.slane %v2441_v3, %v5044_v14 }
 0x99f   :  { %3899 = vst.sshfl [vmem:[#allocation3 + $0x9] sm:$0x15 pattern:$0x73625140] %v2556_v44  ;;  %v2351_v62 = vcombine.high %v2343_v61, %v2343_v61  ;;  %v2367_v30 = vcombine.high %v2359_v53, %v2359_v53  ;;  %v2624_v8 = vrot.slane %v2444_v33, %v5044_v14  ;;  %v2647_v44 = vrot.slane %v2447_v20, %v5044_v14  ;;  %v5893_v20 = vld [vmem:[#allocation10] ss:$0 sm:$0xff] }
 0x9a0   :  { %v2383_v60 = vcombine.high %v2375_v2, %v2375_v2  ;;  %v2399_v4 = vcombine.high %v2391_v31, %v2391_v31 }
 0x9a1   :  { %v3892_v5 = vpack.c.bf16 %v2351_v62, %v2343_v61  ;;  %v3893_v7 = vpack.c.bf16 %v2367_v30, %v2359_v53 }
 0x9a2   :  { %v3894_v16 = vpack.c.bf16 %v2383_v60, %v2375_v2  ;;  %v3895_v54 = vpack.c.bf16 %v2399_v4, %v2391_v31 }
 0x9a3   :  { %v2914_v34 = vld [vmem:[#allocation3] sm:$0x7]  ;;  %v2571_v42 = vrot.slane %v3892_v5, %v5044_v14  ;;  %v2594_v41 = vrot.slane %v3893_v7, %v5044_v14 }
 0x9a4   :  { %v2924_v9 = vrot.slane %v2914_v34, 1  ;;  %v2915_v45 = vunpack.c.l.bf16 %v2914_v34  ;;  %v2617_v48 = vrot.slane %v3894_v16, %v5044_v14  ;;  %v2640_v12 = vrot.slane %v3895_v54, %v5044_v14 }
 0x9a5   :  { %v2579_v55 = vcombine.low %v2571_v42, %v2578_v47  ;;  %v2602_v46 = vcombine.low %v2594_v41, %v2601_v63  ;;  %v2942_v5 = vrot.slane %v2914_v34, 2  ;;  %v3034_v34 = vld [vmem:[#allocation3 + $0x3] sm:$0x7] }
 0x9a6   :  { %v2926_v56 = vunpack.c.l.bf16 %v2924_v9  ;;  %v2625_v35 = vcombine.low %v2617_v48, %v2624_v8  ;;  %v2648_v52 = vcombine.low %v2640_v12, %v2647_v44 }
 0x9a7   :  { %3900 = vst.sshfl [vmem:[#allocation3 + $0xc] sm:$0x15 pattern:$0x73625140] %v2579_v55  ;;  %v2944_v63 = vunpack.c.l.bf16 %v2942_v5  ;;  %v3035_v55 = vunpack.c.l.bf16 %v3034_v34 }
 0x9a8   :  { %v2867_v57 = vpop.f32.mrb[40].mxu0  ;;  %v2908_v49 = vpop.f32.mrb[40].mxu1  ;;  %3901 = vst.sshfl [vmem:[#allocation3 + $0xf] sm:$0x15 pattern:$0x73625140] %v2602_v46 }
 0x9a9   :  { %v2916_v58 = vadd.f32 %v2915_v45, %v2867_v57  ;;  %v2869_v50 = vpop.f32.mrb[41].mxu0  ;;  %v4314_v51 = vpop.f32.mrb[41].mxu1  ;;  %3902 = vst.sshfl [vmem:[#allocation3 + $0x12] sm:$0x15 pattern:$0x73625140] %v2625_v35  ;;  %v2940_v4 = vadd.f32 %v5893_v20, %v2908_v49 }
 0x9aa   :  { %v2871_v61 = vpop.f32.mrb[42].mxu0  ;;  %v2911_v53 = vpop.f32.mrb[42].mxu1  ;;  %3903 = vst.sshfl [vmem:[#allocation3 + $0x15] sm:$0x15 pattern:$0x73625140] %v2648_v52  ;;  %v2927_v30 = vadd.f32 %v2926_v56, %v2869_v50 }
 0x9ab   :  { %v3928_v6 = vmul.f32 -1.442695, %v2916_v58  ;;  %v2872_v3 = vpop.f32.mrb[43].mxu0  ;;  %v4315_v62 = vpop.f32.mrb[43].mxu1  ;;  %v3044_v56 = vrot.slane %v3034_v34, 1 }
 0x9ac   :  { %v3929_v2 = vmul.f32 -1.442695, %v2927_v30 }
 0x9ad   :  { %4654 = vpow2.f32 %v3928_v6  ;;  %v3046_v58 = vunpack.c.l.bf16 %v3044_v56 }
 0x9ae   :  { %4656 = vpow2.f32 %v3929_v2  ;;  %v3056_v2 = vrot.slane %v3034_v34, 2 }
 0x9b7   :  { %v4655_v14 = vpop.eup %4654 }
 0x9b8   :  { %v2920_v31 = vadd.f32 1.0, %v4655_v14  ;;  %v4657_v33 = vpop.eup %4656 }
 0x9b9   :  { %v2931_v60 = vadd.f32 1.0, %v4657_v33 }
 0x9ba   :  { %4658 = vrcp.f32 %v2920_v31 }
 0x9bb   :  { %4660 = vrcp.f32 %v2931_v60 }
 0x9c4   :  { %v4659_v7 = vpop.eup %4658 }
 0x9c5   :  { %v2941_v47 = vmul.f32 %v4659_v7, %v2940_v4  ;;  %v4661_v42 = vpop.eup %4660  ;;  %v3058_v4 = vunpack.c.l.bf16 %v3056_v2 }
 0x9c6   :  { %v2947_v41 = vsub.f32 1.0, %v4661_v42  ;;  %v2949_v8 = vmul.f32 0.0, %v4661_v42 }
 0x9c7   :  { %v2945_v9 = vadd.f32 %v2944_v63, %v2941_v47 }
 0x9c9   :  { %4662 = vtanh.f32 %v2945_v9 }
 0x9d3   :  { %v4663_v16 = vpop.eup %4662 }
 0x9d4   :  { %v2948_v54 = vmul.f32 %v4663_v16, %v2947_v41 }
 0x9d6   :  { %v5896_v44 = vadd.f32 %v2949_v8, %v2948_v54  ;;  %v3149_v54 = vld [vmem:[#allocation3 + $0x6] sm:$0x7] }
 0x9d7   :  { %v3159_v8 = vrot.slane %v3149_v54, 1 }
 0x9d8   :  { %v2951_v45 = vpack.c.bf16 %v5896_v44, %v5896_v44 }
 0x9da   :  { %2952 = vst [vmem:[%s6234_s9] sm:$0x1] %v2951_v45  ;;  %2986 = vmatmul.mubr.bf16.vlgmr.msra.gmra.mrb[44].mxu0 %v2951_v45  ;;  %4333 = vmatmul.mubr.bf16.vlgmr.msra.gmra.mrb[44].mxu1 %v2951_v45 }
 0x9db   :  { %3069 = vmatpush1.bf16.msra.mxu0 %v5722_v36  ;;  %4337 = vmatpush3.bf16.msra.mxu1 %v5724_v59 }
 0x9dc   :  { %3070 = vmatprep.subr.bf16.mxu0 %v5726_v17  ;;  %4338 = vmatprep.subr.bf16.mxu1 %v4907_v0 }
 0x9dd   :  { %3100 = vmatprep.mubr.bf16.mxu0 %v4908_v1  ;;  %4352 = vmatprep.mubr.msk.bf16.mxu1 %vm4909_vm0, %v4907_v0 }
 0x9df   :  { %3071 = vmatpush1.bf16.msra.mxu0 %v5729_v18  ;;  %4339 = vmatpush3.bf16.msra.mxu1 %v5732_v19 }
 0x9e0   :  { %3072 = vmatprep.subr.bf16.mxu0 %v5735_v21  ;;  %4340 = vmatprep.subr.bf16.mxu1 %v4907_v0 }
 0x9e3   :  { %3073 = vmatpush1.bf16.msra.mxu0 %v5742_v23  ;;  %4341 = vmatpush3.bf16.msra.mxu1 %v5745_v22 }
 0x9e4   :  { %3074 = vmatprep.subr.bf16.mxu0 %v5748_v25  ;;  %4342 = vmatprep.subr.bf16.mxu1 %v4907_v0 }
 0x9e7   :  { %3075 = vmatpush1.bf16.msra.mxu0 %v5752_v27  ;;  %4343 = vmatpush3.bf16.msra.mxu1 %v5755_v29 }
 0x9e8   :  { %3076 = vmatprep.subr.bf16.mxu0 %v5758_v32  ;;  %4344 = vmatprep.subr.bf16.mxu1 %v4907_v0 }
 0x9eb   :  { %3077 = vmatpush1.bf16.msra.mxu0 %v5762_v24  ;;  %4345 = vmatpush3.bf16.msra.mxu1 %v5765_v26 }
 0x9ec   :  { %3078 = vmatprep.subr.bf16.mxu0 %v5768_v37  ;;  %4346 = vmatprep.subr.bf16.mxu1 %v4907_v0 }
 0x9ef   :  { %3079 = vmatpush1.bf16.msra.mxu0 %v5772_v38  ;;  %4347 = vmatpush3.bf16.msra.mxu1 %v5775_v10 }
 0x9f0   :  { %3080 = vmatprep.subr.bf16.mxu0 %v5778_v11  ;;  %4348 = vmatprep.subr.bf16.mxu1 %v4907_v0 }
 0x9f3   :  { %3081 = vmatpush1.bf16.msra.mxu0 %v5782_v13  ;;  %4349 = vmatpush3.bf16.msra.mxu1 %v5785_v28 }
 0x9f4   :  { %3082 = vmatprep.subr.bf16.mxu0 %v5788_v39  ;;  %4350 = vmatprep.subr.bf16.mxu1 %v4907_v0 }
 0x9f7   :  { %3083 = vmatpush1.bf16.msra.mxu0 %v5792_v40  ;;  %4351 = vmatpush3.bf16.msra.mxu1 %v5795_v43 }
 0x9f8   :  { %3183 = vmatprep.subr.bf16.mxu0 %v5707_v15  ;;  %4356 = vmatprep.subr.bf16.mxu1 %v4907_v0 }
 0xaad   :  { %v2987_v46 = vpop.f32.mrb[44].mxu0  ;;  %v3028_v48 = vpop.f32.mrb[44].mxu1 }
 0xaae   :  { %v3036_v12 = vadd.f32 %v3035_v55, %v2987_v46  ;;  %v2989_v57 = vpop.f32.mrb[45].mxu0  ;;  %v4334_v49 = vpop.f32.mrb[45].mxu1  ;;  %v3054_v31 = vadd.f32 %v5893_v20, %v3028_v48  ;;  %v3161_v48 = vunpack.c.l.bf16 %v3159_v8 }
 0xaaf   :  { %v2991_v50 = vpop.f32.mrb[46].mxu0  ;;  %v3031_v51 = vpop.f32.mrb[46].mxu1  ;;  %v3047_v53 = vadd.f32 %v3046_v58, %v2989_v57 }
 0xab0   :  { %v3931_v35 = vmul.f32 -1.442695, %v3036_v12  ;;  %v2992_v52 = vpop.f32.mrb[47].mxu0  ;;  %v4335_v61 = vpop.f32.mrb[47].mxu1 }
 0xab1   :  { %v3932_v6 = vmul.f32 -1.442695, %v3047_v53 }
 0xab2   :  { %4664 = vpow2.f32 %v3931_v35 }
 0xab3   :  { %4666 = vpow2.f32 %v3932_v6  ;;  %v3171_v6 = vrot.slane %v3149_v54, 2 }
 0xabc   :  { %v4665_v3 = vpop.eup %4664 }
 0xabd   :  { %v3040_v62 = vadd.f32 1.0, %v4665_v3  ;;  %v4667_v30 = vpop.eup %4666 }
 0xabe   :  { %v3051_v14 = vadd.f32 1.0, %v4667_v30 }
 0xabf   :  { %4668 = vrcp.f32 %v3040_v62 }
 0xac0   :  { %4670 = vrcp.f32 %v3051_v14  ;;  %v3173_v14 = vunpack.c.l.bf16 %v3171_v6 }
 0xac9   :  { %v4669_v33 = vpop.eup %4668 }
 0xaca   :  { %v3055_v60 = vmul.f32 %v4669_v33, %v3054_v31  ;;  %v4671_v7 = vpop.eup %4670 }
 0xacb   :  { %v3061_v47 = vsub.f32 1.0, %v4671_v7  ;;  %v3063_v42 = vmul.f32 %v4671_v7, %v5896_v44  ;;  %v3150_v44 = vunpack.c.l.bf16 %v3149_v54 }
 0xacc   :  { %v3059_v5 = vadd.f32 %v3058_v4, %v3055_v60 }
 0xace   :  { %4672 = vtanh.f32 %v3059_v5 }
 0xad8   :  { %v4673_v63 = vpop.eup %4672 }
 0xad9   :  { %v3062_v9 = vmul.f32 %v4673_v63, %v3061_v47 }
 0xadb   :  { %v5940_v41 = vadd.f32 %v3063_v42, %v3062_v9  ;;  %v3264_v9 = vld [vmem:[#allocation3 + $0x9] sm:$0x7] }
 0xadc   :  { %v3274_v42 = vrot.slane %v3264_v9, 1 }
 0xadd   :  { %v3065_v16 = vpack.c.bf16 %v5940_v41, %v5940_v41 }
 0xadf   :  { %3933 = vst [vmem:[%s6234_s9 + $0x1] sm:$0x1] %v3065_v16  ;;  %3101 = vmatmul.mubr.bf16.vlgmr.msra.gmra.mrb[48].mxu0 %v3065_v16  ;;  %4353 = vmatmul.mubr.bf16.vlgmr.msra.gmra.mrb[48].mxu1 %v3065_v16 }
 0xae0   :  { %3184 = vmatpush1.bf16.msra.mxu0 %v5722_v36  ;;  %4357 = vmatpush3.bf16.msra.mxu1 %v5724_v59 }
 0xae1   :  { %3185 = vmatprep.subr.bf16.mxu0 %v5726_v17  ;;  %4358 = vmatprep.subr.bf16.mxu1 %v4907_v0 }
 0xae2   :  { %3215 = vmatprep.mubr.bf16.mxu0 %v4908_v1  ;;  %4372 = vmatprep.mubr.msk.bf16.mxu1 %vm4909_vm0, %v4907_v0 }
 0xae4   :  { %3186 = vmatpush1.bf16.msra.mxu0 %v5729_v18  ;;  %4359 = vmatpush3.bf16.msra.mxu1 %v5732_v19 }
 0xae5   :  { %3187 = vmatprep.subr.bf16.mxu0 %v5735_v21  ;;  %4360 = vmatprep.subr.bf16.mxu1 %v4907_v0 }
 0xae8   :  { %3188 = vmatpush1.bf16.msra.mxu0 %v5742_v23  ;;  %4361 = vmatpush3.bf16.msra.mxu1 %v5745_v22 }
 0xae9   :  { %3189 = vmatprep.subr.bf16.mxu0 %v5748_v25  ;;  %4362 = vmatprep.subr.bf16.mxu1 %v4907_v0 }
 0xaec   :  { %3190 = vmatpush1.bf16.msra.mxu0 %v5752_v27  ;;  %4363 = vmatpush3.bf16.msra.mxu1 %v5755_v29 }
 0xaed   :  { %3191 = vmatprep.subr.bf16.mxu0 %v5758_v32  ;;  %4364 = vmatprep.subr.bf16.mxu1 %v4907_v0 }
 0xaf0   :  { %3192 = vmatpush1.bf16.msra.mxu0 %v5762_v24  ;;  %4365 = vmatpush3.bf16.msra.mxu1 %v5765_v26 }
 0xaf1   :  { %3193 = vmatprep.subr.bf16.mxu0 %v5768_v37  ;;  %4366 = vmatprep.subr.bf16.mxu1 %v4907_v0 }
 0xaf4   :  { %3194 = vmatpush1.bf16.msra.mxu0 %v5772_v38  ;;  %4367 = vmatpush3.bf16.msra.mxu1 %v5775_v10 }
 0xaf5   :  { %3195 = vmatprep.subr.bf16.mxu0 %v5778_v11  ;;  %4368 = vmatprep.subr.bf16.mxu1 %v4907_v0 }
 0xaf8   :  { %3196 = vmatpush1.bf16.msra.mxu0 %v5782_v13  ;;  %4369 = vmatpush3.bf16.msra.mxu1 %v5785_v28 }
 0xaf9   :  { %3197 = vmatprep.subr.bf16.mxu0 %v5788_v39  ;;  %4370 = vmatprep.subr.bf16.mxu1 %v4907_v0 }
 0xafc   :  { %3198 = vmatpush1.bf16.msra.mxu0 %v5792_v40  ;;  %4371 = vmatpush3.bf16.msra.mxu1 %v5795_v43 }
 0xafd   :  { %3298 = vmatprep.subr.bf16.mxu0 %v5707_v15  ;;  %4376 = vmatprep.subr.bf16.mxu1 %v4907_v0 }
 0xbb2   :  { %v3102_v45 = vpop.f32.mrb[48].mxu0  ;;  %v3143_v34 = vpop.f32.mrb[48].mxu1 }
 0xbb3   :  { %v3151_v56 = vadd.f32 %v3150_v44, %v3102_v45  ;;  %v3104_v55 = vpop.f32.mrb[49].mxu0  ;;  %v4354_v46 = vpop.f32.mrb[49].mxu1  ;;  %v3169_v62 = vadd.f32 %v5893_v20, %v3143_v34  ;;  %v3276_v34 = vunpack.c.l.bf16 %v3274_v42 }
 0xbb4   :  { %v3106_v12 = vpop.f32.mrb[50].mxu0  ;;  %v3146_v57 = vpop.f32.mrb[50].mxu1  ;;  %v3162_v51 = vadd.f32 %v3161_v48, %v3104_v55 }
 0xbb5   :  { %v3934_v49 = vmul.f32 -1.442695, %v3151_v56  ;;  %v3107_v58 = vpop.f32.mrb[51].mxu0  ;;  %v4355_v50 = vpop.f32.mrb[51].mxu1 }
 0xbb6   :  { %v3935_v35 = vmul.f32 -1.442695, %v3162_v51  ;;  %v3286_v51 = vrot.slane %v3264_v9, 2 }
 0xbb7   :  { %4674 = vpow2.f32 %v3934_v49 }
 0xbb8   :  { %4676 = vpow2.f32 %v3935_v35  ;;  %v3288_v6 = vunpack.c.l.bf16 %v3286_v51  ;;  %v6127_v51 = vld [vmem:[#allocation9 + $0x68] ss:$12 sps:$4 sm:$0xff]  }
 0xbc1   :  { %v4675_v52 = vpop.eup %4674 }
 0xbc2   :  { %v3155_v61 = vadd.f32 1.0, %v4675_v52  ;;  %v4677_v53 = vpop.eup %4676 }
 0xbc3   :  { %v3166_v3 = vadd.f32 1.0, %v4677_v53 }
 0xbc4   :  { %4678 = vrcp.f32 %v3155_v61 }
 0xbc5   :  { %4680 = vrcp.f32 %v3166_v3 }
 0xbce   :  { %v4679_v30 = vpop.eup %4678 }
 0xbcf   :  { %v3170_v2 = vmul.f32 %v4679_v30, %v3169_v62  ;;  %v4681_v33 = vpop.eup %4680 }
 0xbd0   :  { %v3176_v60 = vsub.f32 1.0, %v4681_v33  ;;  %v3178_v7 = vmul.f32 %v4681_v33, %v5940_v41  ;;  %v3265_v41 = vunpack.c.l.bf16 %v3264_v9 }
 0xbd1   :  { %v3174_v31 = vadd.f32 %v3173_v14, %v3170_v2 }
 0xbd3   :  { %4682 = vtanh.f32 %v3174_v31 }
 0xbdd   :  { %v4683_v4 = vpop.eup %4682 }
 0xbde   :  { %v3177_v5 = vmul.f32 %v4683_v4, %v3176_v60 }
 0xbe0   :  { %v5984_v47 = vadd.f32 %v3178_v7, %v3177_v5 }
 0xbe2   :  { %v3180_v63 = vpack.c.bf16 %v5984_v47, %v5984_v47 }
 0xbe4   :  { %3936 = vst [vmem:[%s6234_s9 + $0x2] sm:$0x1] %v3180_v63  ;;  %3216 = vmatmul.mubr.bf16.vlgmr.msra.gmra.mrb[52].mxu0 %v3180_v63  ;;  %4373 = vmatmul.mubr.bf16.vlgmr.msra.gmra.mrb[52].mxu1 %v3180_v63 }
 0xbe5   :  { %3299 = vmatpush1.bf16.msra.mxu0 %v5722_v36  ;;  %4377 = vmatpush3.bf16.msra.mxu1 %v5724_v59 }
 0xbe6   :  { %3300 = vmatprep.subr.bf16.mxu0 %v5726_v17  ;;  %4378 = vmatprep.subr.bf16.mxu1 %v4907_v0 }
 0xbe7   :  { %3330 = vmatprep.mubr.bf16.mxu0 %v4908_v1  ;;  %4392 = vmatprep.mubr.msk.bf16.mxu1 %vm4909_vm0, %v4907_v0 }
 0xbe9   :  { %3301 = vmatpush1.bf16.msra.mxu0 %v5729_v18  ;;  %4379 = vmatpush3.bf16.msra.mxu1 %v5732_v19 }
 0xbea   :  { %3302 = vmatprep.subr.bf16.mxu0 %v5735_v21  ;;  %4380 = vmatprep.subr.bf16.mxu1 %v4907_v0 }
 0xbed   :  { %3303 = vmatpush1.bf16.msra.mxu0 %v5742_v23  ;;  %4381 = vmatpush3.bf16.msra.mxu1 %v5745_v22 }
 0xbee   :  { %3304 = vmatprep.subr.bf16.mxu0 %v5748_v25  ;;  %4382 = vmatprep.subr.bf16.mxu1 %v4907_v0 }
 0xbf1   :  { %3305 = vmatpush1.bf16.msra.mxu0 %v5752_v27  ;;  %4383 = vmatpush3.bf16.msra.mxu1 %v5755_v29 }
 0xbf2   :  { %3306 = vmatprep.subr.bf16.mxu0 %v5758_v32  ;;  %4384 = vmatprep.subr.bf16.mxu1 %v4907_v0 }
 0xbf5   :  { %3307 = vmatpush1.bf16.msra.mxu0 %v5762_v24  ;;  %4385 = vmatpush3.bf16.msra.mxu1 %v5765_v26 }
 0xbf6   :  { %3308 = vmatprep.subr.bf16.mxu0 %v5768_v37  ;;  %4386 = vmatprep.subr.bf16.mxu1 %v4907_v0 }
 0xbf9   :  { %3309 = vmatpush1.bf16.msra.mxu0 %v5772_v38  ;;  %4387 = vmatpush3.bf16.msra.mxu1 %v5775_v10 }
 0xbfa   :  { %3310 = vmatprep.subr.bf16.mxu0 %v5778_v11  ;;  %4388 = vmatprep.subr.bf16.mxu1 %v4907_v0 }
 0xbfd   :  { %3311 = vmatpush1.bf16.msra.mxu0 %v5782_v13  ;;  %4389 = vmatpush3.bf16.msra.mxu1 %v5785_v28 }
 0xbfe   :  { %3312 = vmatprep.subr.bf16.mxu0 %v5788_v39  ;;  %4390 = vmatprep.subr.bf16.mxu1 %v4907_v0 }
 0xc01   :  { %3313 = vmatpush1.bf16.msra.mxu0 %v5792_v40  ;;  %4391 = vmatpush3.bf16.msra.mxu1 %v5795_v43 }
 0xc02   :  { %3413 = vmatprep.subr.bf16.mxu0 %v5707_v15  ;;  %4396 = vmatprep.subr.bf16.mxu1 %v4907_v0 }
 0xcb7   :  { %v3217_v16 = vpop.f32.mrb[52].mxu0  ;;  %v3258_v54 = vpop.f32.mrb[52].mxu1 }
 0xcb8   :  { %v3266_v8 = vadd.f32 %v3265_v41, %v3217_v16  ;;  %v3219_v44 = vpop.f32.mrb[53].mxu0  ;;  %v4374_v45 = vpop.f32.mrb[53].mxu1  ;;  %v3284_v52 = vadd.f32 %v5893_v20, %v3258_v54 }
 0xcb9   :  { %v3221_v56 = vpop.f32.mrb[54].mxu0  ;;  %v3261_v55 = vpop.f32.mrb[54].mxu1  ;;  %v3277_v57 = vadd.f32 %v3276_v34, %v3219_v44  ;;  %v6081_v44 = vld [vmem:[#allocation9] ss:$12 sps:$4 sm:$0xff]   ;;  %v6084_v45 = vld [vmem:[#allocation9 + $0x8] ss:$12 sps:$4 sm:$0xff]  }
 0xcba   :  { %v3937_v46 = vmul.f32 -1.442695, %v3266_v8  ;;  %v3222_v48 = vpop.f32.mrb[55].mxu0  ;;  %v4375_v12 = vpop.f32.mrb[55].mxu1  ;;  %v6087_v34 = vld [vmem:[#allocation9 + $0x1c] ss:$12 sps:$4 sm:$0xff]  }
 0xcbb   :  { %v3938_v49 = vmul.f32 -1.442695, %v3277_v57  ;;  %v6094_v56 = vld [vmem:[#allocation9 + $0x18] ss:$12 sps:$4 sm:$0xff]   ;;  %v6097_v55 = vld [vmem:[#allocation9 + $0x20] ss:$12 sps:$4 sm:$0xff]  }
 0xcbc   :  { %4684 = vpow2.f32 %v3937_v46  ;;  %v6100_v46 = vld [vmem:[#allocation9 + $0x34] ss:$12 sps:$4 sm:$0xff]   ;;  %v6104_v48 = vld [vmem:[#allocation9 + $0x30] ss:$12 sps:$4 sm:$0xff]   ;;  %v6107_v12 = vld [vmem:[#allocation9 + $0x38] ss:$12 sps:$4 sm:$0xff]  }
 0xcbd   :  { %4686 = vpow2.f32 %v3938_v49  ;;  %v6110_v57 = vld [vmem:[#allocation9 + $0x4c] ss:$12 sps:$4 sm:$0xff]   ;;  %v6114_v49 = vld [vmem:[#allocation9 + $0x48] ss:$12 sps:$4 sm:$0xff]  }
 0xcc6   :  { %v4685_v15 = vpop.eup %4684 }
 0xcc7   :  { %v3270_v58 = vadd.f32 1.0, %v4685_v15  ;;  %v4687_v50 = vpop.eup %4686  ;;  %v6117_v15 = vld [vmem:[#allocation9 + $0x50] ss:$12 sps:$4 sm:$0xff]  }
 0xcc8   :  { %v3281_v35 = vadd.f32 1.0, %v4687_v50  ;;  %v6124_v50 = vld [vmem:[#allocation9 + $0x60] ss:$12 sps:$4 sm:$0xff]  }
 0xcc9   :  { %4688 = vrcp.f32 %v3270_v58  ;;  %v6120_v58 = vld [vmem:[#allocation9 + $0x64] ss:$12 sps:$4 sm:$0xff]  }
 0xcca   :  { %4690 = vrcp.f32 %v3281_v35  ;;  %v6130_v35 = vld [vmem:[#allocation9 + $0x7c] ss:$12 sps:$4 sm:$0xff]  }
 0xcd3   :  { %v4689_v61 = vpop.eup %4688 }
 0xcd4   :  { %v3285_v53 = vmul.f32 %v4689_v61, %v3284_v52  ;;  %v4691_v62 = vpop.eup %4690  ;;  %v6134_v52 = vld [vmem:[#allocation9 + $0x78] ss:$12 sps:$4 sm:$0xff]   ;;  %v6137_v61 = vld [vmem:[#allocation9 + $0x80] ss:$12 sps:$4 sm:$0xff]  }
 0xcd5   :  { %v3291_v30 = vsub.f32 1.0, %v4691_v62  ;;  %v3293_v31 = vmul.f32 %v4691_v62, %v5984_v47  ;;  %v6150_v62 = vld [vmem:[#allocation9 + $0xac] ss:$12 sps:$4 sm:$0xff]  }
 0xcd6   :  { %v3289_v3 = vadd.f32 %v3288_v6, %v3285_v53  ;;  %v6140_v53 = vld [vmem:[#allocation9 + $0x94] ss:$12 sps:$4 sm:$0xff]   ;;  %v6144_v6 = vld [vmem:[#allocation9 + $0x90] ss:$12 sps:$4 sm:$0xff]  }
 0xcd8   :  { %4692 = vtanh.f32 %v3289_v3  ;;  %v6147_v3 = vld [vmem:[#allocation9 + $0x98] ss:$12 sps:$4 sm:$0xff]  }
 0xce2   :  { %v4693_v2 = vpop.eup %4692 }
 0xce3   :  { %v3292_v14 = vmul.f32 %v4693_v2, %v3291_v30  ;;  %v6154_v30 = vld [vmem:[#allocation9 + $0xa8] ss:$12 sps:$4 sm:$0xff]   ;;  %v6157_v2 = vld [vmem:[#allocation9 + $0xb0] ss:$12 sps:$4 sm:$0xff]  }
 0xce5   :  { %v6028_v33 = vadd.f32 %v3293_v31, %v3292_v14  ;;  %v3494_v14 = vld [vmem:[#allocation3 + $0xf] sm:$0x7] }
 0xce6   :  { %v3504_v31 = vrot.slane %v3494_v14, 1 }
 0xce7   :  { %v3295_v60 = vpack.c.bf16 %v6028_v33, %v6028_v33 }
 0xce9   :  { %3939 = vst [vmem:[%s6234_s9 + $0x3] sm:$0x1] %v3295_v60  ;;  %3331 = vmatmul.mubr.bf16.vlgmr.msra.gmra.mrb[56].mxu0 %v3295_v60  ;;  %4393 = vmatmul.mubr.bf16.vlgmr.msra.gmra.mrb[56].mxu1 %v3295_v60 }
 0xcea   :  { %3414 = vmatpush1.bf16.msra.mxu0 %v5722_v36  ;;  %4397 = vmatpush3.bf16.msra.mxu1 %v5724_v59  ;;  %v6068_v36 = vld [vmem:[#allocation9 + $0x4] ss:$12 sps:$4 sm:$0xff]  }
 0xceb   :  { %3415 = vmatprep.subr.bf16.mxu0 %v5726_v17  ;;  %4398 = vmatprep.subr.bf16.mxu1 %v4907_v0  ;;  %v3379_v59 = vld [vmem:[#allocation3 + $0xc] sm:$0x7] }
 0xcec   :  { %3445 = vmatprep.mubr.bf16.mxu0 %v4908_v1  ;;  %4412 = vmatprep.mubr.msk.bf16.mxu1 %vm4909_vm0, %v4907_v0  ;;  %v3389_v17 = vrot.slane %v3379_v59, 1 }
 0xcee   :  { %3416 = vmatpush1.bf16.msra.mxu0 %v5729_v18  ;;  %4399 = vmatpush3.bf16.msra.mxu1 %v5732_v19  ;;  %v3380_v18 = vunpack.c.l.bf16 %v3379_v59 }
 0xcef   :  { %3417 = vmatprep.subr.bf16.mxu0 %v5735_v21  ;;  %4400 = vmatprep.subr.bf16.mxu1 %v4907_v0 }
 0xcf2   :  { %3418 = vmatpush1.bf16.msra.mxu0 %v5742_v23  ;;  %4401 = vmatpush3.bf16.msra.mxu1 %v5745_v22 }
 0xcf3   :  { %3419 = vmatprep.subr.bf16.mxu0 %v5748_v25  ;;  %4402 = vmatprep.subr.bf16.mxu1 %v4907_v0 }
 0xcf6   :  { %3420 = vmatpush1.bf16.msra.mxu0 %v5752_v27  ;;  %4403 = vmatpush3.bf16.msra.mxu1 %v5755_v29  ;;  %v3391_v27 = vunpack.c.l.bf16 %v3389_v17 }
 0xcf7   :  { %3421 = vmatprep.subr.bf16.mxu0 %v5758_v32  ;;  %4404 = vmatprep.subr.bf16.mxu1 %v4907_v0 }
 0xcfa   :  { %3422 = vmatpush1.bf16.msra.mxu0 %v5762_v24  ;;  %4405 = vmatpush3.bf16.msra.mxu1 %v5765_v26 }
 0xcfb   :  { %3423 = vmatprep.subr.bf16.mxu0 %v5768_v37  ;;  %4406 = vmatprep.subr.bf16.mxu1 %v4907_v0 }
 0xcfe   :  { %3424 = vmatpush1.bf16.msra.mxu0 %v5772_v38  ;;  %4407 = vmatpush3.bf16.msra.mxu1 %v5775_v10 }
 0xcff   :  { %3425 = vmatprep.subr.bf16.mxu0 %v5778_v11  ;;  %4408 = vmatprep.subr.bf16.mxu1 %v4907_v0 }
 0xd02   :  { %3426 = vmatpush1.bf16.msra.mxu0 %v5782_v13  ;;  %4409 = vmatpush3.bf16.msra.mxu1 %v5785_v28 }
 0xd03   :  { %3427 = vmatprep.subr.bf16.mxu0 %v5788_v39  ;;  %4410 = vmatprep.subr.bf16.mxu1 %v4907_v0  ;;  %v3401_v39 = vrot.slane %v3379_v59, 2 }
 0xd05   :  { %v3403_v7 = vunpack.c.l.bf16 %v3401_v39 }
 0xd06   :  { %3428 = vmatpush1.bf16.msra.mxu0 %v5792_v40  ;;  %4411 = vmatpush3.bf16.msra.mxu1 %v5795_v43 }
 0xd07   :  { %3528 = vmatprep.subr.bf16.mxu0 %v6068_v36  ;;  %4416 = vmatprep.subr.bf16.mxu1 %v4907_v0 }
 0xdbc   :  { %v3332_v19 = vpop.f32.mrb[56].mxu0  ;;  %v3373_v21 = vpop.f32.mrb[56].mxu1 }
 0xdbd   :  { %v3381_v23 = vadd.f32 %v3380_v18, %v3332_v19  ;;  %v3334_v22 = vpop.f32.mrb[57].mxu0  ;;  %v4394_v25 = vpop.f32.mrb[57].mxu1  ;;  %v3399_v43 = vadd.f32 %v5893_v20, %v3373_v21  ;;  %v3506_v21 = vunpack.c.l.bf16 %v3504_v31 }
 0xdbe   :  { %v3336_v29 = vpop.f32.mrb[58].mxu0  ;;  %v3376_v32 = vpop.f32.mrb[58].mxu1  ;;  %v3392_v38 = vadd.f32 %v3391_v27, %v3334_v22 }
 0xdbf   :  { %v3940_v24 = vmul.f32 -1.442695, %v3381_v23  ;;  %v3337_v26 = vpop.f32.mrb[59].mxu0  ;;  %v4395_v37 = vpop.f32.mrb[59].mxu1 }
 0xdc0   :  { %v3941_v10 = vmul.f32 -1.442695, %v3392_v38  ;;  %v3516_v38 = vrot.slane %v3494_v14, 2 }
 0xdc1   :  { %4694 = vpow2.f32 %v3940_v24 }
 0xdc2   :  { %4696 = vpow2.f32 %v3941_v10  ;;  %v3518_v39 = vunpack.c.l.bf16 %v3516_v38 }
 0xdcb   :  { %v4695_v11 = vpop.eup %4694 }
 0xdcc   :  { %v3385_v13 = vadd.f32 1.0, %v4695_v11  ;;  %v4697_v28 = vpop.eup %4696 }
 0xdcd   :  { %v3396_v40 = vadd.f32 1.0, %v4697_v28 }
 0xdce   :  { %4698 = vrcp.f32 %v3385_v13 }
 0xdcf   :  { %4700 = vrcp.f32 %v3396_v40 }
 0xdd8   :  { %v4699_v4 = vpop.eup %4698 }
 0xdd9   :  { %v3400_v5 = vmul.f32 %v4699_v4, %v3399_v43  ;;  %v4701_v63 = vpop.eup %4700 }
 0xdda   :  { %v3406_v9 = vsub.f32 1.0, %v4701_v63  ;;  %v3408_v16 = vmul.f32 %v4701_v63, %v6028_v33  ;;  %v3495_v33 = vunpack.c.l.bf16 %v3494_v14 }
 0xddb   :  { %v3404_v47 = vadd.f32 %v3403_v7, %v3400_v5 }
 0xddd   :  { %4702 = vtanh.f32 %v3404_v47 }
 0xde7   :  { %v4703_v42 = vpop.eup %4702 }
 0xde8   :  { %v3407_v41 = vmul.f32 %v4703_v42, %v3406_v9 }
 0xdea   :  { %v6074_v54 = vadd.f32 %v3408_v16, %v3407_v41 }
 0xdec   :  { %v3410_v8 = vpack.c.bf16 %v6074_v54, %v6074_v54 }
 0xdee   :  { %3942 = vst [vmem:[%s6234_s9 + $0x4] sm:$0x1] %v3410_v8  ;;  %3446 = vmatmul.mubr.bf16.vlgmr.msra.gmra.mrb[60].mxu0 %v3410_v8  ;;  %4413 = vmatmul.mubr.bf16.vlgmr.msra.gmra.mrb[60].mxu1 %v3410_v8 }
 0xdef   :  { %3529 = vmatpush1.bf16.msra.mxu0 %v6081_v44  ;;  %4417 = vmatpush3.bf16.msra.mxu1 %v6084_v45 }
 0xdf0   :  { %3530 = vmatprep.subr.bf16.mxu0 %v6087_v34  ;;  %4418 = vmatprep.subr.bf16.mxu1 %v4907_v0 }
 0xdf1   :  { %3560 = vmatprep.mubr.bf16.mxu0 %v4908_v1  ;;  %4432 = vmatprep.mubr.msk.bf16.mxu1 %vm4909_vm0, %v4907_v0 }
 0xdf3   :  { %3531 = vmatpush1.bf16.msra.mxu0 %v6094_v56  ;;  %4419 = vmatpush3.bf16.msra.mxu1 %v6097_v55 }
 0xdf4   :  { %3532 = vmatprep.subr.bf16.mxu0 %v6100_v46  ;;  %4420 = vmatprep.subr.bf16.mxu1 %v4907_v0 }
 0xdf7   :  { %3533 = vmatpush1.bf16.msra.mxu0 %v6104_v48  ;;  %4421 = vmatpush3.bf16.msra.mxu1 %v6107_v12 }
 0xdf8   :  { %3534 = vmatprep.subr.bf16.mxu0 %v6110_v57  ;;  %4422 = vmatprep.subr.bf16.mxu1 %v4907_v0 }
 0xdfb   :  { %3535 = vmatpush1.bf16.msra.mxu0 %v6114_v49  ;;  %4423 = vmatpush3.bf16.msra.mxu1 %v6117_v15 }
 0xdfc   :  { %3536 = vmatprep.subr.bf16.mxu0 %v6120_v58  ;;  %4424 = vmatprep.subr.bf16.mxu1 %v4907_v0 }
 0xdff   :  { %3537 = vmatpush1.bf16.msra.mxu0 %v6124_v50  ;;  %4425 = vmatpush3.bf16.msra.mxu1 %v6127_v51 }
 0xe00   :  { %3538 = vmatprep.subr.bf16.mxu0 %v6130_v35  ;;  %4426 = vmatprep.subr.bf16.mxu1 %v4907_v0 }
 0xe03   :  { %3539 = vmatpush1.bf16.msra.mxu0 %v6134_v52  ;;  %4427 = vmatpush3.bf16.msra.mxu1 %v6137_v61 }
 0xe04   :  { %3540 = vmatprep.subr.bf16.mxu0 %v6140_v53  ;;  %4428 = vmatprep.subr.bf16.mxu1 %v4907_v0 }
 0xe07   :  { %3541 = vmatpush1.bf16.msra.mxu0 %v6144_v6  ;;  %4429 = vmatpush3.bf16.msra.mxu1 %v6147_v3 }
 0xe08   :  { %3542 = vmatprep.subr.bf16.mxu0 %v6150_v62  ;;  %4430 = vmatprep.subr.bf16.mxu1 %v4907_v0 }
 0xe0b   :  { %3543 = vmatpush1.bf16.msra.mxu0 %v6154_v30  ;;  %4431 = vmatpush3.bf16.msra.mxu1 %v6157_v2 }
 0xe0c   :  { %3643 = vmatprep.subr.bf16.mxu0 %v6068_v36  ;;  %4436 = vmatprep.subr.bf16.mxu1 %v4907_v0 }
 0xec1   :  { %v3447_v60 = vpop.f32.mrb[60].mxu0  ;;  %v3488_v59 = vpop.f32.mrb[60].mxu1 }
 0xec2   :  { %v3496_v17 = vadd.f32 %v3495_v33, %v3447_v60  ;;  %v3449_v18 = vpop.f32.mrb[61].mxu0  ;;  %v4414_v19 = vpop.f32.mrb[61].mxu1  ;;  %v3514_v11 = vadd.f32 %v5893_v20, %v3488_v59  ;;  %v3724_v60 = vld [vmem:[#allocation3 + $0x15] sm:$0x7] }
 0xec3   :  { %v3451_v23 = vpop.f32.mrb[62].mxu0  ;;  %v3491_v22 = vpop.f32.mrb[62].mxu1  ;;  %v3507_v32 = vadd.f32 %v3506_v21, %v3449_v18  ;;  %v3734_v59 = vrot.slane %v3724_v60, 1 }
 0xec4   :  { %v3943_v25 = vmul.f32 -1.442695, %v3496_v17  ;;  %v3452_v27 = vpop.f32.mrb[63].mxu0  ;;  %v4415_v29 = vpop.f32.mrb[63].mxu1  ;;  %v3725_v17 = vunpack.c.l.bf16 %v3724_v60 }
 0xec5   :  { %v3944_v24 = vmul.f32 -1.442695, %v3507_v32 }
 0xec6   :  { %4704 = vpow2.f32 %v3943_v25  ;;  %v3736_v25 = vunpack.c.l.bf16 %v3734_v59 }
 0xec7   :  { %4706 = vpow2.f32 %v3944_v24 }
 0xed0   :  { %v4705_v36 = vpop.eup %4704 }
 0xed1   :  { %v3500_v26 = vadd.f32 1.0, %v4705_v36  ;;  %v4707_v37 = vpop.eup %4706 }
 0xed2   :  { %v3511_v10 = vadd.f32 1.0, %v4707_v37 }
 0xed3   :  { %4708 = vrcp.f32 %v3500_v26 }
 0xed4   :  { %4710 = vrcp.f32 %v3511_v10 }
 0xedd   :  { %v4709_v13 = vpop.eup %4708 }
 0xede   :  { %v3515_v28 = vmul.f32 %v4709_v13, %v3514_v11  ;;  %v4711_v43 = vpop.eup %4710  ;;  %v3746_v13 = vrot.slane %v3724_v60, 2 }
 0xedf   :  { %v3521_v4 = vsub.f32 1.0, %v4711_v43  ;;  %v3523_v47 = vmul.f32 %v4711_v43, %v6074_v54 }
 0xee0   :  { %v3519_v40 = vadd.f32 %v3518_v39, %v3515_v28 }
 0xee2   :  { %4712 = vtanh.f32 %v3519_v40 }
 0xeec   :  { %v4713_v5 = vpop.eup %4712 }
 0xeed   :  { %v3522_v7 = vmul.f32 %v4713_v5, %v3521_v4  ;;  %v3748_v4 = vunpack.c.l.bf16 %v3746_v13 }
 0xeef   :  { %v6164_v63 = vadd.f32 %v3523_v47, %v3522_v7 }
 0xef1   :  { %v3525_v9 = vpack.c.bf16 %v6164_v63, %v6164_v63 }
 0xef3   :  { %3945 = vst [vmem:[%s6234_s9 + $0x5] sm:$0x1] %v3525_v9  ;;  %3561 = vmatmul.mubr.bf16.vlgmr.msra.gmra.mrb[64].mxu0 %v3525_v9  ;;  %4433 = vmatmul.mubr.bf16.vlgmr.msra.gmra.mrb[64].mxu1 %v3525_v9 }
 0xef4   :  { %3644 = vmatpush1.bf16.msra.mxu0 %v6081_v44  ;;  %4437 = vmatpush3.bf16.msra.mxu1 %v6084_v45 }
 0xef5   :  { %3645 = vmatprep.subr.bf16.mxu0 %v6087_v34  ;;  %4438 = vmatprep.subr.bf16.mxu1 %v4907_v0 }
 0xef6   :  { %3675 = vmatprep.mubr.bf16.mxu0 %v4908_v1  ;;  %4452 = vmatprep.mubr.msk.bf16.mxu1 %vm4909_vm0, %v4907_v0  ;;  %v3609_v1 = vld [vmem:[#allocation3 + $0x12] sm:$0x7] }
 0xef7   :  { %v3619_v42 = vrot.slane %v3609_v1, 1  ;;  %v3610_v41 = vunpack.c.l.bf16 %v3609_v1 }
 0xef8   :  { %3646 = vmatpush1.bf16.msra.mxu0 %v6094_v56  ;;  %4439 = vmatpush3.bf16.msra.mxu1 %v6097_v55 }
 0xef9   :  { %3647 = vmatprep.subr.bf16.mxu0 %v6100_v46  ;;  %4440 = vmatprep.subr.bf16.mxu1 %v4907_v0  ;;  %v3621_v34 = vunpack.c.l.bf16 %v3619_v42 }
 0xefc   :  { %3648 = vmatpush1.bf16.msra.mxu0 %v6104_v48  ;;  %4441 = vmatpush3.bf16.msra.mxu1 %v6107_v12 }
 0xefd   :  { %3649 = vmatprep.subr.bf16.mxu0 %v6110_v57  ;;  %4442 = vmatprep.subr.bf16.mxu1 %v4907_v0 }
 0xf00   :  { %3650 = vmatpush1.bf16.msra.mxu0 %v6114_v49  ;;  %4443 = vmatpush3.bf16.msra.mxu1 %v6117_v15 }
 0xf01   :  { %3651 = vmatprep.subr.bf16.mxu0 %v6120_v58  ;;  %4444 = vmatprep.subr.bf16.mxu1 %v4907_v0 }
 0xf04   :  { %3652 = vmatpush1.bf16.msra.mxu0 %v6124_v50  ;;  %4445 = vmatpush3.bf16.msra.mxu1 %v6127_v51  ;;  %v3631_v50 = vrot.slane %v3609_v1, 2 }
 0xf05   :  { %3653 = vmatprep.subr.bf16.mxu0 %v6130_v35  ;;  %4446 = vmatprep.subr.bf16.mxu1 %v4907_v0 }
 0xf08   :  { %3654 = vmatpush1.bf16.msra.mxu0 %v6134_v52  ;;  %4447 = vmatpush3.bf16.msra.mxu1 %v6137_v61 }
 0xf09   :  { %3655 = vmatprep.subr.bf16.mxu0 %v6140_v53  ;;  %4448 = vmatprep.subr.bf16.mxu1 %v4907_v0  ;;  %v3633_v53 = vunpack.c.l.bf16 %v3631_v50 }
 0xf0c   :  { %3656 = vmatpush1.bf16.msra.mxu0 %v6144_v6  ;;  %4449 = vmatpush3.bf16.msra.mxu1 %v6147_v3 }
 0xf0d   :  { %3657 = vmatprep.subr.bf16.mxu0 %v6150_v62  ;;  %4450 = vmatprep.subr.bf16.mxu1 %v4907_v0 }
 0xf10   :  { %3658 = vmatpush1.bf16.msra.mxu0 %v6154_v30  ;;  %4451 = vmatpush3.bf16.msra.mxu1 %v6157_v2 }
 0xfc6   :  { %v3562_v16 = vpop.f32.mrb[64].mxu0  ;;  %v3603_v54 = vpop.f32.mrb[64].mxu1 }
 0xfc7   :  { %v3611_v8 = vadd.f32 %v3610_v41, %v3562_v16  ;;  %v3564_v44 = vpop.f32.mrb[65].mxu0  ;;  %v4434_v45 = vpop.f32.mrb[65].mxu1  ;;  %v3629_v35 = vadd.f32 %v5893_v20, %v3603_v54 }
 0xfc8   :  { %v3566_v56 = vpop.f32.mrb[66].mxu0  ;;  %v3606_v55 = vpop.f32.mrb[66].mxu1  ;;  %v3622_v57 = vadd.f32 %v3621_v34, %v3564_v44 }
 0xfc9   :  { %v3946_v46 = vmul.f32 -1.442695, %v3611_v8  ;;  %v3567_v48 = vpop.f32.mrb[67].mxu0  ;;  %v4435_v12 = vpop.f32.mrb[67].mxu1 }
 0xfca   :  { %v3947_v0 = vmul.f32 -1.442695, %v3622_v57 }
 0xfcb   :  { %4714 = vpow2.f32 %v3946_v46 }
 0xfcc   :  { %4716 = vpow2.f32 %v3947_v0 }
 0xfd5   :  { %v4715_v49 = vpop.eup %4714 }
 0xfd6   :  { %v3615_v15 = vadd.f32 1.0, %v4715_v49  ;;  %v4717_v58 = vpop.eup %4716 }
 0xfd7   :  { %v3626_v51 = vadd.f32 1.0, %v4717_v58 }
 0xfd8   :  { %4718 = vrcp.f32 %v3615_v15 }
 0xfd9   :  { %4720 = vrcp.f32 %v3626_v51 }
 0xfe2   :  { %v4719_v52 = vpop.eup %4718 }
 0xfe3   :  { %v3630_v61 = vmul.f32 %v4719_v52, %v3629_v35  ;;  %v4721_v3 = vpop.eup %4720 }
 0xfe4   :  { %v3636_v62 = vsub.f32 1.0, %v4721_v3  ;;  %v3638_v14 = vmul.f32 %v4721_v3, %v6164_v63 }
 0xfe5   :  { %v3634_v6 = vadd.f32 %v3633_v53, %v3630_v61 }
 0xfe7   :  { %4722 = vtanh.f32 %v3634_v6 }
 0xff1   :  { %v4723_v30 = vpop.eup %4722 }
 0xff2   :  { %v3637_v2 = vmul.f32 %v4723_v30, %v3636_v62 }
 0xff4   :  { %v3639_v31 = vadd.f32 %v3638_v14, %v3637_v2 }
 0xff6   :  { %v3640_v33 = vpack.c.bf16 %v3639_v31, %v3639_v31 }
 0xff8   :  { %3948 = vst [vmem:[%s6234_s9 + $0x6] sm:$0x1] %v3640_v33  ;;  %3676 = vmatmul.mubr.bf16.vlgmr.msra.gmra.mrb[68].mxu0 %v3640_v33  ;;  %4453 = vmatmul.mubr.bf16.vlgmr.msra.gmra.mrb[68].mxu1 %v3640_v33 }
0x10cb   :  { %v3677_v18 = vpop.f32.mrb[68].mxu0  ;;  %v3718_v19 = vpop.f32.mrb[68].mxu1 }
0x10cc   :  { %v3726_v21 = vadd.f32 %v3725_v17, %v3677_v18  ;;  %v3679_v23 = vpop.f32.mrb[69].mxu0  ;;  %v4454_v22 = vpop.f32.mrb[69].mxu1  ;;  %v3744_v39 = vadd.f32 %v5893_v20, %v3718_v19 }
0x10cd   :  { %v3681_v27 = vpop.f32.mrb[70].mxu0  ;;  %v3721_v29 = vpop.f32.mrb[70].mxu1  ;;  %v3737_v26 = vadd.f32 %v3736_v25, %v3679_v23 }
0x10ce   :  { %v3949_v32 = vmul.f32 -1.442695, %v3726_v21  ;;  %v3682_v24 = vpop.f32.mrb[71].mxu0  ;;  %v4455_v36 = vpop.f32.mrb[71].mxu1 }
0x10cf   :  { %v3950_v37 = vmul.f32 -1.442695, %v3737_v26 }
0x10d0   :  { %4724 = vpow2.f32 %v3949_v32 }
0x10d1   :  { %4726 = vpow2.f32 %v3950_v37 }
0x10da   :  { %v4725_v38 = vpop.eup %4724 }
0x10db   :  { %v3730_v10 = vadd.f32 1.0, %v4725_v38  ;;  %v4727_v11 = vpop.eup %4726 }
0x10dc   :  { %v3741_v28 = vadd.f32 1.0, %v4727_v11 }
0x10dd   :  { %4728 = vrcp.f32 %v3730_v10 }
0x10de   :  { %4730 = vrcp.f32 %v3741_v28 }
0x10e7   :  { %v4729_v40 = vpop.eup %4728 }
0x10e8   :  { %v3745_v43 = vmul.f32 %v4729_v40, %v3744_v39  ;;  %v4731_v7 = vpop.eup %4730 }
0x10e9   :  { %v3751_v47 = vsub.f32 1.0, %v4731_v7  ;;  %v3753_v1 = vmul.f32 %v4731_v7, %v3639_v31 }
0x10ea   :  { %v3749_v5 = vadd.f32 %v3748_v4, %v3745_v43 }
0x10ec   :  { %4732 = vtanh.f32 %v3749_v5 }
0x10f6   :  { %v4733_v63 = vpop.eup %4732 }
0x10f7   :  { %v3752_v9 = vmul.f32 %v4733_v63, %v3751_v47 }
0x10f9   :  { %v3754_v42 = vadd.f32 %v3753_v1, %v3752_v9 }
0x10fb   :  { %v3755_v41 = vpack.c.bf16 %v3754_v42, %v3754_v42  ;;  %3759 = vst [vmem:[#allocation12 + $0x2] sm:$0x3] %v3754_v42 }
0x10fc   :  { %4882 = shalt.err (!%p4879_p8)
}
0x10fd   :  { %s4883_s30 = scalar_lea.hbm %s6235_s10, 64 }
0x10fe   :  { %p4884_p9 = scmp.ne.s32.totalorder %s6235_s10, %s4883_s30  ;;  %p4887_p10 = scmp.lt.u32.totalorder %s4883_s30, %s6235_s10 }
0x1100   :  { %p4889_p11 = pnand %p4887_p10, %p4884_p9 }
0x1102   :  { %4892 = shalt.err (!%p4889_p11)
}
0x1103   :  { %s4913_s13 = smov 32   ;;  %s4914_s2 = smov 2   ;;  %3951 = vst [vmem:[%s6234_s9 + $0x7] sm:$0x1] %v3755_v41 }
0x1104   :  { %3773 = dma.vmem_to_hbm [thread:$0]  %s3768_s24, 64, %s6235_s10, [#allocation6], %s4913_s13, %s4913_s13, %s4914_s2  }
0x1105   :  { %4899 = dma.done.wait [#allocation6], 64  }
0x1106   :  { %4900 = vsyncadd [#allocation6], 4294967232 }
0x1107   :  { %3779 = vsyncpa [#allocation5], 1 }
0x1108   :  { %3780 = vsyncpa [#allocation8], 1 }
0x1109   :  { %3781 = vsyncpa [#allocation11], 1 }
0x110a   :  { %3782 = vsyncpa [#allocation6], 1 }

</bundles_post_ra>
